<compile_context>
chip_gen: v7x
topology: tpu7x:2x2x1
jax: 0.10.0
libtpu: 0.0.40
codegen_flags: <defaults>
</compile_context>

<pallas_src>
import math

import jax
import jax.numpy as jnp
from jax.experimental import pallas as pl
from jax.experimental.pallas import tpu as pltpu

_LN_EPS = 1e-5


def _round_up(n, m):
    return ((n + m - 1) // m) * m


# ----------------------------- kernel ---------------------------------------


def _mlp_block(h_bf16, w_ref, p_ref, *, out_bf16):
    """Fused Linear -> LayerNorm -> ReLU on one (row_tile, Din) bf16 tile.

    w_ref: (Din, Dout) bf16 weights; p_ref: (3, Dout) f32 rows = [bias, gamma, beta].
    Matmul runs bf16 x bf16 on the MXU with f32 accumulation; epilogue is f32.
    """
    p = p_ref[...]                                            # (3, Dout) f32
    y = jnp.dot(h_bf16, w_ref[...], preferred_element_type=jnp.float32)
    y = y + p[0:1, :]                                         # bias
    mu = jnp.mean(y, axis=-1, keepdims=True)
    var = jnp.mean(jnp.square(y - mu), axis=-1, keepdims=True)
    y = (y - mu) * jax.lax.rsqrt(var + _LN_EPS)
    y = y * p[1:2, :] + p[2:3, :]                             # gamma, beta
    y = jnp.maximum(y, 0.0)                                   # ReLU
    return y.astype(jnp.bfloat16) if out_bf16 else y


def all_mlp_kernel(x_ref, w1, p1, w2, p2, w3, p3, w4, p4, o_ref):
    h = x_ref[...].astype(jnp.bfloat16)        # (row_tile, input_dim)
    h = _mlp_block(h, w1, p1, out_bf16=True)   # -> hidden_dim1 (bf16 carry)
    h = _mlp_block(h, w2, p2, out_bf16=True)   # -> hidden_dim2
    h = _mlp_block(h, w3, p3, out_bf16=True)   # -> hidden_dim1
    h = _mlp_block(h, w4, p4, out_bf16=False)  # -> input_dim, f32 epilogue
    o_ref[...] = h.astype(o_ref.dtype)


# ----------------------------- wrapper --------------------------------------


def all_mlp_forward(x, params, *, row_tile=256, vmem_limit_bytes=48 * 1024 * 1024):
    """params: list of 4 tuples (W bf16 (Din, Dout), bgb f32 (3, Dout) = [bias; gamma; beta])."""
    B, d_in = x.shape
    d_out = params[-1][0].shape[1]

    # Row-tile choice: big enough to fill the MXU M dimension (>=256 on
    # v6e/v7x, >=128 on v5e), capped so both v7x TensorCores get grid work,
    # rounded to the 8-sublane granule.  Batch is zero-padded to a multiple.
    rt = min(int(row_tile), _round_up(pl.cdiv(B, 2), 8))
    rt = max(8, _round_up(rt, 8))
    B_pad = _round_up(B, rt)
    x_in = x if B_pad == B else jnp.pad(x, ((0, B_pad - B), (0, 0)))

    flat_params = []
    for (w, bgb) in params:
        flat_params += [w, bgb]

    def param_specs(single_buffer):
        # Constant index_map -> params stay VMEM-resident across grid steps;
        # Buffered(1) drops the pointless second buffer for them.
        extra = {"pipeline_mode": pl.Buffered(1)} if single_buffer else {}
        specs = []
        for (w, bgb) in params:
            specs.append(pl.BlockSpec(w.shape, lambda i: (0, 0), **extra))
            specs.append(pl.BlockSpec(bgb.shape, lambda i: (0, 0), **extra))
        return specs

    flops = 2 * B_pad * sum(w.shape[0] * w.shape[1] for (w, _) in params)
    transcendentals = B_pad * len(params)            # one rsqrt per row per LN
    bytes_accessed = (
        x.size * x.dtype.itemsize + B_pad * d_out * 4
        + sum(w.size * w.dtype.itemsize + bgb.size * bgb.dtype.itemsize
              for (w, bgb) in params))

    def build(single_buffer):
        return pl.pallas_call(
            all_mlp_kernel,
            out_shape=jax.ShapeDtypeStruct((B_pad, d_out), jnp.float32),
            grid=(B_pad // rt,),
            in_specs=[pl.BlockSpec((rt, d_in), lambda i: (i, 0))]
                     + param_specs(single_buffer),
            out_specs=pl.BlockSpec((rt, d_out), lambda i: (i, 0)),
            compiler_params=pltpu.CompilerParams(
                dimension_semantics=("parallel",),   # shard rows over v7x's 2 TCs
                vmem_limit_bytes=vmem_limit_bytes,
            ),
            cost_estimate=pl.CostEstimate(
                flops=flops,
                transcendentals=transcendentals,
                bytes_accessed=bytes_accessed),
        )

    try:
        out = build(True)(x_in, *flat_params)
    except Exception:
        # Fallback if this jax build rejects single-buffered (Buffered(1)) specs.
        out = build(False)(x_in, *flat_params)

    return out if B_pad == B else out[:B]


# ----------------------------- parameters -----------------------------------


def make_params(key, input_dim, hidden_dim1, hidden_dim2):
    dims = [(input_dim, hidden_dim1), (hidden_dim1, hidden_dim2),
            (hidden_dim2, hidden_dim1), (hidden_dim1, input_dim)]
    params = []
    for (din, dout) in dims:
        key, kw, kb, kg, kbe = jax.random.split(key, 5)
        bound = 1.0 / math.sqrt(din)
        w = jax.random.uniform(kw, (din, dout), jnp.float32, -bound, bound)
        b = jax.random.uniform(kb, (1, dout), jnp.float32, -bound, bound)
        g = 1.0 + 0.1 * jax.random.normal(kg, (1, dout), jnp.float32)
        beta = 0.1 * jax.random.normal(kbe, (1, dout), jnp.float32)
        bgb = jnp.concatenate([b, g, beta], axis=0)          # (3, dout) f32
        # Weights stored bf16 (halves weight HBM traffic; MXU-native everywhere).
        params.append((w.astype(jnp.bfloat16), bgb))
    return params


# ----------------------------- references -----------------------------------


def _ln_relu(y, g, beta):
    mu = jnp.mean(y, axis=-1, keepdims=True)
    var = jnp.mean(jnp.square(y - mu), axis=-1, keepdims=True)
    y = (y - mu) / jnp.sqrt(var + _LN_EPS)
    return jnp.maximum(y * g + beta, 0.0)


def reference_mixed(x, params):
    """Pure-JAX reference mirroring the kernel's precision policy exactly
    (bf16 x bf16 matmul with f32 accumulation, f32 LN/ReLU, bf16 carries)."""
    h = x.astype(jnp.bfloat16)
    n = len(params)
    for idx, (w, bgb) in enumerate(params):
        y = jnp.dot(h, w, preferred_element_type=jnp.float32) + bgb[0:1, :]
        a = _ln_relu(y, bgb[1:2, :], bgb[2:3, :])
        h = a if idx == n - 1 else a.astype(jnp.bfloat16)
    return h


def reference_f32(x, params):
    """Full-f32 reference of the PyTorch forward (Linear -> LayerNorm -> ReLU x4)."""
    h = x
    for (w, bgb) in params:
        y = h @ w.astype(jnp.float32) + bgb[0:1, :]
        h = _ln_relu(y, bgb[1:2, :], bgb[2:3, :])
    return h


# ----------------------------- main -----------------------------------------

if __name__ == "__main__":
    # Small TPU-tile-friendly stand-ins for (input_dim=2048, hidden1=1024, hidden2=512).
    # B=40 exercises the padding path and a 2-step ("parallel") grid.
    B, D_IN, H1, H2 = 40, 256, 128, 384

    root = jax.random.PRNGKey(0)
    kx, kp = jax.random.split(root)
    x = jax.random.normal(kx, (B, D_IN), dtype=jnp.float32)
    params = make_params(kp, D_IN, H1, H2)

    out = jax.block_until_ready(all_mlp_forward(x, params))
    assert out.shape == (B, D_IN), out.shape
    assert bool(jnp.all(jnp.isfinite(out)))

    ref = reference_mixed(x, params)
    err = float(jnp.max(jnp.abs(out - ref)))
    assert jnp.allclose(out, ref, atol=2e-2, rtol=2e-2), err

    ref32 = reference_f32(x, params)  # loose sanity vs full-f32 math (bf16 error budget)
    err32 = float(jnp.max(jnp.abs(out - ref32)))
    assert jnp.allclose(out, ref32, atol=2e-1, rtol=2e-1), err32

    print("KERNEL_OK")
</pallas_src>

<mosaic_0001>
module attributes {stable_mosaic.version = 11 : i64} {
  func.func @all_mlp_kernel(%arg0: i32, %arg1: memref<24x256xf32, #tpu.memory_space<vmem>>, %arg2: memref<256x128xbf16, #tpu.memory_space<vmem>>, %arg3: memref<3x128xf32, #tpu.memory_space<vmem>>, %arg4: memref<128x384xbf16, #tpu.memory_space<vmem>>, %arg5: memref<3x384xf32, #tpu.memory_space<vmem>>, %arg6: memref<384x128xbf16, #tpu.memory_space<vmem>>, %arg7: memref<3x128xf32, #tpu.memory_space<vmem>>, %arg8: memref<128x256xbf16, #tpu.memory_space<vmem>>, %arg9: memref<3x256xf32, #tpu.memory_space<vmem>>, %arg10: memref<24x256xf32, #tpu.memory_space<vmem>>) attributes {dimension_semantics = [#tpu.dimension_semantics<parallel>], iteration_bounds = array<i64: 2>, scalar_prefetch = 0 : i64, scratch_operands = 0 : i64, tpu.core_type = #tpu.core_type<tc>, window_params = [{transform_indices = @transform_0, window_bounds = array<i64: 24, 256>}, {pipeline_mode = #tpu.pipeline_mode<synchronous>, transform_indices = @transform_1, window_bounds = array<i64: 256, 128>}, {pipeline_mode = #tpu.pipeline_mode<synchronous>, transform_indices = @transform_2, window_bounds = array<i64: 3, 128>}, {pipeline_mode = #tpu.pipeline_mode<synchronous>, transform_indices = @transform_3, window_bounds = array<i64: 128, 384>}, {pipeline_mode = #tpu.pipeline_mode<synchronous>, transform_indices = @transform_4, window_bounds = array<i64: 3, 384>}, {pipeline_mode = #tpu.pipeline_mode<synchronous>, transform_indices = @transform_5, window_bounds = array<i64: 384, 128>}, {pipeline_mode = #tpu.pipeline_mode<synchronous>, transform_indices = @transform_6, window_bounds = array<i64: 3, 128>}, {pipeline_mode = #tpu.pipeline_mode<synchronous>, transform_indices = @transform_7, window_bounds = array<i64: 128, 256>}, {pipeline_mode = #tpu.pipeline_mode<synchronous>, transform_indices = @transform_8, window_bounds = array<i64: 3, 256>}, {transform_indices = @transform_9, window_bounds = array<i64: 24, 256>}]} {
    %c0 = arith.constant 0 : index
    %c0_0 = arith.constant 0 : index
    %0 = vector.load %arg1[%c0, %c0_0] : memref<24x256xf32, #tpu.memory_space<vmem>>, vector<24x256xf32>
    %1 = arith.truncf %0 : vector<24x256xf32> to vector<24x256xbf16>
    %c0_1 = arith.constant 0 : index
    %c0_2 = arith.constant 0 : index
    %2 = vector.load %arg3[%c0_1, %c0_2] : memref<3x128xf32, #tpu.memory_space<vmem>>, vector<3x128xf32>
    %c0_3 = arith.constant 0 : index
    %c0_4 = arith.constant 0 : index
    %3 = vector.load %arg2[%c0_3, %c0_4] : memref<256x128xbf16, #tpu.memory_space<vmem>>, vector<256x128xbf16>
    %cst = arith.constant dense<0.000000e+00> : vector<24x128xf32>
    %4 = tpu.matmul %1, %3, %cst {dimension_numbers = #tpu.dot_dimension_numbers<[1], [0], [0], [1], [0, 0, 1, 1], [], []>} : vector<24x256xbf16>, vector<256x128xbf16>, vector<24x128xf32> -> vector<24x128xf32>
    %5 = vector.extract_strided_slice %2 {offsets = [0, 0], sizes = [1, 128], strides = [1, 1]} : vector<3x128xf32> to vector<1x128xf32>
    %6 = vector.broadcast %5 : vector<1x128xf32> to vector<24x128xf32>
    %7 = arith.addf %4, %6 : vector<24x128xf32>
    %cst_5 = arith.constant dense<0.000000e+00> : vector<24xf32>
    %8 = vector.multi_reduction <add>, %7, %cst_5 [1] : vector<24x128xf32> to vector<24xf32>
    %9 = vector.shape_cast %8 : vector<24xf32> to vector<24x1xf32>
    %cst_6 = arith.constant 1.280000e+02 : f32
    %10 = vector.broadcast %cst_6 : f32 to vector<24x1xf32>
    %11 = arith.divf %9, %10 : vector<24x1xf32>
    %12 = vector.broadcast %11 : vector<24x1xf32> to vector<24x128xf32>
    %13 = arith.subf %7, %12 : vector<24x128xf32>
    %14 = arith.mulf %13, %13 : vector<24x128xf32>
    %cst_7 = arith.constant dense<0.000000e+00> : vector<24xf32>
    %15 = vector.multi_reduction <add>, %14, %cst_7 [1] : vector<24x128xf32> to vector<24xf32>
    %16 = vector.shape_cast %15 : vector<24xf32> to vector<24x1xf32>
    %cst_8 = arith.constant 1.280000e+02 : f32
    %17 = vector.broadcast %cst_8 : f32 to vector<24x1xf32>
    %18 = arith.divf %16, %17 : vector<24x1xf32>
    %19 = vector.broadcast %11 : vector<24x1xf32> to vector<24x128xf32>
    %20 = arith.subf %7, %19 : vector<24x128xf32>
    %cst_9 = arith.constant 9.99999974E-6 : f32
    %21 = vector.broadcast %cst_9 : f32 to vector<24x1xf32>
    %22 = arith.addf %18, %21 : vector<24x1xf32>
    %23 = math.rsqrt %22 : vector<24x1xf32>
    %24 = vector.broadcast %23 : vector<24x1xf32> to vector<24x128xf32>
    %25 = arith.mulf %20, %24 : vector<24x128xf32>
    %26 = vector.extract_strided_slice %2 {offsets = [1, 0], sizes = [1, 128], strides = [1, 1]} : vector<3x128xf32> to vector<1x128xf32>
    %27 = vector.broadcast %26 : vector<1x128xf32> to vector<24x128xf32>
    %28 = arith.mulf %25, %27 : vector<24x128xf32>
    %29 = vector.extract_strided_slice %2 {offsets = [2, 0], sizes = [1, 128], strides = [1, 1]} : vector<3x128xf32> to vector<1x128xf32>
    %30 = vector.broadcast %29 : vector<1x128xf32> to vector<24x128xf32>
    %31 = arith.addf %28, %30 : vector<24x128xf32>
    %cst_10 = arith.constant 0.000000e+00 : f32
    %32 = vector.broadcast %cst_10 : f32 to vector<24x128xf32>
    %33 = arith.maximumf %31, %32 : vector<24x128xf32>
    %34 = arith.truncf %33 : vector<24x128xf32> to vector<24x128xbf16>
    %c0_11 = arith.constant 0 : index
    %c0_12 = arith.constant 0 : index
    %35 = vector.load %arg5[%c0_11, %c0_12] : memref<3x384xf32, #tpu.memory_space<vmem>>, vector<3x384xf32>
    %c0_13 = arith.constant 0 : index
    %c0_14 = arith.constant 0 : index
    %36 = vector.load %arg4[%c0_13, %c0_14] : memref<128x384xbf16, #tpu.memory_space<vmem>>, vector<128x384xbf16>
    %cst_15 = arith.constant dense<0.000000e+00> : vector<24x384xf32>
    %37 = tpu.matmul %34, %36, %cst_15 {dimension_numbers = #tpu.dot_dimension_numbers<[1], [0], [0], [1], [0, 0, 1, 1], [], []>} : vector<24x128xbf16>, vector<128x384xbf16>, vector<24x384xf32> -> vector<24x384xf32>
    %38 = vector.extract_strided_slice %35 {offsets = [0, 0], sizes = [1, 384], strides = [1, 1]} : vector<3x384xf32> to vector<1x384xf32>
    %39 = vector.broadcast %38 : vector<1x384xf32> to vector<24x384xf32>
    %40 = arith.addf %37, %39 : vector<24x384xf32>
    %cst_16 = arith.constant dense<0.000000e+00> : vector<24xf32>
    %41 = vector.multi_reduction <add>, %40, %cst_16 [1] : vector<24x384xf32> to vector<24xf32>
    %42 = vector.shape_cast %41 : vector<24xf32> to vector<24x1xf32>
    %cst_17 = arith.constant 3.840000e+02 : f32
    %43 = vector.broadcast %cst_17 : f32 to vector<24x1xf32>
    %44 = arith.divf %42, %43 : vector<24x1xf32>
    %45 = vector.broadcast %44 : vector<24x1xf32> to vector<24x384xf32>
    %46 = arith.subf %40, %45 : vector<24x384xf32>
    %47 = arith.mulf %46, %46 : vector<24x384xf32>
    %cst_18 = arith.constant dense<0.000000e+00> : vector<24xf32>
    %48 = vector.multi_reduction <add>, %47, %cst_18 [1] : vector<24x384xf32> to vector<24xf32>
    %49 = vector.shape_cast %48 : vector<24xf32> to vector<24x1xf32>
    %cst_19 = arith.constant 3.840000e+02 : f32
    %50 = vector.broadcast %cst_19 : f32 to vector<24x1xf32>
    %51 = arith.divf %49, %50 : vector<24x1xf32>
    %52 = vector.broadcast %44 : vector<24x1xf32> to vector<24x384xf32>
    %53 = arith.subf %40, %52 : vector<24x384xf32>
    %cst_20 = arith.constant 9.99999974E-6 : f32
    %54 = vector.broadcast %cst_20 : f32 to vector<24x1xf32>
    %55 = arith.addf %51, %54 : vector<24x1xf32>
    %56 = math.rsqrt %55 : vector<24x1xf32>
    %57 = vector.broadcast %56 : vector<24x1xf32> to vector<24x384xf32>
    %58 = arith.mulf %53, %57 : vector<24x384xf32>
    %59 = vector.extract_strided_slice %35 {offsets = [1, 0], sizes = [1, 384], strides = [1, 1]} : vector<3x384xf32> to vector<1x384xf32>
    %60 = vector.broadcast %59 : vector<1x384xf32> to vector<24x384xf32>
    %61 = arith.mulf %58, %60 : vector<24x384xf32>
    %62 = vector.extract_strided_slice %35 {offsets = [2, 0], sizes = [1, 384], strides = [1, 1]} : vector<3x384xf32> to vector<1x384xf32>
    %63 = vector.broadcast %62 : vector<1x384xf32> to vector<24x384xf32>
    %64 = arith.addf %61, %63 : vector<24x384xf32>
    %cst_21 = arith.constant 0.000000e+00 : f32
    %65 = vector.broadcast %cst_21 : f32 to vector<24x384xf32>
    %66 = arith.maximumf %64, %65 : vector<24x384xf32>
    %67 = arith.truncf %66 : vector<24x384xf32> to vector<24x384xbf16>
    %c0_22 = arith.constant 0 : index
    %c0_23 = arith.constant 0 : index
    %68 = vector.load %arg7[%c0_22, %c0_23] : memref<3x128xf32, #tpu.memory_space<vmem>>, vector<3x128xf32>
    %c0_24 = arith.constant 0 : index
    %c0_25 = arith.constant 0 : index
    %69 = vector.load %arg6[%c0_24, %c0_25] : memref<384x128xbf16, #tpu.memory_space<vmem>>, vector<384x128xbf16>
    %cst_26 = arith.constant dense<0.000000e+00> : vector<24x128xf32>
    %70 = tpu.matmul %67, %69, %cst_26 {dimension_numbers = #tpu.dot_dimension_numbers<[1], [0], [0], [1], [0, 0, 1, 1], [], []>} : vector<24x384xbf16>, vector<384x128xbf16>, vector<24x128xf32> -> vector<24x128xf32>
    %71 = vector.extract_strided_slice %68 {offsets = [0, 0], sizes = [1, 128], strides = [1, 1]} : vector<3x128xf32> to vector<1x128xf32>
    %72 = vector.broadcast %71 : vector<1x128xf32> to vector<24x128xf32>
    %73 = arith.addf %70, %72 : vector<24x128xf32>
    %cst_27 = arith.constant dense<0.000000e+00> : vector<24xf32>
    %74 = vector.multi_reduction <add>, %73, %cst_27 [1] : vector<24x128xf32> to vector<24xf32>
    %75 = vector.shape_cast %74 : vector<24xf32> to vector<24x1xf32>
    %cst_28 = arith.constant 1.280000e+02 : f32
    %76 = vector.broadcast %cst_28 : f32 to vector<24x1xf32>
    %77 = arith.divf %75, %76 : vector<24x1xf32>
    %78 = vector.broadcast %77 : vector<24x1xf32> to vector<24x128xf32>
    %79 = arith.subf %73, %78 : vector<24x128xf32>
    %80 = arith.mulf %79, %79 : vector<24x128xf32>
    %cst_29 = arith.constant dense<0.000000e+00> : vector<24xf32>
    %81 = vector.multi_reduction <add>, %80, %cst_29 [1] : vector<24x128xf32> to vector<24xf32>
    %82 = vector.shape_cast %81 : vector<24xf32> to vector<24x1xf32>
    %cst_30 = arith.constant 1.280000e+02 : f32
    %83 = vector.broadcast %cst_30 : f32 to vector<24x1xf32>
    %84 = arith.divf %82, %83 : vector<24x1xf32>
    %85 = vector.broadcast %77 : vector<24x1xf32> to vector<24x128xf32>
    %86 = arith.subf %73, %85 : vector<24x128xf32>
    %cst_31 = arith.constant 9.99999974E-6 : f32
    %87 = vector.broadcast %cst_31 : f32 to vector<24x1xf32>
    %88 = arith.addf %84, %87 : vector<24x1xf32>
    %89 = math.rsqrt %88 : vector<24x1xf32>
    %90 = vector.broadcast %89 : vector<24x1xf32> to vector<24x128xf32>
    %91 = arith.mulf %86, %90 : vector<24x128xf32>
    %92 = vector.extract_strided_slice %68 {offsets = [1, 0], sizes = [1, 128], strides = [1, 1]} : vector<3x128xf32> to vector<1x128xf32>
    %93 = vector.broadcast %92 : vector<1x128xf32> to vector<24x128xf32>
    %94 = arith.mulf %91, %93 : vector<24x128xf32>
    %95 = vector.extract_strided_slice %68 {offsets = [2, 0], sizes = [1, 128], strides = [1, 1]} : vector<3x128xf32> to vector<1x128xf32>
    %96 = vector.broadcast %95 : vector<1x128xf32> to vector<24x128xf32>
    %97 = arith.addf %94, %96 : vector<24x128xf32>
    %cst_32 = arith.constant 0.000000e+00 : f32
    %98 = vector.broadcast %cst_32 : f32 to vector<24x128xf32>
    %99 = arith.maximumf %97, %98 : vector<24x128xf32>
    %100 = arith.truncf %99 : vector<24x128xf32> to vector<24x128xbf16>
    %c0_33 = arith.constant 0 : index
    %c0_34 = arith.constant 0 : index
    %101 = vector.load %arg9[%c0_33, %c0_34] : memref<3x256xf32, #tpu.memory_space<vmem>>, vector<3x256xf32>
    %c0_35 = arith.constant 0 : index
    %c0_36 = arith.constant 0 : index
    %102 = vector.load %arg8[%c0_35, %c0_36] : memref<128x256xbf16, #tpu.memory_space<vmem>>, vector<128x256xbf16>
    %cst_37 = arith.constant dense<0.000000e+00> : vector<24x256xf32>
    %103 = tpu.matmul %100, %102, %cst_37 {dimension_numbers = #tpu.dot_dimension_numbers<[1], [0], [0], [1], [0, 0, 1, 1], [], []>} : vector<24x128xbf16>, vector<128x256xbf16>, vector<24x256xf32> -> vector<24x256xf32>
    %104 = vector.extract_strided_slice %101 {offsets = [0, 0], sizes = [1, 256], strides = [1, 1]} : vector<3x256xf32> to vector<1x256xf32>
    %105 = vector.broadcast %104 : vector<1x256xf32> to vector<24x256xf32>
    %106 = arith.addf %103, %105 : vector<24x256xf32>
    %cst_38 = arith.constant dense<0.000000e+00> : vector<24xf32>
    %107 = vector.multi_reduction <add>, %106, %cst_38 [1] : vector<24x256xf32> to vector<24xf32>
    %108 = vector.shape_cast %107 : vector<24xf32> to vector<24x1xf32>
    %cst_39 = arith.constant 2.560000e+02 : f32
    %109 = vector.broadcast %cst_39 : f32 to vector<24x1xf32>
    %110 = arith.divf %108, %109 : vector<24x1xf32>
    %111 = vector.broadcast %110 : vector<24x1xf32> to vector<24x256xf32>
    %112 = arith.subf %106, %111 : vector<24x256xf32>
    %113 = arith.mulf %112, %112 : vector<24x256xf32>
    %cst_40 = arith.constant dense<0.000000e+00> : vector<24xf32>
    %114 = vector.multi_reduction <add>, %113, %cst_40 [1] : vector<24x256xf32> to vector<24xf32>
    %115 = vector.shape_cast %114 : vector<24xf32> to vector<24x1xf32>
    %cst_41 = arith.constant 2.560000e+02 : f32
    %116 = vector.broadcast %cst_41 : f32 to vector<24x1xf32>
    %117 = arith.divf %115, %116 : vector<24x1xf32>
    %118 = vector.broadcast %110 : vector<24x1xf32> to vector<24x256xf32>
    %119 = arith.subf %106, %118 : vector<24x256xf32>
    %cst_42 = arith.constant 9.99999974E-6 : f32
    %120 = vector.broadcast %cst_42 : f32 to vector<24x1xf32>
    %121 = arith.addf %117, %120 : vector<24x1xf32>
    %122 = math.rsqrt %121 : vector<24x1xf32>
    %123 = vector.broadcast %122 : vector<24x1xf32> to vector<24x256xf32>
    %124 = arith.mulf %119, %123 : vector<24x256xf32>
    %125 = vector.extract_strided_slice %101 {offsets = [1, 0], sizes = [1, 256], strides = [1, 1]} : vector<3x256xf32> to vector<1x256xf32>
    %126 = vector.broadcast %125 : vector<1x256xf32> to vector<24x256xf32>
    %127 = arith.mulf %124, %126 : vector<24x256xf32>
    %128 = vector.extract_strided_slice %101 {offsets = [2, 0], sizes = [1, 256], strides = [1, 1]} : vector<3x256xf32> to vector<1x256xf32>
    %129 = vector.broadcast %128 : vector<1x256xf32> to vector<24x256xf32>
    %130 = arith.addf %127, %129 : vector<24x256xf32>
    %cst_43 = arith.constant 0.000000e+00 : f32
    %131 = vector.broadcast %cst_43 : f32 to vector<24x256xf32>
    %132 = arith.maximumf %130, %131 : vector<24x256xf32>
    %c0_44 = arith.constant 0 : index
    %c0_45 = arith.constant 0 : index
    %133 = vector.load %arg10[%c0_44, %c0_45] : memref<24x256xf32, #tpu.memory_space<vmem>>, vector<24x256xf32>
    tpu.vector_store %arg10[%c0_44, %c0_45], %132 {strides = array<i32>} : memref<24x256xf32, #tpu.memory_space<vmem>>, vector<24x256xf32>,
    return
  }
  func.func @transform_0(%arg0: i32) -> (i32, i32) {
    %c0_i32 = arith.constant 0 : i32
    %c0_i32_0 = arith.constant 0 : i32
    return %arg0, %c0_i32 : i32, i32
  }
  func.func @transform_1(%arg0: i32) -> (i32, i32) {
    %c0_i32 = arith.constant 0 : i32
    %c0_i32_0 = arith.constant 0 : i32
    %c0_i32_1 = arith.constant 0 : i32
    return %c0_i32, %c0_i32_0 : i32, i32
  }
  func.func @transform_2(%arg0: i32) -> (i32, i32) {
    %c0_i32 = arith.constant 0 : i32
    %c0_i32_0 = arith.constant 0 : i32
    %c0_i32_1 = arith.constant 0 : i32
    return %c0_i32, %c0_i32_0 : i32, i32
  }
  func.func @transform_3(%arg0: i32) -> (i32, i32) {
    %c0_i32 = arith.constant 0 : i32
    %c0_i32_0 = arith.constant 0 : i32
    %c0_i32_1 = arith.constant 0 : i32
    return %c0_i32, %c0_i32_0 : i32, i32
  }
  func.func @transform_4(%arg0: i32) -> (i32, i32) {
    %c0_i32 = arith.constant 0 : i32
    %c0_i32_0 = arith.constant 0 : i32
    %c0_i32_1 = arith.constant 0 : i32
    return %c0_i32, %c0_i32_0 : i32, i32
  }
  func.func @transform_5(%arg0: i32) -> (i32, i32) {
    %c0_i32 = arith.constant 0 : i32
    %c0_i32_0 = arith.constant 0 : i32
    %c0_i32_1 = arith.constant 0 : i32
    return %c0_i32, %c0_i32_0 : i32, i32
  }
  func.func @transform_6(%arg0: i32) -> (i32, i32) {
    %c0_i32 = arith.constant 0 : i32
    %c0_i32_0 = arith.constant 0 : i32
    %c0_i32_1 = arith.constant 0 : i32
    return %c0_i32, %c0_i32_0 : i32, i32
  }
  func.func @transform_7(%arg0: i32) -> (i32, i32) {
    %c0_i32 = arith.constant 0 : i32
    %c0_i32_0 = arith.constant 0 : i32
    %c0_i32_1 = arith.constant 0 : i32
    return %c0_i32, %c0_i32_0 : i32, i32
  }
  func.func @transform_8(%arg0: i32) -> (i32, i32) {
    %c0_i32 = arith.constant 0 : i32
    %c0_i32_0 = arith.constant 0 : i32
    %c0_i32_1 = arith.constant 0 : i32
    return %c0_i32, %c0_i32_0 : i32, i32
  }
  func.func @transform_9(%arg0: i32) -> (i32, i32) {
    %c0_i32 = arith.constant 0 : i32
    %c0_i32_0 = arith.constant 0 : i32
    return %arg0, %c0_i32 : i32, i32
  }
}

module attributes {stable_mosaic.version = 11 : i64} {
  func.func @all_mlp_kernel(%arg0: i32, %arg1: memref<24x256xf32, #tpu.memory_space<vmem>>, %arg2: memref<256x128xbf16, #tpu.memory_space<vmem>>, %arg3: memref<3x128xf32, #tpu.memory_space<vmem>>, %arg4: memref<128x384xbf16, #tpu.memory_space<vmem>>, %arg5: memref<3x384xf32, #tpu.memory_space<vmem>>, %arg6: memref<384x128xbf16, #tpu.memory_space<vmem>>, %arg7: memref<3x128xf32, #tpu.memory_space<vmem>>, %arg8: memref<128x256xbf16, #tpu.memory_space<vmem>>, %arg9: memref<3x256xf32, #tpu.memory_space<vmem>>, %arg10: memref<24x256xf32, #tpu.memory_space<vmem>>) attributes {dimension_semantics = [#tpu.dimension_semantics<parallel>], iteration_bounds = array<i64: 2>, scalar_prefetch = 0 : i64, scratch_operands = 0 : i64, tpu.core_type = #tpu.core_type<tc>, window_params = [{transform_indices = @transform_0, window_bounds = array<i64: 24, 256>}, {pipeline_mode = #tpu.pipeline_mode<synchronous>, transform_indices = @transform_1, window_bounds = array<i64: 256, 128>}, {pipeline_mode = #tpu.pipeline_mode<synchronous>, transform_indices = @transform_2, window_bounds = array<i64: 3, 128>}, {pipeline_mode = #tpu.pipeline_mode<synchronous>, transform_indices = @transform_3, window_bounds = array<i64: 128, 384>}, {pipeline_mode = #tpu.pipeline_mode<synchronous>, transform_indices = @transform_4, window_bounds = array<i64: 3, 384>}, {pipeline_mode = #tpu.pipeline_mode<synchronous>, transform_indices = @transform_5, window_bounds = array<i64: 384, 128>}, {pipeline_mode = #tpu.pipeline_mode<synchronous>, transform_indices = @transform_6, window_bounds = array<i64: 3, 128>}, {pipeline_mode = #tpu.pipeline_mode<synchronous>, transform_indices = @transform_7, window_bounds = array<i64: 128, 256>}, {pipeline_mode = #tpu.pipeline_mode<synchronous>, transform_indices = @transform_8, window_bounds = array<i64: 3, 256>}, {transform_indices = @transform_9, window_bounds = array<i64: 24, 256>}]} {
    %c0 = arith.constant 0 : index
    %c0_0 = arith.constant 0 : index
    %0 = vector.load %arg1[%c0, %c0_0] : memref<24x256xf32, #tpu.memory_space<vmem>>, vector<24x256xf32>
    %1 = arith.truncf %0 : vector<24x256xf32> to vector<24x256xbf16>
    %c0_1 = arith.constant 0 : index
    %c0_2 = arith.constant 0 : index
    %2 = vector.load %arg3[%c0_1, %c0_2] : memref<3x128xf32, #tpu.memory_space<vmem>>, vector<3x128xf32>
    %c0_3 = arith.constant 0 : index
    %c0_4 = arith.constant 0 : index
    %3 = vector.load %arg2[%c0_3, %c0_4] : memref<256x128xbf16, #tpu.memory_space<vmem>>, vector<256x128xbf16>
    %cst = arith.constant dense<0.000000e+00> : vector<24x128xf32>
    %4 = tpu.matmul %1, %3, %cst {dimension_numbers = #tpu.dot_dimension_numbers<[1], [0], [0], [1], [0, 0, 1, 1], [], []>} : vector<24x256xbf16>, vector<256x128xbf16>, vector<24x128xf32> -> vector<24x128xf32>
    %5 = vector.extract_strided_slice %2 {offsets = [0, 0], sizes = [1, 128], strides = [1, 1]} : vector<3x128xf32> to vector<1x128xf32>
    %6 = vector.broadcast %5 : vector<1x128xf32> to vector<24x128xf32>
    %7 = arith.addf %4, %6 : vector<24x128xf32>
    %cst_5 = arith.constant dense<0.000000e+00> : vector<24xf32>
    %8 = vector.multi_reduction <add>, %7, %cst_5 [1] : vector<24x128xf32> to vector<24xf32>
    %9 = vector.shape_cast %8 : vector<24xf32> to vector<24x1xf32>
    %cst_6 = arith.constant 1.280000e+02 : f32
    %10 = vector.broadcast %cst_6 : f32 to vector<24x1xf32>
    %11 = arith.divf %9, %10 : vector<24x1xf32>
    %12 = vector.broadcast %11 : vector<24x1xf32> to vector<24x128xf32>
    %13 = arith.subf %7, %12 : vector<24x128xf32>
    %14 = arith.mulf %13, %13 : vector<24x128xf32>
    %cst_7 = arith.constant dense<0.000000e+00> : vector<24xf32>
    %15 = vector.multi_reduction <add>, %14, %cst_7 [1] : vector<24x128xf32> to vector<24xf32>
    %16 = vector.shape_cast %15 : vector<24xf32> to vector<24x1xf32>
    %cst_8 = arith.constant 1.280000e+02 : f32
    %17 = vector.broadcast %cst_8 : f32 to vector<24x1xf32>
    %18 = arith.divf %16, %17 : vector<24x1xf32>
    %19 = vector.broadcast %11 : vector<24x1xf32> to vector<24x128xf32>
    %20 = arith.subf %7, %19 : vector<24x128xf32>
    %cst_9 = arith.constant 9.99999974E-6 : f32
    %21 = vector.broadcast %cst_9 : f32 to vector<24x1xf32>
    %22 = arith.addf %18, %21 : vector<24x1xf32>
    %23 = math.rsqrt %22 : vector<24x1xf32>
    %24 = vector.broadcast %23 : vector<24x1xf32> to vector<24x128xf32>
    %25 = arith.mulf %20, %24 : vector<24x128xf32>
    %26 = vector.extract_strided_slice %2 {offsets = [1, 0], sizes = [1, 128], strides = [1, 1]} : vector<3x128xf32> to vector<1x128xf32>
    %27 = vector.broadcast %26 : vector<1x128xf32> to vector<24x128xf32>
    %28 = arith.mulf %25, %27 : vector<24x128xf32>
    %29 = vector.extract_strided_slice %2 {offsets = [2, 0], sizes = [1, 128], strides = [1, 1]} : vector<3x128xf32> to vector<1x128xf32>
    %30 = vector.broadcast %29 : vector<1x128xf32> to vector<24x128xf32>
    %31 = arith.addf %28, %30 : vector<24x128xf32>
    %cst_10 = arith.constant 0.000000e+00 : f32
    %32 = vector.broadcast %cst_10 : f32 to vector<24x128xf32>
    %33 = arith.maximumf %31, %32 : vector<24x128xf32>
    %34 = arith.truncf %33 : vector<24x128xf32> to vector<24x128xbf16>
    %c0_11 = arith.constant 0 : index
    %c0_12 = arith.constant 0 : index
    %35 = vector.load %arg5[%c0_11, %c0_12] : memref<3x384xf32, #tpu.memory_space<vmem>>, vector<3x384xf32>
    %c0_13 = arith.constant 0 : index
    %c0_14 = arith.constant 0 : index
    %36 = vector.load %arg4[%c0_13, %c0_14] : memref<128x384xbf16, #tpu.memory_space<vmem>>, vector<128x384xbf16>
    %cst_15 = arith.constant dense<0.000000e+00> : vector<24x384xf32>
    %37 = tpu.matmul %34, %36, %cst_15 {dimension_numbers = #tpu.dot_dimension_numbers<[1], [0], [0], [1], [0, 0, 1, 1], [], []>} : vector<24x128xbf16>, vector<128x384xbf16>, vector<24x384xf32> -> vector<24x384xf32>
    %38 = vector.extract_strided_slice %35 {offsets = [0, 0], sizes = [1, 384], strides = [1, 1]} : vector<3x384xf32> to vector<1x384xf32>
    %39 = vector.broadcast %38 : vector<1x384xf32> to vector<24x384xf32>
    %40 = arith.addf %37, %39 : vector<24x384xf32>
    %cst_16 = arith.constant dense<0.000000e+00> : vector<24xf32>
    %41 = vector.multi_reduction <add>, %40, %cst_16 [1] : vector<24x384xf32> to vector<24xf32>
    %42 = vector.shape_cast %41 : vector<24xf32> to vector<24x1xf32>
    %cst_17 = arith.constant 3.840000e+02 : f32
    %43 = vector.broadcast %cst_17 : f32 to vector<24x1xf32>
    %44 = arith.divf %42, %43 : vector<24x1xf32>
    %45 = vector.broadcast %44 : vector<24x1xf32> to vector<24x384xf32>
    %46 = arith.subf %40, %45 : vector<24x384xf32>
    %47 = arith.mulf %46, %46 : vector<24x384xf32>
    %cst_18 = arith.constant dense<0.000000e+00> : vector<24xf32>
    %48 = vector.multi_reduction <add>, %47, %cst_18 [1] : vector<24x384xf32> to vector<24xf32>
    %49 = vector.shape_cast %48 : vector<24xf32> to vector<24x1xf32>
    %cst_19 = arith.constant 3.840000e+02 : f32
    %50 = vector.broadcast %cst_19 : f32 to vector<24x1xf32>
    %51 = arith.divf %49, %50 : vector<24x1xf32>
    %52 = vector.broadcast %44 : vector<24x1xf32> to vector<24x384xf32>
    %53 = arith.subf %40, %52 : vector<24x384xf32>
    %cst_20 = arith.constant 9.99999974E-6 : f32
    %54 = vector.broadcast %cst_20 : f32 to vector<24x1xf32>
    %55 = arith.addf %51, %54 : vector<24x1xf32>
    %56 = math.rsqrt %55 : vector<24x1xf32>
    %57 = vector.broadcast %56 : vector<24x1xf32> to vector<24x384xf32>
    %58 = arith.mulf %53, %57 : vector<24x384xf32>
    %59 = vector.extract_strided_slice %35 {offsets = [1, 0], sizes = [1, 384], strides = [1, 1]} : vector<3x384xf32> to vector<1x384xf32>
    %60 = vector.broadcast %59 : vector<1x384xf32> to vector<24x384xf32>
    %61 = arith.mulf %58, %60 : vector<24x384xf32>
    %62 = vector.extract_strided_slice %35 {offsets = [2, 0], sizes = [1, 384], strides = [1, 1]} : vector<3x384xf32> to vector<1x384xf32>
    %63 = vector.broadcast %62 : vector<1x384xf32> to vector<24x384xf32>
    %64 = arith.addf %61, %63 : vector<24x384xf32>
    %cst_21 = arith.constant 0.000000e+00 : f32
    %65 = vector.broadcast %cst_21 : f32 to vector<24x384xf32>
    %66 = arith.maximumf %64, %65 : vector<24x384xf32>
    %67 = arith.truncf %66 : vector<24x384xf32> to vector<24x384xbf16>
    %c0_22 = arith.constant 0 : index
    %c0_23 = arith.constant 0 : index
    %68 = vector.load %arg7[%c0_22, %c0_23] : memref<3x128xf32, #tpu.memory_space<vmem>>, vector<3x128xf32>
    %c0_24 = arith.constant 0 : index
    %c0_25 = arith.constant 0 : index
    %69 = vector.load %arg6[%c0_24, %c0_25] : memref<384x128xbf16, #tpu.memory_space<vmem>>, vector<384x128xbf16>
    %cst_26 = arith.constant dense<0.000000e+00> : vector<24x128xf32>
    %70 = tpu.matmul %67, %69, %cst_26 {dimension_numbers = #tpu.dot_dimension_numbers<[1], [0], [0], [1], [0, 0, 1, 1], [], []>} : vector<24x384xbf16>, vector<384x128xbf16>, vector<24x128xf32> -> vector<24x128xf32>
    %71 = vector.extract_strided_slice %68 {offsets = [0, 0], sizes = [1, 128], strides = [1, 1]} : vector<3x128xf32> to vector<1x128xf32>
    %72 = vector.broadcast %71 : vector<1x128xf32> to vector<24x128xf32>
    %73 = arith.addf %70, %72 : vector<24x128xf32>
    %cst_27 = arith.constant dense<0.000000e+00> : vector<24xf32>
    %74 = vector.multi_reduction <add>, %73, %cst_27 [1] : vector<24x128xf32> to vector<24xf32>
    %75 = vector.shape_cast %74 : vector<24xf32> to vector<24x1xf32>
    %cst_28 = arith.constant 1.280000e+02 : f32
    %76 = vector.broadcast %cst_28 : f32 to vector<24x1xf32>
    %77 = arith.divf %75, %76 : vector<24x1xf32>
    %78 = vector.broadcast %77 : vector<24x1xf32> to vector<24x128xf32>
    %79 = arith.subf %73, %78 : vector<24x128xf32>
    %80 = arith.mulf %79, %79 : vector<24x128xf32>
    %cst_29 = arith.constant dense<0.000000e+00> : vector<24xf32>
    %81 = vector.multi_reduction <add>, %80, %cst_29 [1] : vector<24x128xf32> to vector<24xf32>
    %82 = vector.shape_cast %81 : vector<24xf32> to vector<24x1xf32>
    %cst_30 = arith.constant 1.280000e+02 : f32
    %83 = vector.broadcast %cst_30 : f32 to vector<24x1xf32>
    %84 = arith.divf %82, %83 : vector<24x1xf32>
    %85 = vector.broadcast %77 : vector<24x1xf32> to vector<24x128xf32>
    %86 = arith.subf %73, %85 : vector<24x128xf32>
    %cst_31 = arith.constant 9.99999974E-6 : f32
    %87 = vector.broadcast %cst_31 : f32 to vector<24x1xf32>
    %88 = arith.addf %84, %87 : vector<24x1xf32>
    %89 = math.rsqrt %88 : vector<24x1xf32>
    %90 = vector.broadcast %89 : vector<24x1xf32> to vector<24x128xf32>
    %91 = arith.mulf %86, %90 : vector<24x128xf32>
    %92 = vector.extract_strided_slice %68 {offsets = [1, 0], sizes = [1, 128], strides = [1, 1]} : vector<3x128xf32> to vector<1x128xf32>
    %93 = vector.broadcast %92 : vector<1x128xf32> to vector<24x128xf32>
    %94 = arith.mulf %91, %93 : vector<24x128xf32>
    %95 = vector.extract_strided_slice %68 {offsets = [2, 0], sizes = [1, 128], strides = [1, 1]} : vector<3x128xf32> to vector<1x128xf32>
    %96 = vector.broadcast %95 : vector<1x128xf32> to vector<24x128xf32>
    %97 = arith.addf %94, %96 : vector<24x128xf32>
    %cst_32 = arith.constant 0.000000e+00 : f32
    %98 = vector.broadcast %cst_32 : f32 to vector<24x128xf32>
    %99 = arith.maximumf %97, %98 : vector<24x128xf32>
    %100 = arith.truncf %99 : vector<24x128xf32> to vector<24x128xbf16>
    %c0_33 = arith.constant 0 : index
    %c0_34 = arith.constant 0 : index
    %101 = vector.load %arg9[%c0_33, %c0_34] : memref<3x256xf32, #tpu.memory_space<vmem>>, vector<3x256xf32>
    %c0_35 = arith.constant 0 : index
    %c0_36 = arith.constant 0 : index
    %102 = vector.load %arg8[%c0_35, %c0_36] : memref<128x256xbf16, #tpu.memory_space<vmem>>, vector<128x256xbf16>
    %cst_37 = arith.constant dense<0.000000e+00> : vector<24x256xf32>
    %103 = tpu.matmul %100, %102, %cst_37 {dimension_numbers = #tpu.dot_dimension_numbers<[1], [0], [0], [1], [0, 0, 1, 1], [], []>} : vector<24x128xbf16>, vector<128x256xbf16>, vector<24x256xf32> -> vector<24x256xf32>
    %104 = vector.extract_strided_slice %101 {offsets = [0, 0], sizes = [1, 256], strides = [1, 1]} : vector<3x256xf32> to vector<1x256xf32>
    %105 = vector.broadcast %104 : vector<1x256xf32> to vector<24x256xf32>
    %106 = arith.addf %103, %105 : vector<24x256xf32>
    %cst_38 = arith.constant dense<0.000000e+00> : vector<24xf32>
    %107 = vector.multi_reduction <add>, %106, %cst_38 [1] : vector<24x256xf32> to vector<24xf32>
    %108 = vector.shape_cast %107 : vector<24xf32> to vector<24x1xf32>
    %cst_39 = arith.constant 2.560000e+02 : f32
    %109 = vector.broadcast %cst_39 : f32 to vector<24x1xf32>
    %110 = arith.divf %108, %109 : vector<24x1xf32>
    %111 = vector.broadcast %110 : vector<24x1xf32> to vector<24x256xf32>
    %112 = arith.subf %106, %111 : vector<24x256xf32>
    %113 = arith.mulf %112, %112 : vector<24x256xf32>
    %cst_40 = arith.constant dense<0.000000e+00> : vector<24xf32>
    %114 = vector.multi_reduction <add>, %113, %cst_40 [1] : vector<24x256xf32> to vector<24xf32>
    %115 = vector.shape_cast %114 : vector<24xf32> to vector<24x1xf32>
    %cst_41 = arith.constant 2.560000e+02 : f32
    %116 = vector.broadcast %cst_41 : f32 to vector<24x1xf32>
    %117 = arith.divf %115, %116 : vector<24x1xf32>
    %118 = vector.broadcast %110 : vector<24x1xf32> to vector<24x256xf32>
    %119 = arith.subf %106, %118 : vector<24x256xf32>
    %cst_42 = arith.constant 9.99999974E-6 : f32
    %120 = vector.broadcast %cst_42 : f32 to vector<24x1xf32>
    %121 = arith.addf %117, %120 : vector<24x1xf32>
    %122 = math.rsqrt %121 : vector<24x1xf32>
    %123 = vector.broadcast %122 : vector<24x1xf32> to vector<24x256xf32>
    %124 = arith.mulf %119, %123 : vector<24x256xf32>
    %125 = vector.extract_strided_slice %101 {offsets = [1, 0], sizes = [1, 256], strides = [1, 1]} : vector<3x256xf32> to vector<1x256xf32>
    %126 = vector.broadcast %125 : vector<1x256xf32> to vector<24x256xf32>
    %127 = arith.mulf %124, %126 : vector<24x256xf32>
    %128 = vector.extract_strided_slice %101 {offsets = [2, 0], sizes = [1, 256], strides = [1, 1]} : vector<3x256xf32> to vector<1x256xf32>
    %129 = vector.broadcast %128 : vector<1x256xf32> to vector<24x256xf32>
    %130 = arith.addf %127, %129 : vector<24x256xf32>
    %cst_43 = arith.constant 0.000000e+00 : f32
    %131 = vector.broadcast %cst_43 : f32 to vector<24x256xf32>
    %132 = arith.maximumf %130, %131 : vector<24x256xf32>
    %c0_44 = arith.constant 0 : index
    %c0_45 = arith.constant 0 : index
    %133 = vector.load %arg10[%c0_44, %c0_45] : memref<24x256xf32, #tpu.memory_space<vmem>>, vector<24x256xf32>
    tpu.vector_store %arg10[%c0_44, %c0_45], %132 {strides = array<i32>} : memref<24x256xf32, #tpu.memory_space<vmem>>, vector<24x256xf32>,
    return
  }
  func.func @transform_0(%arg0: i32) -> (i32, i32) {
    %c0_i32 = arith.constant 0 : i32
    %c0_i32_0 = arith.constant 0 : i32
    return %arg0, %c0_i32 : i32, i32
  }
  func.func @transform_1(%arg0: i32) -> (i32, i32) {
    %c0_i32 = arith.constant 0 : i32
    %c0_i32_0 = arith.constant 0 : i32
    %c0_i32_1 = arith.constant 0 : i32
    return %c0_i32, %c0_i32_0 : i32, i32
  }
  func.func @transform_2(%arg0: i32) -> (i32, i32) {
    %c0_i32 = arith.constant 0 : i32
    %c0_i32_0 = arith.constant 0 : i32
    %c0_i32_1 = arith.constant 0 : i32
    return %c0_i32, %c0_i32_0 : i32, i32
  }
  func.func @transform_3(%arg0: i32) -> (i32, i32) {
    %c0_i32 = arith.constant 0 : i32
    %c0_i32_0 = arith.constant 0 : i32
    %c0_i32_1 = arith.constant 0 : i32
    return %c0_i32, %c0_i32_0 : i32, i32
  }
  func.func @transform_4(%arg0: i32) -> (i32, i32) {
    %c0_i32 = arith.constant 0 : i32
    %c0_i32_0 = arith.constant 0 : i32
    %c0_i32_1 = arith.constant 0 : i32
    return %c0_i32, %c0_i32_0 : i32, i32
  }
  func.func @transform_5(%arg0: i32) -> (i32, i32) {
    %c0_i32 = arith.constant 0 : i32
    %c0_i32_0 = arith.constant 0 : i32
    %c0_i32_1 = arith.constant 0 : i32
    return %c0_i32, %c0_i32_0 : i32, i32
  }
  func.func @transform_6(%arg0: i32) -> (i32, i32) {
    %c0_i32 = arith.constant 0 : i32
    %c0_i32_0 = arith.constant 0 : i32
    %c0_i32_1 = arith.constant 0 : i32
    return %c0_i32, %c0_i32_0 : i32, i32
  }
  func.func @transform_7(%arg0: i32) -> (i32, i32) {
    %c0_i32 = arith.constant 0 : i32
    %c0_i32_0 = arith.constant 0 : i32
    %c0_i32_1 = arith.constant 0 : i32
    return %c0_i32, %c0_i32_0 : i32, i32
  }
  func.func @transform_8(%arg0: i32) -> (i32, i32) {
    %c0_i32 = arith.constant 0 : i32
    %c0_i32_0 = arith.constant 0 : i32
    %c0_i32_1 = arith.constant 0 : i32
    return %c0_i32, %c0_i32_0 : i32, i32
  }
  func.func @transform_9(%arg0: i32) -> (i32, i32) {
    %c0_i32 = arith.constant 0 : i32
    %c0_i32_0 = arith.constant 0 : i32
    return %arg0, %c0_i32 : i32, i32
  }
}

</mosaic_0001>

<bundles_post_ra>
// kernel: tpu_custom_call.1
= control target key start
LH: loop header
LB: loop body
LE: loop exit
PB: predicated region body
PF: predicated region fallthrough
CT: control target
= control target key end

     0   :  { %s3193_s0 = inlined_call_operand.hbm [shape: f32[48,256], index: 0, kind: input, shape index: {}]   ;;  %s3194_s1 = inlined_call_operand.hbm [shape: bf16[256,128], index: 1, kind: input, shape index: {}]   ;;  %s3195_s2 = inlined_call_operand.hbm [shape: f32[3,128], index: 2, kind: input, shape index: {}]   ;;  %s3196_s3 = inlined_call_operand.hbm [shape: bf16[128,384], index: 3, kind: input, shape index: {}]   ;;  %s3197_s4 = inlined_call_operand.vmem [shape: f32[3,384], index: 4, kind: input, shape index: {}]   ;;  %s3198_s5 = inlined_call_operand.hbm [shape: bf16[384,128], index: 5, kind: input, shape index: {}]   ;;  %s3199_s6 = inlined_call_operand.hbm [shape: f32[3,128], index: 6, kind: input, shape index: {}]   ;;  %s3200_s7 = inlined_call_operand.hbm [shape: bf16[128,256], index: 7, kind: input, shape index: {}]   ;;  %s3201_s8 = inlined_call_operand.vmem [shape: f32[3,256], index: 8, kind: input, shape index: {}]   ;;  %s3202_s9 = inlined_call_operand.hbm [shape: f32[48,256], index: 9, kind: output, shape index: {}]  }
   0x1   :  { %3208 = sst [smem:[#allocation20_spill]] %s3194_s1 }
   0x2   :  { %3209 = sst [smem:[#allocation21_spill]] %s3195_s2 }
   0x3   :  { %3210 = sst [smem:[#allocation22_spill]] %s3202_s9 }
   0x4   :  { %14 = vsyncpa [#allocation3], 0 }
   0x5   :  { %16 = vsyncpa [#allocation3 + $0x1], 0 }
   0x6   :  { %17 = vsyncpa [#allocation6], 0 }
   0x7   :  { %18 = vsyncpa [#allocation9], 0 }
   0x8   :  { %19 = vsyncpa [#allocation12], 0 }
   0x9   :  { %20 = vsyncpa [#allocation4], 0 }
   0xa   :  { %22 = vsyncpa [#allocation4 + $0x1], 0  ;;  %s2700_s30 = smov 0   ;;  %s2702_s10 = smov 0  }
   0xb   :  { %s2704_s11 = smov 0   ;;  %s2706_s12 = smov 0  }
   0xc LB: > { %s2631_s13 = smov [#allocation5]   ;;  %s2721_s15 = sadd.s32 4294967295, %s2629_s12   ;;  %s2629_s12 = sphi %s2706_s12, %s3236_s12   ;;  %s2625_s11 = sphi %s2704_s11, %s3235_s11   ;;  %s2621_s10 = sphi %s2702_s10, %s3234_s10   ;;  %s2617_s30 = sphi %s2700_s30, %s3233_s30  }
   0xd   : > { %s265_s14 = sshll.u32 %s2631_s13, 4  ;;  %p1890_p0 = scmp.ge.s32.totalorder %s2629_s12, 1  ;;  %s2726_s14 = int_to_ptr.vmem [resolvable:$true] %s265_s14 }
   0xe   : > { %p3205_p1 = scmp.eq.s32.totalorder %s2721_s15, 0  ;;  %p253_p2 = scmp.lt.s32.totalorder %s2629_s12, 3 }
   0xf   : > { %s2632_s17 = smov [#allocation8]   ;;  %s2633_s20 = smov [#allocation11]  }
  0x10   : > { %p2728_p3 = pnand %p1890_p0, %p253_p2  ;;  %s289_s18 = sshll.u32 %s2632_s17, 4  ;;  %s2741_s18 = int_to_ptr.vmem [resolvable:$true] %s289_s18 }
  0x11   : > { %s2743_s21 = sshll.u32 %s2633_s20, 4  ;;  %s3213_s1 = sld [smem:[#allocation20_spill]]  ;;  %s320_s21 = int_to_ptr.vmem [resolvable:$true] %s2743_s21 }
  0x12   : > { %s3211_s16 = scalar_select %p2728_p3, 1, 0 }
  0x13   : > { %p2143_p5 = pneg %p2728_p3 }
  0x15   : > { %p2737_p6 = pnand %p2143_p5, %p3205_p1 }
  0x17   : > { %s2353_s24 = scalar_lea.hbm %s3213_s1, 2048  ;;  %p2753_p8 = pneg %p2737_p6 }
  0x18   : > { %p2354_p7 = scmp.ne.s32.totalorder %s3213_s1, %s2353_s24  ;;  %p2360_p11 = scmp.lt.u32.totalorder %s2353_s24, %s3213_s1 }
  0x1a   : > { %p2356_p9 = pnand %p2753_p8, %p2354_p7 }
  0x1c   : > { %p2357_p10 = pneg %p2356_p9 }
  0x1e   : > { %p2362_p12 = pnand %p2360_p11, %p2357_p10 }
  0x20   : > { %2365 = shalt.err (!%p2362_p12)
}
  0x21   : > { %s2366_s13 = scalar_lea.vmem %s2726_s14, 2048  ;;  %p2374_p5 = scmp.lt.s32.totalorder %s2726_s14, %s2726_s14 }
  0x22   : > { %p2367_p13 = scmp.ne.s32.totalorder %s2726_s14, %s2366_s13  ;;  %p2375_p4 = scmp.lt.s32.totalorder %s2366_s13, %s2366_s13 }
  0x24   : > { %p2369_p0 = pnand %p2367_p13, %p2753_p8  ;;  %p2376_p7 = por %p2375_p4, %p2374_p5 }
  0x26   : > { %p2370_p2 = pneg %p2369_p0 }
  0x28   : > { %p2377_p9 = pnand %p2376_p7, %p2370_p2 }
  0x2a   : > { %2380 = shalt.err (!%p2377_p9)
}
  0x2b   : > { %s3204_s17 = smov 64   ;;  %s2635_s20 = smov 4  }
  0x2c   : > { %2146 = dma.hbm_to_vmem [thread:$0]  (!%p2737_p6), %s3213_s1, 2048, %s2726_s14, [#allocation6], %s3204_s17, %s3204_s17, %s2635_s20  }
  0x2d   : > { %s2381_s26 = scalar_lea.hbm %s3196_s3, 3072 }
  0x2e   : > { %p2382_p4 = scmp.ne.s32.totalorder %s3196_s3, %s2381_s26  ;;  %p2388_p12 = scmp.lt.u32.totalorder %s2381_s26, %s3196_s3 }
  0x30   : > { %p2384_p10 = pnand %p2382_p4, %p2753_p8 }
  0x32   : > { %p2385_p11 = pneg %p2384_p10 }
  0x34   : > { %p2390_p13 = pnand %p2388_p12, %p2385_p11 }
  0x36   : > { %2393 = shalt.err (!%p2390_p13)
}
  0x37   : > { %s2394_s14 = scalar_lea.vmem %s2741_s18, 3072  ;;  %p2402_p7 = scmp.lt.s32.totalorder %s2741_s18, %s2741_s18 }
  0x38   : > { %p2395_p0 = scmp.ne.s32.totalorder %s2741_s18, %s2394_s14  ;;  %p2403_p9 = scmp.lt.s32.totalorder %s2394_s14, %s2394_s14 }
  0x3a   : > { %p2397_p2 = pnand %p2395_p0, %p2753_p8  ;;  %p2404_p4 = por %p2403_p9, %p2402_p7 }
  0x3c   : > { %p2398_p5 = pneg %p2397_p2 }
  0x3e   : > { %p2405_p10 = pnand %p2404_p4, %p2398_p5 }
  0x40   : > { %2408 = shalt.err (!%p2405_p10)
}
  0x41   : > { %s2636_s22 = smov 192   ;;  %s2637_s9 = smov 12  }
  0x42   : > { %2152 = dma.hbm_to_vmem [thread:$0]  (!%p2737_p6), %s3196_s3, 3072, %s2741_s18, [#allocation9], %s2636_s22, %s2636_s22, %s2637_s9  }
  0x43   : > { %s2409_s28 = scalar_lea.hbm %s3199_s6, 64 }
  0x44   : > { %p2410_p11 = scmp.ne.s32.totalorder %s3199_s6, %s2409_s28  ;;  %p2416_p0 = scmp.lt.u32.totalorder %s2409_s28, %s3199_s6 }
  0x46   : > { %p2412_p12 = pnand %p2410_p11, %p2753_p8 }
  0x48   : > { %p2413_p13 = pneg %p2412_p12 }
  0x4a   : > { %p2418_p2 = pnand %p2416_p0, %p2413_p13 }
  0x4c   : > { %2421 = shalt.err (!%p2418_p2)
}
  0x4d   : > { %s2422_s23 = scalar_lea.vmem %s320_s21, 64  ;;  %p2430_p4 = scmp.lt.s32.totalorder %s320_s21, %s320_s21 }
  0x4e   : > { %p2423_p5 = scmp.ne.s32.totalorder %s320_s21, %s2422_s23  ;;  %p2431_p10 = scmp.lt.s32.totalorder %s2422_s23, %s2422_s23 }
  0x50   : > { %p2425_p7 = pnand %p2423_p5, %p2753_p8  ;;  %p2432_p1 = por %p2431_p10, %p2430_p4 }
  0x52   : > { %p2426_p9 = pneg %p2425_p7 }
  0x54   : > { %p2433_p3 = pnand %p2432_p1, %p2426_p9 }
  0x56   : > { %2436 = shalt.err (!%p2433_p3)
}
  0x57   : > { %2158 = dma.hbm_to_vmem [thread:$0]  (!%p2737_p6), %s3199_s6, 64, %s320_s21, [#allocation12]  }
  0x58   : > { %s2638_s17 = smov [#allocation7]   ;;  %s2639_s24 = smov [#allocation10]  }
  0x59   : > { %s279_s9 = sshll.u32 %s2638_s17, 4  ;;  %s305_s25 = sshll.u32 %s2639_s24, 4  ;;  %s280_s9 = int_to_ptr.vmem [resolvable:$true] %s279_s9  ;;  %s306_s25 = int_to_ptr.vmem [resolvable:$true] %s305_s25 }
  0x5a   : > { %s3215_s2 = sld [smem:[#allocation21_spill]] }
  0x60   : > { %s2437_s29 = scalar_lea.hbm %s3215_s2, 64 }
  0x61   : > { %p2438_p1 = scmp.ne.s32.totalorder %s3215_s2, %s2437_s29  ;;  %p2444_p12 = scmp.lt.u32.totalorder %s2437_s29, %s3215_s2 }
  0x63   : > { %p2440_p3 = pnand %p2438_p1, %p2753_p8 }
  0x65   : > { %p2441_p11 = pneg %p2440_p3 }
  0x67   : > { %p2446_p13 = pnand %p2444_p12, %p2441_p11 }
  0x69   : > { %2449 = shalt.err (!%p2446_p13)
}
  0x6a   : > { %s2450_s21 = scalar_lea.vmem %s280_s9, 64  ;;  %p2458_p7 = scmp.lt.s32.totalorder %s280_s9, %s280_s9 }
  0x6b   : > { %p2451_p0 = scmp.ne.s32.totalorder %s280_s9, %s2450_s21  ;;  %p2459_p9 = scmp.lt.s32.totalorder %s2450_s21, %s2450_s21 }
  0x6d   : > { %p2453_p2 = pnand %p2451_p0, %p2753_p8  ;;  %p2460_p4 = por %p2459_p9, %p2458_p7 }
  0x6f   : > { %p2454_p5 = pneg %p2453_p2 }
  0x71   : > { %p2461_p10 = pnand %p2460_p4, %p2454_p5 }
  0x73   : > { %2464 = shalt.err (!%p2461_p10)
}
  0x74   : > { %2149 = dma.hbm_to_vmem [thread:$0]  (!%p2737_p6), %s3215_s2, 64, %s280_s9, [#allocation6]  }
  0x75   : > { %s2465_s28 = scalar_lea.hbm %s3198_s5, 3072 }
  0x76   : > { %p2466_p1 = scmp.ne.s32.totalorder %s3198_s5, %s2465_s28  ;;  %p2472_p12 = scmp.lt.u32.totalorder %s2465_s28, %s3198_s5 }
  0x78   : > { %p2468_p3 = pnand %p2466_p1, %p2753_p8 }
  0x7a   : > { %p2469_p11 = pneg %p2468_p3 }
  0x7c   : > { %p2474_p13 = pnand %p2472_p12, %p2469_p11 }
  0x7e   : > { %2477 = shalt.err (!%p2474_p13)
}
  0x7f   : > { %s2478_s18 = scalar_lea.vmem %s306_s25, 3072  ;;  %p2486_p7 = scmp.lt.s32.totalorder %s306_s25, %s306_s25 }
  0x80   : > { %p2479_p0 = scmp.ne.s32.totalorder %s306_s25, %s2478_s18  ;;  %p2487_p9 = scmp.lt.s32.totalorder %s2478_s18, %s2478_s18 }
  0x82   : > { %p2481_p2 = pnand %p2479_p0, %p2753_p8  ;;  %p2488_p4 = por %p2487_p9, %p2486_p7 }
  0x84   : > { %p2482_p5 = pneg %p2481_p2 }
  0x86   : > { %p2489_p10 = pnand %p2488_p4, %p2482_p5 }
  0x88   : > { %2492 = shalt.err (!%p2489_p10)
}
  0x89   : > { %s3216_s9 = smov 64   ;;  %s2640_s17 = smov [#allocation13]  }
  0x8a   : > { %2155 = dma.hbm_to_vmem [thread:$0]  (!%p2737_p6), %s3198_s5, 3072, %s306_s25, [#allocation9], %s3216_s9, %s3216_s9, %s2635_s20  }
  0x8b   : > { %s329_s24 = sshll.u32 %s2640_s17, 4  ;;  %s2493_s29 = scalar_lea.hbm %s3200_s7, 2048  ;;  %s330_s24 = int_to_ptr.vmem [resolvable:$true] %s329_s24 }
  0x8c   : > { %p2494_p1 = scmp.ne.s32.totalorder %s3200_s7, %s2493_s29  ;;  %p2500_p12 = scmp.lt.u32.totalorder %s2493_s29, %s3200_s7 }
  0x8e   : > { %p2496_p3 = pnand %p2494_p1, %p2753_p8 }
  0x90   : > { %p2497_p11 = pneg %p2496_p3 }
  0x92   : > { %p2502_p13 = pnand %p2500_p12, %p2497_p11 }
  0x94   : > { %2505 = shalt.err (!%p2502_p13)
}
  0x95   : > { %s2506_s20 = scalar_lea.vmem %s330_s24, 2048  ;;  %p2514_p7 = scmp.lt.s32.totalorder %s330_s24, %s330_s24 }
  0x96   : > { %p2507_p0 = scmp.ne.s32.totalorder %s330_s24, %s2506_s20  ;;  %p2515_p9 = scmp.lt.s32.totalorder %s2506_s20, %s2506_s20 }
  0x98   : > { %p2509_p2 = pnand %p2507_p0, %p2753_p8  ;;  %p2516_p4 = por %p2515_p9, %p2514_p7 }
  0x9a   : > { %p2510_p5 = pneg %p2509_p2 }
  0x9c   : > { %p2517_p10 = pnand %p2516_p4, %p2510_p5 }
  0x9e   : > { %2520 = shalt.err (!%p2517_p10)
}
  0x9f   : > { %s2641_s25 = smov 128   ;;  %s2642_s27 = smov 8  }
  0xa0   : > { %2161 = dma.hbm_to_vmem [thread:$0]  (!%p2737_p6), %s3200_s7, 2048, %s330_s24, [#allocation12], %s2641_s25, %s2641_s25, %s2642_s27  }
  0xa1   : > { %s1889_s22 = sadd.s32 4294967294, %s2629_s12   ;;  %s2878_s17 = sadd.s32 1, %s2629_s12  }
  0xa2   : > { %s32_s26 = ssub.s32 %s2629_s12, %s2878_s17  ;;  %s35_s28 = sadd.s32 1, %s2625_s11 }
  0xa3   : > { %p33_p8 = scmp.eq.s32.totalorder %s32_s26, 0  ;;  %p42_p1 = scmp.ne.s32.totalorder %s2625_s11, %s2621_s10 }
  0xa4   : > { %p43_p3 = scmp.eq.s32.totalorder %s2629_s12, 0  ;;  %p48_p11 = scmp.ne.s32.totalorder %s2621_s10, %s2617_s30 }
  0xa5   : > { %s2889_s29 = scalar_select %p33_p8, %s2625_s11, %s35_s28  }
  0xa6   : > { %p44_p12 = por %p43_p3, %p42_p1  ;;  %p3217_p13 = scmp.eq.s32.totalorder %s2721_s15, 0 }
  0xa7   : > { %p240_p6 = scmp.eq.s32.totalorder %s2721_s15, 1  ;;  %p246_p2 = scmp.eq.s32.totalorder %s1889_s22, 1 }
  0xa8   : > { %p2893_p0 = por %p3217_p13, %p48_p11  ;;  %p2176_p5 = scmp.lt.s32.totalorder %s2629_s12, 2 }
  0xa9   : > { %s346_s24 = sand.u32 1, %s2625_s11   ;;  %p2900_p7 = por %p240_p6, %p42_p1 }
  0xaa   : > { %p2904_p9 = por %p246_p2, %p48_p11  ;;  %s2113_s23 = smul.u32 48, %s346_s24 }
  0xab   : > { %s3219_s13 = scalar_select %p2900_p7, 1, 0 }
  0xac   : > { %s3220_s14 = scalar_select %p2904_p9, 1, 0 }
  0xad   : > { %s1995_s18 = smul.u32 768, %s2629_s12  ;;  %p2909_p4 = pnand %p2176_p5, %p44_p12 }
  0xae   : > { %s350_s21 = scalar_lea.vmem [#allocation2], %s2113_s23  ;;  %s2920_s26 = scalar_lea.sflag [#allocation3], %s346_s24 }
  0xaf   : > { %s2916_s9 = scalar_lea.hbm %s3193_s0, %s1995_s18  ;;  %s358_s22 = sshll.u32 %s350_s21, 4  ;;  %s2918_s22 = int_to_ptr.vmem [resolvable:$true] %s358_s22 }
  0xb0   : > { %s2521_s28 = scalar_lea.hbm %s2916_s9, 768  ;;  %p2523_p8 = pneg %p2909_p4 }
  0xb1   : > { %p2522_p10 = scmp.ne.s32.totalorder %s2916_s9, %s2521_s28  ;;  %s2526_s27 = scalar_lea.hbm %s3193_s0, 1536 }
  0xb2   : > { %p2527_p11 = scmp.lt.u32.totalorder %s2916_s9, %s3193_s0  ;;  %p2528_p12 = scmp.lt.u32.totalorder %s2526_s27, %s2521_s28 }
  0xb3   : > { %p2524_p1 = pnand %p2523_p8, %p2522_p10  ;;  %p2530_p6 = scmp.lt.u32.totalorder %s2521_s28, %s2916_s9 }
  0xb4   : > { %p2529_p13 = por %p2528_p12, %p2527_p11 }
  0xb5   : > { %p2525_p3 = pneg %p2524_p1 }
  0xb6   : > { %p2531_p2 = por %p2530_p6, %p2529_p13 }
  0xb8   : > { %p2532_p5 = pnand %p2531_p2, %p2525_p3 }
  0xba   : > { %2535 = shalt.err (!%p2532_p5)
}
  0xbb   : > { %s2536_s24 = scalar_lea.vmem %s2918_s22, 768  ;;  %s2643_s23 = smov [#allocation2]  }
  0xbc   : > { %p2537_p10 = scmp.ne.s32.totalorder %s2918_s22, %s2536_s24  ;;  %s2541_s21 = sshll.u32 %s2643_s23, 4  ;;  %s2542_s21 = int_to_ptr.vmem [resolvable:$false] %s2541_s21 }
  0xbd   : > { %s2543_s1 = scalar_lea.vmem %s2542_s21, 1536  ;;  %p2544_p7 = scmp.lt.s32.totalorder %s2918_s22, %s2542_s21 }
  0xbe   : > { %p2539_p1 = pnand %p2537_p10, %p2523_p8  ;;  %p2545_p11 = scmp.lt.s32.totalorder %s2543_s1, %s2536_s24 }
  0xc0   : > { %p2540_p9 = pneg %p2539_p1  ;;  %p2546_p12 = por %p2545_p11, %p2544_p7 }
  0xc2   : > { %p2547_p13 = pnand %p2546_p12, %p2540_p9 }
  0xc4   : > { %2550 = shalt.err (!%p2547_p13)
}
  0xc5   : > { %s2644_s2 = smov 256   ;;  %s2645_s28 = smov 16  }
  0xc6   : > { %2165 = dma.hbm_to_vmem [thread:$0]  (!%p2909_p4), %s2916_s9, 768, %s2918_s22, %s2920_s26, %s2644_s2, %s2644_s2, %s2645_s28  }
  0xc7   : > { %p3222_p8 = scmp.ne.s32.totalorder %s3211_s16, 0 }
  0xc8   : > { %s2951_s18 = sand.u32 (!%p3222_p8), 1, %s2621_s10  }
  0xc9   : > { %370 = sbr.rel (%p3222_p8) target bundleno = 2422 (0x976), region = 56  ;;  %s373_s27 = scalar_lea.sflag (!%p3222_p8), [#allocation3], %s2951_s18 }
  0xca   : > { %s2114_s25 = smul.u32 (!%p3222_p8), 48, %s2951_s18 }
  0xcc   : > { %s2957_s24 = scalar_lea.vmem (!%p3222_p8), [#allocation2], %s2114_s25 }
  0xd0   : > { %2596 = dma.done.wait (%p2893_p0), %s373_s27, 768  }
  0xd1   : > { %2598 = vsyncadd (%p2893_p0), %s373_s27, 4294966528  ;;  %p3223_p7 = scmp.eq.s32.totalorder %s2721_s15, 0 }
  0xd3   : > { %2600 = dma.done.wait (%p3223_p7), [#allocation6], 2112   ;;  %p3224_p9 = pmov %p3223_p7 }
  0xd4   : > { %p3225_p4 = pmov %p3223_p7 }
  0xd5   : > { %2602 = vsyncadd (%p3224_p9), [#allocation6], 4294965184 }
  0xd6   : > { %2604 = dma.done.wait (%p3225_p4), [#allocation9], 6144   ;;  %p3226_p3 = pmov %p3225_p4 }
  0xd8   : > { %2606 = vsyncadd (%p3226_p3), [#allocation9], 4294961152  ;;  %p3227_p6 = pmov %p3226_p3 }
  0xd9   : > { %p3228_p2 = pmov %p3226_p3 }
  0xda   : > { %2608 = dma.done.wait (%p3227_p6), [#allocation12], 2112  }
  0xdb   : > { %2610 = vsyncadd (%p3228_p2), [#allocation12], 4294965184  ;;  %v2233_v0 = vld [vmem:[#allocation5 + $0x40] sm:$0xff]   ;;  %v2235_v2 = vld [vmem:[#allocation5 + $0x48] sm:$0xff]   ;;  %v481_v26 = vlaneseq  ;;  %s434_s23 = scalar_lea.vmem [#allocation14], %s2114_s25  ;;  %s1996_s21 = smul.u32 768, %s2721_s15 }
  0xdc   : > { %v2234_v1 = vld [vmem:[#allocation5] sm:$0xff]   ;;  %1997 = vmatprep.subr.bf16.mxu0 %v2233_v0  ;;  %v2236_v3 = vld [vmem:[#allocation5 + $0x8] sm:$0xff]   ;;  %v2237_v4 = vld [vmem:[#allocation5 + $0x50] sm:$0xff]   ;;  %s1759_s1 = sshll.u32 %s434_s23, 4  ;;  %s3229_s27 = sld [smem:[#allocation22_spill]]  ;;  %s3149_s1 = int_to_ptr.vmem [resolvable:$true] %s1759_s1 }
  0xdd   : > { %1998 = vmatpush3.bf16.msra.mxu0 %v2234_v1  ;;  %v2238_v5 = vld [vmem:[#allocation5 + $0x10] sm:$0xff]   ;;  %v2239_v6 = vld [vmem:[#allocation5 + $0x58] sm:$0xff]   ;;  %v2241_v8 = vld [vmem:[#allocation5 + $0x60] sm:$0xff]   ;;  %v2981_v27 = vshrl.u32 %v481_v26, 7  ;;  %s1745_s15 = scalar_lea.sflag [#allocation4], %s2951_s18  ;;  %p3230_p5 = scmp.ne.s32.totalorder %s3219_s13, 0 }
  0xde   : > { %1999 = vmatprep.subr.bf16.mxu0 %v2235_v2  ;;  %v2240_v7 = vld [vmem:[#allocation5 + $0x18] sm:$0xff]   ;;  %v2242_v9 = vld [vmem:[#allocation5 + $0x20] sm:$0xff]   ;;  %v2243_v10 = vld [vmem:[#allocation5 + $0x68] sm:$0xff]   ;;  %s2647_s16 = smov [#allocation14]  }
  0xdf   : > { %v439_v11 = vld [vmem:[%s2957_s24 + $0x8] sm:$0xff]  ;;  %v441_v12 = vld [vmem:[%s2957_s24 + $0x18] sm:$0xff]  ;;  %v2245_v15 = vld [vmem:[#allocation5 + $0x70] sm:$0xff]   ;;  %v2984_v28 = vsub.s32 0, %v2981_v27  ;;  %v3004_v26 = vsub.s32 1, %v2981_v27  ;;  %s2555_s19 = sshll.u32 %s2647_s16, 4  ;;  %s2556_s19 = int_to_ptr.vmem [resolvable:$false] %s2555_s19 }
  0xe0   : > { %v2244_v13 = vld [vmem:[#allocation5 + $0x28] sm:$0xff]   ;;  %v445_v14 = vpack.c.bf16 %v441_v12, %v439_v11  ;;  %v2246_v16 = vld [vmem:[#allocation5 + $0x30] sm:$0xff]   ;;  %v2247_v17 = vld [vmem:[#allocation5 + $0x78] sm:$0xff]   ;;  %s2557_s20 = scalar_lea.vmem %s2556_s19, 1536  ;;  %p2558_p11 = scmp.lt.s32.totalorder %s3149_s1, %s2556_s19 }
  0xe1   : > { %2000 = vmatpush3.bf16.msra.mxu0 %v2236_v3  ;;  %v2248_v18 = vld [vmem:[#allocation5 + $0x38] sm:$0xff]   ;;  %v438_v19 = vld [vmem:[%s2957_s24] sm:$0xff]  ;;  %v440_v20 = vld [vmem:[%s2957_s24 + $0x10] sm:$0xff] }
  0xe2   : > { %2001 = vmatprep.subr.bf16.mxu0 %v2237_v4  ;;  %613 = vmatprep.mubr.bf16.mxu0 %v445_v14  ;;  %v443_v21 = vld [vmem:[%s2957_s24 + $0x28] sm:$0xff]  ;;  %v444_v22 = vpack.c.bf16 %v440_v20, %v438_v19  ;;  %v442_v24 = vld [vmem:[%s2957_s24 + $0x20] sm:$0xff]  ;;  %s3147_s25 = scalar_lea.hbm %s3229_s27, %s1996_s21  ;;  %s2551_s24 = scalar_lea.vmem %s3149_s1, 768 }
  0xe3   : > { %v447_v23 = vpack.c.bf16 %v443_v21, %v443_v21  ;;  %v446_v25 = vpack.c.bf16 %v442_v24, %v442_v24  ;;  %v2986_v29 = vld [vmem:[#allocation7] sm:$0x7]  ;;  %v2249_v45 = vld [vmem:[#allocation8 + $0x4] ss:$12 sps:$4 sm:$0xff]   ;;  %v2251_v46 = vld [vmem:[#allocation8] ss:$12 sps:$4 sm:$0xff]   ;;  %p2552_p0 = scmp.ne.s32.totalorder %s3149_s1, %s2551_s24  ;;  %p2559_p12 = scmp.lt.s32.totalorder %s2557_s20, %s2551_s24 }
  0xe4   : > { %v484_v31 = vrot.slane %v2986_v29, %v2984_v28  ;;  %873 = vmatprep.subr.bf16.mxu1 %v2249_v45  ;;  %v2252_v59 = vld [vmem:[#allocation8 + $0x1c] ss:$12 sps:$4 sm:$0xff]   ;;  %v2255_v61 = vld [vmem:[#allocation8 + $0x18] ss:$12 sps:$4 sm:$0xff]   ;;  %v2256_v62 = vld [vmem:[#allocation8 + $0x34] ss:$12 sps:$4 sm:$0xff]  }
  0xe5   : > { %2002 = vmatpush3.bf16.msra.mxu0 %v2238_v5  ;;  %874 = vmatpush1.bf16.msra.mxu1 %v2251_v46  ;;  %v2254_v60 = vld [vmem:[#allocation8 + $0x8] ss:$12 sps:$4 sm:$0xff]   ;;  %v2258_v63 = vld [vmem:[#allocation8 + $0x20] ss:$12 sps:$4 sm:$0xff]   ;;  %v2259_v0 = vld [vmem:[#allocation8 + $0x30] ss:$12 sps:$4 sm:$0xff]   ;;  %p2553_p10 = pnand %p2552_p0, %p3230_p5  ;;  %p2560_p13 = por %p2559_p12, %p2558_p11 }
  0xe6   : > { %2003 = vmatprep.subr.bf16.mxu0 %v2239_v6  ;;  %875 = vmatprep.subr.bf16.mxu1 %v2252_v59  ;;  %v2260_v1 = vld [vmem:[#allocation8 + $0x4c] ss:$12 sps:$4 sm:$0xff]   ;;  %v2263_v3 = vld [vmem:[#allocation8 + $0x48] ss:$12 sps:$4 sm:$0xff]   ;;  %v2264_v4 = vld [vmem:[#allocation8 + $0x64] ss:$12 sps:$4 sm:$0xff]  }
  0xe7   : > { %v2262_v2 = vld [vmem:[#allocation8 + $0x38] ss:$12 sps:$4 sm:$0xff]   ;;  %v2266_v5 = vld [vmem:[#allocation8 + $0x50] ss:$12 sps:$4 sm:$0xff]   ;;  %v2267_v6 = vld [vmem:[#allocation8 + $0x60] ss:$12 sps:$4 sm:$0xff]   ;;  %p2554_p1 = pneg %p2553_p10 }
  0xe8   : > { %v2274_v11 = vld [vmem:[#allocation8 + $0x80] ss:$12 sps:$4 sm:$0xff]   ;;  %v2275_v12 = vld [vmem:[#allocation8 + $0x90] ss:$12 sps:$4 sm:$0xff]   ;;  %v2278_v14 = vld [vmem:[#allocation8 + $0x98] ss:$12 sps:$4 sm:$0xff]  }
  0xe9   : > { %2004 = vmatpush3.bf16.msra.mxu0 %v2240_v7  ;;  %876 = vmatpush1.bf16.msra.mxu1 %v2255_v61  ;;  %v2268_v7 = vld [vmem:[#allocation8 + $0x7c] ss:$12 sps:$4 sm:$0xff]   ;;  %p2561_p8 = pnand %p2560_p13, %p2554_p1 }
  0xea   : > { %2005 = vmatprep.subr.bf16.mxu0 %v2241_v8  ;;  %877 = vmatprep.subr.bf16.mxu1 %v2256_v62  ;;  %v2270_v8 = vld [vmem:[#allocation8 + $0x68] ss:$12 sps:$4 sm:$0xff]  }
  0xed   : > { %2006 = vmatpush3.bf16.msra.mxu0 %v2242_v9  ;;  %878 = vmatpush1.bf16.msra.mxu1 %v2259_v0  ;;  %v2271_v9 = vld [vmem:[#allocation8 + $0x78] ss:$12 sps:$4 sm:$0xff]  }
  0xee   : > { %2007 = vmatprep.subr.bf16.mxu0 %v2243_v10  ;;  %879 = vmatprep.subr.bf16.mxu1 %v2260_v1  ;;  %v2272_v10 = vld [vmem:[#allocation8 + $0x94] ss:$12 sps:$4 sm:$0xff]  }
  0xf1   : > { %2008 = vmatpush3.bf16.msra.mxu0 %v2244_v13  ;;  %880 = vmatpush1.bf16.msra.mxu1 %v2263_v3  ;;  %v2276_v13 = vld [vmem:[#allocation8 + $0xac] ss:$12 sps:$4 sm:$0xff]  }
  0xf2   : > { %2009 = vmatprep.subr.bf16.mxu0 %v2245_v15  ;;  %881 = vmatprep.subr.bf16.mxu1 %v2264_v4  ;;  %v2279_v15 = vld [vmem:[#allocation8 + $0xa8] ss:$12 sps:$4 sm:$0xff]  }
  0xf5   : > { %2010 = vmatpush3.bf16.msra.mxu0 %v2246_v16  ;;  %882 = vmatpush1.bf16.msra.mxu1 %v2267_v6  ;;  %v2646_v16 = vmov 0  }
  0xf6   : > { %2011 = vmatprep.subr.bf16.mxu0 %v2247_v17  ;;  %883 = vmatprep.subr.bf16.mxu1 %v2268_v7  ;;  %v2280_v17 = vld [vmem:[#allocation8 + $0xb0] ss:$12 sps:$4 sm:$0xff]  }
  0xf7   : > { %905 = vmatprep.mubr.bf16.mxu1 %v2646_v16 }
  0xf9   : > { %2012 = vmatpush3.bf16.msra.mxu0 %v2248_v18  ;;  %884 = vmatpush1.bf16.msra.mxu1 %v2271_v9 }
  0xfa   : > { %2073 = vmatprep.subr.bf16.mxu0 %v2254_v60  ;;  %885 = vmatprep.subr.bf16.mxu1 %v2272_v10 }
  0xfc   : > { %614 = vmatmul.mubr.bf16.vlgmr.msra.gmra.mrb[0].mxu0 %v444_v22 }
  0xfd   : > { %621 = vmatprep.mubr.bf16.mxu0 %v447_v23  ;;  %2074 = vmatpush3.bf16.msra.mxu0 %v2254_v60 }
  0xfe   : > { %2075 = vmatprep.subr.bf16.mxu0 %v2258_v63  ;;  %886 = vmatpush1.bf16.msra.mxu1 %v2275_v12 }
  0xff   : > { %887 = vmatprep.subr.bf16.mxu1 %v2276_v13 }
 0x101   : > { %2076 = vmatpush3.bf16.msra.mxu0 %v2258_v63 }
 0x102   : > { %2077 = vmatprep.subr.bf16.mxu0 %v2262_v2  ;;  %888 = vmatpush1.bf16.msra.mxu1 %v2279_v15 }
 0x104   : > { %622 = vmatmul.mubr.bf16.gmra.mrb[4].mxu0 %v446_v25 }
 0x105   : > { %2078 = vmatpush3.bf16.msra.mxu0 %v2262_v2 }
 0x106   : > { %2079 = vmatprep.subr.bf16.mxu0 %v2266_v5 }
 0x109   : > { %2080 = vmatpush3.bf16.msra.mxu0 %v2266_v5 }
 0x10a   : > { %2081 = vmatprep.subr.bf16.mxu0 %v2270_v8 }
 0x10d   : > { %2082 = vmatpush3.bf16.msra.mxu0 %v2270_v8 }
 0x10e   : > { %2083 = vmatprep.subr.bf16.mxu0 %v2274_v11 }
 0x111   : > { %2084 = vmatpush3.bf16.msra.mxu0 %v2274_v11 }
 0x112   : > { %2085 = vmatprep.subr.bf16.mxu0 %v2278_v14 }
 0x115   : > { %2086 = vmatpush3.bf16.msra.mxu0 %v2278_v14 }
 0x116   : > { %2087 = vmatprep.subr.bf16.mxu0 %v2280_v17 }
 0x119   : > { %2088 = vmatpush3.bf16.msra.mxu0 %v2280_v17 }
 0x1cf   : > { %v2013_v30 = vpop.f32.mrb[0].mxu0 }
 0x1d0   : > { %v2014_v32 = vpop.f32.mrb[1].mxu0 }
 0x1d1   : > { %v2015_v33 = vadd.f32 %v2014_v32, %v2013_v30  ;;  %v2016_v34 = vpop.f32.mrb[2].mxu0  ;;  %v3009_v32 = vsub.s32 2, %v2981_v27 }
 0x1d2   : > { %v2017_v35 = vpop.f32.mrb[3].mxu0 }
 0x1d3   : > { %v2018_v36 = vadd.f32 %v2017_v35, %v2016_v34  ;;  %v616_v37 = vadd.f32 %v2015_v33, %v484_v31  ;;  %v673_v35 = vrot.slane %v2986_v29, %v3009_v32 }
 0x1d5   : > { %629 = vadd.xlane.f32.xlu0 %v616_v37  ;;  %v619_v39 = vadd.f32 %v2018_v36, %v484_v31 }
 0x1d7   : > { %v2019_v38 = vpop.f32.mrb[4].mxu0 }
 0x1d8   : > { %v2020_v40 = vpop.f32.mrb[5].mxu0 }
 0x1d9   : > { %v2021_v41 = vadd.f32 %v2020_v40, %v2019_v38  ;;  %v2022_v42 = vpop.f32.mrb[6].mxu0  ;;  %631 = vadd.xlane.f32.xlu0 %v619_v39 }
 0x1da   : > { %v2023_v43 = vpop.f32.mrb[7].mxu0 }
 0x1db   : > { %v624_v44 = vadd.f32 %v2021_v41, %v484_v31  ;;  %v666_v31 = vrot.slane %v2986_v29, %v3004_v26 }
 0x1dd   : > { %633 = vadd.xlane.f32.xlu1 %v624_v44 }
 0x262   : > { %v630_v47 = vpop.xlane.xlu0 %629 }
 0x263   : > { %v636_v48 = vmul.f32 0.0078125, %v630_v47 }
 0x265   : > { %v2990_v49 = vsub.f32 %v616_v37, %v636_v48 }
 0x266   : > { %v632_v50 = vpop.xlane.xlu0 %631 }
 0x267   : > { %v637_v51 = vmul.f32 0.0078125, %v632_v50  ;;  %v642_v52 = vmul.f32 %v2990_v49, %v2990_v49  ;;  %v724_v50 = vsub.s32 4, %v2981_v27 }
 0x269   : > { %v2994_v53 = vsub.f32 %v619_v39, %v637_v51  ;;  %645 = vadd.xlane.f32.xlu1 %v642_v52  ;;  %v3021_v51 = vld [vmem:[%s3197_s4] sm:$0x77] }
 0x26a   : > { %v634_v54 = vpop.xlane.xlu1 %633  ;;  %v721_v52 = vrot.slane %v3021_v51, %v2984_v28 }
 0x26b   : > { %v638_v55 = vmul.f32 0.0078125, %v634_v54  ;;  %v643_v56 = vmul.f32 %v2994_v53, %v2994_v53  ;;  %v3031_v54 = vld [vmem:[%s3197_s4 + $0x8] sm:$0x7] }
 0x26d   : > { %v2998_v57 = vsub.f32 %v624_v44, %v638_v55  ;;  %647 = vadd.xlane.f32.xlu0 %v643_v56  ;;  %v736_v55 = vrot.slane %v721_v52, %v2984_v28 }
 0x26f   : > { %v644_v58 = vmul.f32 %v2998_v57, %v2998_v57 }
 0x271   : > { %649 = vadd.xlane.f32.xlu1 %v644_v58 }
 0x2f6   : > { %v646_v18 = vpop.xlane.xlu1 %645 }
 0x2f7   : > { %v651_v19 = vmul.f32 0.0078125, %v646_v18 }
 0x2f9   : > { %v654_v20 = vadd.f32 1e-05, %v651_v19 }
 0x2fa   : > { %v648_v21 = vpop.xlane.xlu0 %647 }
 0x2fb   : > { %2329 = vrsqrt.f32 %v654_v20  ;;  %v652_v22 = vmul.f32 0.0078125, %v648_v21 }
 0x2fd   : > { %v655_v23 = vadd.f32 1e-05, %v652_v22 }
 0x2fe   : > { %v650_v24 = vpop.xlane.xlu1 %649 }
 0x2ff   : > { %2331 = vrsqrt.f32 %v655_v23  ;;  %v653_v25 = vmul.f32 0.0078125, %v650_v24  ;;  %v2281_v23 = vld [vmem:[#allocation10 + $0x40] sm:$0xff]  }
 0x300   : > { %v2282_v24 = vld [vmem:[#allocation10] sm:$0xff]   ;;  %2035 = vmatprep.subr.bf16.mxu1 %v2281_v23 }
 0x301   : > { %v656_v30 = vadd.f32 1e-05, %v653_v25  ;;  %v2283_v25 = vld [vmem:[#allocation10 + $0x80] sm:$0xff]  }
 0x302   : > { %2093 = vmatprep.subr.bf16.mxu0 %v2283_v25 }
 0x303   : > { %2333 = vrsqrt.f32 %v656_v30 }
 0x305   : > { %v2330_v33 = vpop.eup %2329 }
 0x306   : > { %v660_v34 = vmul.f32 %v2330_v33, %v2990_v49 }
 0x308   : > { %v667_v36 = vmul.f32 %v666_v31, %v660_v34 }
 0x309   : > { %v2332_v37 = vpop.eup %2331 }
 0x30a   : > { %v661_v38 = vmul.f32 %v2332_v37, %v2994_v53  ;;  %v674_v40 = vadd.f32 %v673_v35, %v667_v36  ;;  %v725_v53 = vrot.slane %v3021_v51, %v724_v50 }
 0x30c   : > { %v668_v39 = vmul.f32 %v666_v31, %v661_v38  ;;  %v677_v45 = vmax.f32 %v674_v40, 0.0  ;;  %v740_v56 = vrot.slane %v725_v53, %v2984_v28 }
 0x30d   : > { %v2334_v41 = vpop.eup %2333 }
 0x30e   : > { %v662_v42 = vmul.f32 %v2334_v41, %v2998_v57  ;;  %v675_v43 = vadd.f32 %v673_v35, %v668_v39  ;;  %v729_v57 = vrot.slane %v3031_v54, %v2984_v28 }
 0x310   : > { %v669_v44 = vmul.f32 %v666_v31, %v662_v42  ;;  %v678_v46 = vmax.f32 %v675_v43, 0.0  ;;  %v744_v63 = vrot.slane %v729_v57, %v2984_v28 }
 0x312   : > { %v680_v47 = vpack.c.bf16 %v678_v46, %v677_v45  ;;  %v676_v48 = vadd.f32 %v673_v35, %v669_v44 }
 0x314   : > { %906 = vmatmul.mubr.bf16.vlgmr.msra.gmra.mrb[0].mxu1 %v680_v47  ;;  %2089 = vmatprep.mubr.bf16.mxu0 %v680_v47  ;;  %v679_v49 = vmax.f32 %v676_v48, 0.0 }
 0x315   : > { %915 = vmatprep.mubr.bf16.mxu1 %v2646_v16  ;;  %2036 = vmatpush3.bf16.msra.mxu1 %v2282_v24 }
 0x316   : > { %v681_v29 = vpack.c.bf16 %v679_v49, %v679_v49 }
 0x318   : > { %2090 = vmatmul.mubr.bf16.vlgmr.msra.gmra.mrb[8].mxu0 %v681_v29 }
 0x319   : > { %2094 = vmatpush3.bf16.msra.mxu0 %v2283_v25 }
 0x31c   : > { %916 = vmatmul.mubr.bf16.gmra.mrb[4].mxu1 %v681_v29 }
 0x3e7   : > { %v907_v58 = vpop.f32.mrb[0].mxu1 }
 0x3e8   : > { %v909_v59 = vpop.f32.mrb[1].mxu1  ;;  %v908_v60 = vadd.f32 %v907_v58, %v736_v55 }
 0x3e9   : > { %v910_v61 = vadd.f32 %v909_v59, %v740_v56  ;;  %v911_v62 = vpop.f32.mrb[2].mxu1 }
 0x3ea   : > { %v913_v0 = vpop.f32.mrb[3].mxu1  ;;  %v912_v1 = vadd.f32 %v911_v62, %v736_v55 }
 0x3eb   : > { %v914_v2 = vadd.f32 %v913_v0, %v740_v56  ;;  %v2091_v3 = vpop.f32.mrb[8].mxu0  ;;  %v972_v5 = vadd.f32 %v910_v61, %v908_v60  ;;  %v2285_v0 = vld [vmem:[#allocation10 + $0x8] sm:$0xff]  }
 0x3ec   : > { %v958_v4 = vpop.f32.mrb[9].mxu0  ;;  %v967_v20 = vadd.f32 %v2091_v3, %v744_v63  ;;  %v2288_v3 = vld [vmem:[#allocation10 + $0x10] sm:$0xff]  }
 0x3ed   : > { %v959_v6 = vadd.f32 %v958_v4, %v744_v63  ;;  %v2092_v7 = vpop.f32.mrb[10].mxu0  ;;  %v976_v9 = vadd.f32 %v914_v2, %v912_v1  ;;  %v2289_v4 = vld [vmem:[#allocation10 + $0x90] sm:$0xff]  }
 0x3ee   : > { %v961_v8 = vpop.f32.mrb[11].mxu0  ;;  %v2292_v7 = vld [vmem:[#allocation10 + $0x98] sm:$0xff]  }
 0x3ef   : > { %v962_v10 = vadd.f32 %v961_v8, %v744_v63  ;;  %v917_v11 = vpop.f32.mrb[4].mxu1  ;;  %v973_v12 = vadd.f32 %v972_v5, %v959_v6  ;;  %v2284_v63 = vld [vmem:[#allocation10 + $0x48] sm:$0xff]   ;;  %v2290_v5 = vld [vmem:[#allocation10 + $0x58] sm:$0xff]   ;;  %v2293_v8 = vld [vmem:[#allocation10 + $0x60] sm:$0xff]  }
 0x3f0   : > { %v918_v13 = vadd.f32 %v917_v11, %v736_v55  ;;  %v919_v14 = vpop.f32.mrb[5].mxu1  ;;  %2037 = vmatprep.subr.bf16.mxu1 %v2284_v63  ;;  %v2296_v11 = vld [vmem:[#allocation10 + $0x68] sm:$0xff]  }
 0x3f1   : > { %v920_v15 = vadd.f32 %v919_v14, %v740_v56  ;;  %v921_v17 = vpop.f32.mrb[6].mxu1  ;;  %974 = vadd.xlane.f32.xlu0 %v973_v12  ;;  %v977_v18 = vadd.f32 %v976_v9, %v962_v10  ;;  %2038 = vmatpush3.bf16.msra.mxu1 %v2285_v0  ;;  %v2294_v9 = vld [vmem:[#allocation10 + $0x20] sm:$0xff]   ;;  %v2297_v12 = vld [vmem:[#allocation10 + $0x28] sm:$0xff]   ;;  %v2299_v14 = vld [vmem:[#allocation10 + $0x70] sm:$0xff]  }
 0x3f2   : > { %v922_v19 = vpop.f32.mrb[7].mxu1  ;;  %v2301_v17 = vld [vmem:[#allocation10 + $0xb0] sm:$0xff]  }
 0x3f3   : > { %v980_v21 = vadd.f32 %v920_v15, %v918_v13  ;;  %978 = vadd.xlane.f32.xlu1 %v977_v18  ;;  %v2302_v18 = vld [vmem:[#allocation10 + $0x78] sm:$0xff]  }
 0x3f4   : > { %v2303_v19 = vld [vmem:[#allocation10 + $0x38] sm:$0xff]  }
 0x3f5   : > { %v981_v22 = vadd.f32 %v980_v21, %v967_v20 }
 0x3f7   : > { %982 = vadd.xlane.f32.xlu0 %v981_v22 }
 0x47e   : > { %v975_v30 = vpop.xlane.xlu0 %974 }
 0x47f   : > { %v985_v31 = vmul.f32 0.0026041667, %v975_v30 }
 0x480   : > { %v979_v33 = vpop.xlane.xlu1 %978 }
 0x481   : > { %v3038_v34 = vsub.f32 %v908_v60, %v985_v31  ;;  %v3040_v35 = vsub.f32 %v910_v61, %v985_v31  ;;  %v986_v36 = vmul.f32 0.0026041667, %v979_v33  ;;  %v3042_v37 = vsub.f32 %v959_v6, %v985_v31  ;;  %v2291_v6 = vld [vmem:[#allocation10 + $0x18] sm:$0xff]  }
 0x483   : > { %v3044_v38 = vsub.f32 %v912_v1, %v986_v36  ;;  %v3046_v39 = vsub.f32 %v914_v2, %v986_v36  ;;  %v3048_v40 = vsub.f32 %v962_v10, %v986_v36  ;;  %v997_v41 = vmul.f32 %v3038_v34, %v3038_v34  ;;  %v2286_v1 = vld [vmem:[#allocation10 + $0x88] sm:$0xff]   ;;  %v2287_v2 = vld [vmem:[#allocation10 + $0x50] sm:$0xff]   ;;  %v2295_v10 = vld [vmem:[#allocation10 + $0xa0] sm:$0xff]  }
 0x484   : > { %v983_v42 = vpop.xlane.xlu0 %982  ;;  %v998_v43 = vmul.f32 %v3040_v35, %v3040_v35  ;;  %v999_v47 = vmul.f32 %v3042_v37, %v3042_v37  ;;  %2095 = vmatprep.subr.bf16.mxu0 %v2286_v1  ;;  %2039 = vmatprep.subr.bf16.mxu1 %v2287_v2  ;;  %v1042_v36 = vsub.s32 5, %v2981_v27 }
 0x485   : > { %v987_v44 = vmul.f32 0.0026041667, %v983_v42  ;;  %v1000_v45 = vmul.f32 %v3044_v38, %v3044_v38  ;;  %v1001_v46 = vmul.f32 %v3046_v39, %v3046_v39  ;;  %v1002_v49 = vmul.f32 %v3048_v40, %v3048_v40  ;;  %2096 = vmatpush3.bf16.msra.mxu0 %v2286_v1  ;;  %2040 = vmatpush3.bf16.msra.mxu1 %v2288_v3 }
 0x486   : > { %v1006_v48 = vadd.f32 %v998_v43, %v997_v41  ;;  %2097 = vmatprep.subr.bf16.mxu0 %v2289_v4  ;;  %2041 = vmatprep.subr.bf16.mxu1 %v2290_v5  ;;  %v1078_v41 = vsub.s32 6, %v2981_v27  ;;  %v1047_v43 = vrot.slane %v3031_v54, %v3004_v26 }
 0x487   : > { %v3062_v29 = vsub.f32 %v918_v13, %v987_v44  ;;  %v3064_v52 = vsub.f32 %v920_v15, %v987_v44  ;;  %v3066_v53 = vsub.f32 %v967_v20, %v987_v44  ;;  %v1010_v55 = vadd.f32 %v1001_v46, %v1000_v45  ;;  %v2298_v13 = vld [vmem:[#allocation10 + $0xa8] sm:$0xff]   ;;  %v2300_v15 = vld [vmem:[#allocation10 + $0x30] sm:$0xff]   ;;  %v2304_v20 = vld [vmem:[#allocation10 + $0xb8] sm:$0xff]  }
 0x488   : > { %v1007_v56 = vadd.f32 %v1006_v48, %v999_v47  ;;  %v1043_v44 = vrot.slane %v3021_v51, %v1042_v36  ;;  %v1039_v45 = vrot.slane %v3021_v51, %v3004_v26  ;;  %v1083_v46 = vrot.slane %v3031_v54, %v3009_v32 }
 0x489   : > { %v1011_v57 = vadd.f32 %v1010_v55, %v1002_v49  ;;  %v1003_v58 = vmul.f32 %v3062_v29, %v3062_v29  ;;  %v1004_v59 = vmul.f32 %v3064_v52, %v3064_v52  ;;  %v1005_v60 = vmul.f32 %v3066_v53, %v3066_v53  ;;  %2098 = vmatpush3.bf16.msra.mxu0 %v2289_v4 }
 0x48a   : > { %1008 = vadd.xlane.f32.xlu1 %v1007_v56  ;;  %2042 = vmatpush3.bf16.msra.mxu1 %v2291_v6  ;;  %v1079_v47 = vrot.slane %v3021_v51, %v1078_v41  ;;  %v1075_v48 = vrot.slane %v3021_v51, %v3009_v32  ;;  %v1058_v49 = vrot.slane %v1043_v44, %v3004_v26 }
 0x48b   : > { %1012 = vadd.xlane.f32.xlu0 %v1011_v57  ;;  %v1014_v61 = vadd.f32 %v1004_v59, %v1003_v58  ;;  %2099 = vmatprep.subr.bf16.mxu0 %v2292_v7  ;;  %v1062_v55 = vrot.slane %v1047_v43, %v3004_v26  ;;  %v1054_v56 = vrot.slane %v1039_v45, %v3004_v26 }
 0x48c   : > { %2043 = vmatprep.subr.bf16.mxu1 %v2293_v8  ;;  %v1094_v58 = vrot.slane %v1079_v47, %v3009_v32  ;;  %v1098_v59 = vrot.slane %v1083_v46, %v3009_v32  ;;  %v1090_v51 = vrot.slane %v1075_v48, %v3009_v32 }
 0x48d   : > { %v1015_v62 = vadd.f32 %v1014_v61, %v1005_v60  ;;  %2100 = vmatpush3.bf16.msra.mxu0 %v2292_v7 }
 0x48e   : > { %2044 = vmatpush3.bf16.msra.mxu1 %v2294_v9  ;;  %2101 = vmatprep.subr.bf16.mxu0 %v2295_v10 }
 0x48f   : > { %1016 = vadd.xlane.f32.xlu1 %v1015_v62  ;;  %2045 = vmatprep.subr.bf16.mxu1 %v2296_v11 }
 0x491   : > { %2102 = vmatpush3.bf16.msra.mxu0 %v2295_v10 }
 0x492   : > { %2046 = vmatpush3.bf16.msra.mxu1 %v2297_v12  ;;  %2103 = vmatprep.subr.bf16.mxu0 %v2298_v13 }
 0x493   : > { %2047 = vmatprep.subr.bf16.mxu1 %v2299_v14 }
 0x495   : > { %2104 = vmatpush3.bf16.msra.mxu0 %v2298_v13 }
 0x496   : > { %2048 = vmatpush3.bf16.msra.mxu1 %v2300_v15  ;;  %2105 = vmatprep.subr.bf16.mxu0 %v2301_v17 }
 0x497   : > { %2049 = vmatprep.subr.bf16.mxu1 %v2302_v18 }
 0x499   : > { %2106 = vmatpush3.bf16.msra.mxu0 %v2301_v17 }
 0x49a   : > { %2050 = vmatpush3.bf16.msra.mxu1 %v2303_v19  ;;  %2107 = vmatprep.subr.bf16.mxu0 %v2304_v20 }
 0x49d   : > { %2108 = vmatpush3.bf16.msra.mxu0 %v2304_v20 }
 0x517   : > { %v1009_v21 = vpop.xlane.xlu1 %1008 }
 0x518   : > { %v1018_v22 = vmul.f32 0.0026041667, %v1009_v21  ;;  %v1013_v23 = vpop.xlane.xlu0 %1012 }
 0x519   : > { %v1019_v24 = vmul.f32 0.0026041667, %v1013_v23 }
 0x51a   : > { %v1021_v25 = vadd.f32 1e-05, %v1018_v22 }
 0x51b   : > { %v1022_v30 = vadd.f32 1e-05, %v1019_v24 }
 0x51c   : > { %2335 = vrsqrt.f32 %v1021_v25  ;;  %v1017_v31 = vpop.xlane.xlu1 %1016 }
 0x51d   : > { %2337 = vrsqrt.f32 %v1022_v30  ;;  %v1020_v33 = vmul.f32 0.0026041667, %v1017_v31 }
 0x51f   : > { %v1023_v42 = vadd.f32 1e-05, %v1020_v33 }
 0x521   : > { %2339 = vrsqrt.f32 %v1023_v42 }
 0x526   : > { %v2336_v57 = vpop.eup %2335 }
 0x527   : > { %v2338_v60 = vpop.eup %2337  ;;  %v1028_v54 = vmul.f32 %v2336_v57, %v3040_v35  ;;  %v1029_v61 = vmul.f32 %v2336_v57, %v3042_v37  ;;  %v1027_v62 = vmul.f32 %v2336_v57, %v3038_v34 }
 0x528   : > { %v1031_v63 = vmul.f32 %v2338_v60, %v3046_v39  ;;  %v1032_v0 = vmul.f32 %v2338_v60, %v3048_v40  ;;  %v1030_v1 = vmul.f32 %v2338_v60, %v3044_v38 }
 0x529   : > { %v1064_v2 = vmul.f32 %v1058_v49, %v1028_v54  ;;  %v1065_v3 = vmul.f32 %v1062_v55, %v1029_v61  ;;  %v1063_v4 = vmul.f32 %v1054_v56, %v1027_v62 }
 0x52a   : > { %v1067_v5 = vmul.f32 %v1058_v49, %v1031_v63  ;;  %v1068_v6 = vmul.f32 %v1062_v55, %v1032_v0  ;;  %v1066_v7 = vmul.f32 %v1054_v56, %v1030_v1 }
 0x52b   : > { %v2340_v8 = vpop.eup %2339  ;;  %v1100_v35 = vadd.f32 %v1094_v58, %v1064_v2  ;;  %v1101_v9 = vadd.f32 %v1098_v59, %v1065_v3  ;;  %v1099_v37 = vadd.f32 %v1090_v51, %v1063_v4 }
 0x52c   : > { %v1103_v10 = vadd.f32 %v1094_v58, %v1067_v5  ;;  %v1104_v34 = vadd.f32 %v1098_v59, %v1068_v6  ;;  %v1102_v11 = vadd.f32 %v1090_v51, %v1066_v7  ;;  %v1034_v12 = vmul.f32 %v2340_v8, %v3064_v52  ;;  %v2305_v6 = vld [vmem:[#allocation13] ss:$8 sps:$4 sm:$0xff]   ;;  %v2307_v7 = vld [vmem:[#allocation13 + $0x4] ss:$8 sps:$4 sm:$0xff]  }
 0x52d   : > { %v1109_v39 = vmax.f32 %v1100_v35, 0.0  ;;  %v1110_v13 = vmax.f32 %v1101_v9, 0.0  ;;  %v1108_v40 = vmax.f32 %v1099_v37, 0.0  ;;  %v1035_v38 = vmul.f32 %v2340_v8, %v3066_v53  ;;  %1584 = vmatprep.subr.bf16.mxu1 %v2307_v7  ;;  %v2308_v35 = vld [vmem:[#allocation13 + $0x10] ss:$8 sps:$4 sm:$0xff]  }
 0x52e   : > { %v1112_v14 = vmax.f32 %v1103_v10, 0.0  ;;  %v1113_v15 = vmax.f32 %v1104_v34, 0.0  ;;  %v1111_v17 = vmax.f32 %v1102_v11, 0.0  ;;  %v1070_v18 = vmul.f32 %v1058_v49, %v1034_v12 }
 0x52f   : > { %v1071_v19 = vmul.f32 %v1062_v55, %v1035_v38  ;;  %v1033_v20 = vmul.f32 %v2340_v8, %v3062_v29  ;;  %v3106_v29 = vld [vmem:[#allocation11] sm:$0x7] }
 0x530   : > { %v1118_v21 = vpack.c.bf16 %v1112_v14, %v1109_v39  ;;  %v1119_v22 = vpack.c.bf16 %v1113_v15, %v1110_v13  ;;  %v1117_v23 = vpack.c.bf16 %v1111_v17, %v1108_v40  ;;  %v1106_v24 = vadd.f32 %v1094_v58, %v1070_v18  ;;  %v2310_v8 = vld [vmem:[#allocation13 + $0x14] ss:$8 sps:$4 sm:$0xff]   ;;  %v2313_v17 = vld [vmem:[#allocation13 + $0x24] ss:$8 sps:$4 sm:$0xff]   ;;  %v2311_v18 = vld [vmem:[#allocation13 + $0x20] ss:$8 sps:$4 sm:$0xff]  }
 0x531   : > { %v1107_v25 = vadd.f32 %v1098_v59, %v1071_v19  ;;  %v1069_v30 = vmul.f32 %v1054_v56, %v1033_v20  ;;  %v1175_v46 = vrot.slane %v3106_v29, %v2984_v28  ;;  %v2316_v19 = vld [vmem:[#allocation13 + $0x34] ss:$8 sps:$4 sm:$0xff]   ;;  %v2314_v20 = vld [vmem:[#allocation13 + $0x30] ss:$8 sps:$4 sm:$0xff]  }
 0x532   : > { %1352 = vmatprep.mubr.bf16.mxu1 %v1118_v21  ;;  %2109 = vmatprep.mubr.bf16.mxu0 %v1119_v22  ;;  %v1115_v52 = vmax.f32 %v1106_v24, 0.0  ;;  %v2319_v21 = vld [vmem:[#allocation13 + $0x44] ss:$8 sps:$4 sm:$0xff]   ;;  %v2317_v22 = vld [vmem:[#allocation13 + $0x40] ss:$8 sps:$4 sm:$0xff]  }
 0x533   : > { %1353 = vmatmul.mubr.bf16.vlgmr.msra.gmra.mrb[8].mxu1 %v1117_v23  ;;  %v1116_v31 = vmax.f32 %v1107_v25, 0.0  ;;  %v1105_v33 = vadd.f32 %v1090_v51, %v1069_v30  ;;  %v2322_v23 = vld [vmem:[#allocation13 + $0x54] ss:$8 sps:$4 sm:$0xff]   ;;  %v2320_v24 = vld [vmem:[#allocation13 + $0x50] ss:$8 sps:$4 sm:$0xff]  }
 0x534   : > { %v1121_v53 = vpack.c.bf16 %v1115_v52, %v1115_v52  ;;  %1585 = vmatpush1.bf16.msra.mxu1 %v2305_v6  ;;  %v2323_v25 = vld [vmem:[#allocation13 + $0x60] ss:$8 sps:$4 sm:$0xff]   ;;  %v2325_v30 = vld [vmem:[#allocation13 + $0x64] ss:$8 sps:$4 sm:$0xff]   ;;  %v2328_v52 = vld [vmem:[#allocation13 + $0x74] ss:$8 sps:$4 sm:$0xff]  }
 0x535   : > { %v1122_v42 = vpack.c.bf16 %v1116_v31, %v1116_v31  ;;  %v1114_v43 = vmax.f32 %v1105_v33, 0.0  ;;  %1586 = vmatprep.subr.bf16.mxu1 %v2310_v8  ;;  %v2326_v31 = vld [vmem:[#allocation13 + $0x70] ss:$8 sps:$4 sm:$0xff]  }
 0x536   : > { %1360 = vmatprep.mubr.bf16.mxu1 %v1121_v53 }
 0x537   : > { %2110 = vmatmul.mubr.bf16.vlgmr.msra.gmra.mrb[12].mxu0 %v1122_v42  ;;  %v1120_v44 = vpack.c.bf16 %v1114_v43, %v1114_v43 }
 0x538   : > { %1587 = vmatpush1.bf16.msra.mxu1 %v2308_v35 }
 0x539   : > { %1588 = vmatprep.subr.bf16.mxu1 %v2313_v17 }
 0x53b   : > { %1361 = vmatmul.mubr.bf16.gmra.mrb[12].mxu1 %v1120_v44 }
 0x53c   : > { %1616 = vmatprep.mubr.bf16.mxu1 %v2646_v16  ;;  %1589 = vmatpush1.bf16.msra.mxu1 %v2311_v18 }
 0x53d   : > { %1590 = vmatprep.subr.bf16.mxu1 %v2316_v19 }
 0x540   : > { %1591 = vmatpush1.bf16.msra.mxu1 %v2314_v20 }
 0x541   : > { %1592 = vmatprep.subr.bf16.mxu1 %v2319_v21 }
 0x544   : > { %1593 = vmatpush1.bf16.msra.mxu1 %v2317_v22 }
 0x545   : > { %1594 = vmatprep.subr.bf16.mxu1 %v2322_v23 }
 0x548   : > { %1595 = vmatpush1.bf16.msra.mxu1 %v2320_v24 }
 0x549   : > { %1596 = vmatprep.subr.bf16.mxu1 %v2325_v30 }
 0x54c   : > { %1597 = vmatpush1.bf16.msra.mxu1 %v2323_v25 }
 0x54d   : > { %1598 = vmatprep.subr.bf16.mxu1 %v2328_v52 }
 0x550   : > { %1599 = vmatpush1.bf16.msra.mxu1 %v2326_v31 }
 0x606   : > { %v2051_v45 = vpop.f32.mrb[8].mxu1 }
 0x607   : > { %v2052_v47 = vpop.f32.mrb[9].mxu1 }
 0x608   : > { %v2053_v48 = vadd.f32 %v2052_v47, %v2051_v45  ;;  %v2054_v49 = vpop.f32.mrb[10].mxu1 }
 0x609   : > { %v2055_v55 = vpop.f32.mrb[11].mxu1 }
 0x60a   : > { %v2056_v56 = vadd.f32 %v2055_v55, %v2054_v49  ;;  %v2111_v57 = vpop.f32.mrb[12].mxu0  ;;  %v1355_v58 = vadd.f32 %v2053_v48, %v1175_v46  ;;  %v1452_v49 = vrot.slane %v3106_v29, %v3004_v26 }
 0x60b   : > { %v1402_v59 = vpop.f32.mrb[13].mxu0 }
 0x60c   : > { %v1403_v60 = vadd.f32 %v1402_v59, %v1355_v58  ;;  %v2112_v54 = vpop.f32.mrb[14].mxu0  ;;  %v1358_v61 = vadd.f32 %v2056_v56, %v1175_v46  ;;  %v1459_v56 = vrot.slane %v3106_v29, %v3009_v32  ;;  %v3118_v29 = vld [vmem:[%s3201_s8] sm:$0x77] }
 0x60d   : > { %v1405_v62 = vpop.f32.mrb[15].mxu0  ;;  %v1489_v7 = vrot.slane %v3118_v29, %v2984_v28  ;;  %v1493_v8 = vrot.slane %v3118_v29, %v724_v50 }
 0x60e   : > { %v1406_v51 = vadd.f32 %v1405_v62, %v1358_v61  ;;  %v2057_v63 = vpop.f32.mrb[12].mxu1  ;;  %1416 = vadd.xlane.f32.xlu0 %v1403_v60 }
 0x60f   : > { %v2058_v0 = vpop.f32.mrb[13].mxu1  ;;  %v1499_v35 = vrot.slane %v1489_v7, %v2984_v28 }
 0x610   : > { %v2059_v1 = vadd.f32 %v2058_v0, %v2057_v63  ;;  %v2060_v2 = vpop.f32.mrb[14].mxu1  ;;  %1418 = vadd.xlane.f32.xlu1 %v1406_v51 }
 0x611   : > { %v2061_v3 = vpop.f32.mrb[15].mxu1 }
 0x612   : > { %v1363_v4 = vadd.f32 %v2059_v1, %v1175_v46 }
 0x614   : > { %v1411_v5 = vadd.f32 %v2111_v57, %v1363_v4 }
 0x616   : > { %1420 = vadd.xlane.f32.xlu0 %v1411_v5 }
 0x69b   : > { %v1417_v9 = vpop.xlane.xlu0 %1416 }
 0x69c   : > { %v1422_v37 = vmul.f32 0.0078125, %v1417_v9  ;;  %v1503_v9 = vrot.slane %v1493_v8, %v2984_v28 }
 0x69d   : > { %v1419_v10 = vpop.xlane.xlu1 %1418 }
 0x69e   : > { %v1425_v34 = vsub.f32 %v1403_v60, %v1422_v37  ;;  %v1423_v11 = vmul.f32 0.0078125, %v1419_v10 }
 0x6a0   : > { %v1426_v12 = vsub.f32 %v1406_v51, %v1423_v11  ;;  %v1428_v39 = vmul.f32 %v1425_v34, %v1425_v34 }
 0x6a2   : > { %1431 = vadd.xlane.f32.xlu1 %v1428_v39  ;;  %v1429_v13 = vmul.f32 %v1426_v12, %v1426_v12 }
 0x6a3   : > { %v1421_v40 = vpop.xlane.xlu0 %1420 }
 0x6a4   : > { %v1424_v38 = vmul.f32 0.0078125, %v1421_v40  ;;  %1433 = vadd.xlane.f32.xlu0 %v1429_v13 }
 0x6a6   : > { %v1427_v14 = vsub.f32 %v1411_v5, %v1424_v38 }
 0x6a8   : > { %v1430_v15 = vmul.f32 %v1427_v14, %v1427_v14 }
 0x6aa   : > { %1435 = vadd.xlane.f32.xlu1 %v1430_v15 }
 0x72f   : > { %v1432_v33 = vpop.xlane.xlu1 %1431 }
 0x730   : > { %v1437_v53 = vmul.f32 0.0078125, %v1432_v33 }
 0x731   : > { %v1434_v42 = vpop.xlane.xlu0 %1433 }
 0x732   : > { %v1440_v43 = vadd.f32 1e-05, %v1437_v53  ;;  %v1438_v44 = vmul.f32 0.0078125, %v1434_v42 }
 0x734   : > { %2341 = vrsqrt.f32 %v1440_v43  ;;  %v1441_v45 = vadd.f32 1e-05, %v1438_v44 }
 0x736   : > { %2343 = vrsqrt.f32 %v1441_v45 }
 0x737   : > { %v1436_v46 = vpop.xlane.xlu1 %1435 }
 0x738   : > { %v1439_v47 = vmul.f32 0.0078125, %v1436_v46 }
 0x73a   : > { %v1442_v48 = vadd.f32 1e-05, %v1439_v47 }
 0x73c   : > { %2345 = vrsqrt.f32 %v1442_v48 }
 0x73e   : > { %v2342_v55 = vpop.eup %2341 }
 0x73f   : > { %v1446_v57 = vmul.f32 %v2342_v55, %v1425_v34 }
 0x740   : > { %v2344_v58 = vpop.eup %2343 }
 0x741   : > { %v1453_v59 = vmul.f32 %v1452_v49, %v1446_v57  ;;  %v1447_v60 = vmul.f32 %v2344_v58, %v1426_v12 }
 0x743   : > { %v1454_v54 = vmul.f32 %v1452_v49, %v1447_v60  ;;  %v1460_v61 = vadd.f32 %v1459_v56, %v1453_v59 }
 0x745   : > { %v1461_v62 = vadd.f32 %v1459_v56, %v1454_v54  ;;  %v1463_v63 = vmax.f32 %v1460_v61, 0.0 }
 0x746   : > { %v2346_v51 = vpop.eup %2345 }
 0x747   : > { %v1464_v0 = vmax.f32 %v1461_v62, 0.0  ;;  %v1448_v1 = vmul.f32 %v2346_v51, %v1427_v14 }
 0x749   : > { %v1466_v2 = vpack.c.bf16 %v1464_v0, %v1463_v63  ;;  %v1455_v3 = vmul.f32 %v1452_v49, %v1448_v1  ;;  %v1687_v63 = vrot.slane %v3118_v29, %v3004_v26  ;;  %v1691_v0 = vrot.slane %v3118_v29, %v1042_v36 }
 0x74b   : > { %1617 = vmatmul.mubr.bf16.vlgmr.msra.gmra.mrb[16].mxu1 %v1466_v2  ;;  %v1462_v4 = vadd.f32 %v1459_v56, %v1455_v3  ;;  %v1711_v2 = vrot.slane %v3118_v29, %v3009_v32  ;;  %v1715_v3 = vrot.slane %v3118_v29, %v1078_v41 }
 0x74c   : > { %1626 = vmatprep.mubr.bf16.mxu1 %v2646_v16 }
 0x74d   : > { %v1465_v5 = vmax.f32 %v1462_v4, 0.0  ;;  %v1697_v4 = vrot.slane %v1687_v63, %v3004_v26  ;;  %v1721_v7 = vrot.slane %v1711_v2, %v3009_v32  ;;  %v1725_v8 = vrot.slane %v1715_v3, %v3009_v32 }
 0x74f   : > { %v1467_v6 = vpack.c.bf16 %v1465_v5, %v1465_v5  ;;  %v1701_v5 = vrot.slane %v1691_v0, %v3004_v26 }
 0x753   : > { %1627 = vmatmul.mubr.bf16.gmra.mrb[20].mxu1 %v1467_v6 }
 0x81e   : > { %v1618_v16 = vpop.f32.mrb[16].mxu1 }
 0x81f   : > { %v1619_v37 = vadd.f32 %v1618_v16, %v1499_v35  ;;  %v1620_v10 = vpop.f32.mrb[17].mxu1 }
 0x820   : > { %v1621_v34 = vadd.f32 %v1620_v10, %v1503_v9  ;;  %v1622_v11 = vpop.f32.mrb[18].mxu1 }
 0x821   : > { %v1623_v12 = vadd.f32 %v1622_v11, %v1499_v35  ;;  %v1624_v39 = vpop.f32.mrb[19].mxu1 }
 0x822   : > { %v1625_v13 = vadd.f32 %v1624_v39, %v1503_v9  ;;  %v1635_v40 = vadd.f32 %v1621_v34, %v1619_v37 }
 0x824   : > { %1636 = vadd.xlane.f32.xlu0 %v1635_v40  ;;  %v1638_v38 = vadd.f32 %v1625_v13, %v1623_v12 }
 0x826   : > { %v1628_v14 = vpop.f32.mrb[20].mxu1  ;;  %1639 = vadd.xlane.f32.xlu1 %v1638_v38 }
 0x827   : > { %v1629_v15 = vadd.f32 %v1628_v14, %v1499_v35  ;;  %v1630_v17 = vpop.f32.mrb[21].mxu1 }
 0x828   : > { %v1631_v50 = vadd.f32 %v1630_v17, %v1503_v9  ;;  %v1632_v18 = vpop.f32.mrb[22].mxu1 }
 0x829   : > { %v1633_v19 = vpop.f32.mrb[23].mxu1 }
 0x82a   : > { %v1641_v20 = vadd.f32 %v1631_v50, %v1629_v15 }
 0x82c   : > { %1642 = vadd.xlane.f32.xlu0 %v1641_v20 }
 0x8b1   : > { %v1637_v28 = vpop.xlane.xlu0 %1636 }
 0x8b2   : > { %v1645_v21 = vmul.f32 0.00390625, %v1637_v28 }
 0x8b3   : > { %v1640_v22 = vpop.xlane.xlu1 %1639 }
 0x8b4   : > { %v1648_v23 = vsub.f32 %v1619_v37, %v1645_v21  ;;  %v1649_v24 = vsub.f32 %v1621_v34, %v1645_v21  ;;  %v1646_v25 = vmul.f32 0.00390625, %v1640_v22 }
 0x8b6   : > { %v1650_v30 = vsub.f32 %v1623_v12, %v1646_v25  ;;  %v1651_v52 = vsub.f32 %v1625_v13, %v1646_v25  ;;  %v1654_v31 = vmul.f32 %v1648_v23, %v1648_v23  ;;  %v1655_v33 = vmul.f32 %v1649_v24, %v1649_v24 }
 0x8b8   : > { %v1660_v53 = vadd.f32 %v1655_v33, %v1654_v31  ;;  %v1656_v42 = vmul.f32 %v1650_v30, %v1650_v30  ;;  %v1657_v43 = vmul.f32 %v1651_v52, %v1651_v52 }
 0x8b9   : > { %v1643_v44 = vpop.xlane.xlu0 %1642 }
 0x8ba   : > { %v1647_v45 = vmul.f32 0.00390625, %v1643_v44  ;;  %1661 = vadd.xlane.f32.xlu1 %v1660_v53  ;;  %v1663_v46 = vadd.f32 %v1657_v43, %v1656_v42 }
 0x8bc   : > { %v1652_v47 = vsub.f32 %v1629_v15, %v1647_v45  ;;  %v1653_v48 = vsub.f32 %v1631_v50, %v1647_v45  ;;  %1664 = vadd.xlane.f32.xlu0 %v1663_v46 }
 0x8be   : > { %v1658_v49 = vmul.f32 %v1652_v47, %v1652_v47  ;;  %v1659_v55 = vmul.f32 %v1653_v48, %v1653_v48 }
 0x8c0   : > { %v1666_v56 = vadd.f32 %v1659_v55, %v1658_v49 }
 0x8c2   : > { %1667 = vadd.xlane.f32.xlu1 %v1666_v56 }
 0x947   : > { %v1662_v57 = vpop.xlane.xlu1 %1661 }
 0x948   : > { %v1669_v58 = vmul.f32 0.00390625, %v1662_v57 }
 0x949   : > { %v1665_v59 = vpop.xlane.xlu0 %1664 }
 0x94a   : > { %v1672_v60 = vadd.f32 1e-05, %v1669_v58  ;;  %v1670_v54 = vmul.f32 0.00390625, %v1665_v59 }
 0x94c   : > { %2347 = vrsqrt.f32 %v1672_v60  ;;  %v1673_v61 = vadd.f32 1e-05, %v1670_v54 }
 0x94e   : > { %2349 = vrsqrt.f32 %v1673_v61 }
 0x94f   : > { %v1668_v62 = vpop.xlane.xlu1 %1667 }
 0x950   : > { %v1671_v51 = vmul.f32 0.00390625, %v1668_v62 }
 0x952   : > { %v1674_v1 = vadd.f32 1e-05, %v1671_v51 }
 0x954   : > { %2351 = vrsqrt.f32 %v1674_v1 }
 0x956   : > { %v2348_v6 = vpop.eup %2347 }
 0x957   : > { %v1678_v35 = vmul.f32 %v2348_v6, %v1648_v23  ;;  %v1679_v36 = vmul.f32 %v2348_v6, %v1649_v24 }
 0x958   : > { %v2350_v9 = vpop.eup %2349 }
 0x959   : > { %v1702_v16 = vmul.f32 %v1697_v4, %v1678_v35  ;;  %v1703_v37 = vmul.f32 %v1701_v5, %v1679_v36  ;;  %v1680_v10 = vmul.f32 %v2350_v9, %v1650_v30  ;;  %v1681_v27 = vmul.f32 %v2350_v9, %v1651_v52 }
 0x95b   : > { %v1726_v34 = vadd.f32 %v1721_v7, %v1702_v16  ;;  %v1727_v41 = vadd.f32 %v1725_v8, %v1703_v37  ;;  %v1704_v29 = vmul.f32 %v1697_v4, %v1680_v10  ;;  %v1705_v11 = vmul.f32 %v1701_v5, %v1681_v27 }
 0x95d   : > { %v1732_v12 = vmax.f32 %v1726_v34, 0.0  ;;  %v1733_v26 = vmax.f32 %v1727_v41, 0.0  ;;  %v1728_v39 = vadd.f32 %v1721_v7, %v1704_v29  ;;  %v1729_v13 = vadd.f32 %v1725_v8, %v1705_v11 }
 0x95e   : > { %v2352_v40 = vpop.eup %2351 }
 0x95f   : > { %1738 = vst [vmem:[%s434_s23] sm:$0xff] %v1732_v12  ;;  %1739 = vst [vmem:[%s434_s23 + $0x8] sm:$0xff] %v1733_v26  ;;  %v1734_v32 = vmax.f32 %v1728_v39, 0.0  ;;  %v1735_v38 = vmax.f32 %v1729_v13, 0.0  ;;  %v1682_v14 = vmul.f32 %v2352_v40, %v1652_v47  ;;  %v1683_v15 = vmul.f32 %v2352_v40, %v1653_v48 }
 0x961   : > { %1740 = vst [vmem:[%s434_s23 + $0x10] sm:$0xff] %v1734_v32  ;;  %1741 = vst [vmem:[%s434_s23 + $0x18] sm:$0xff] %v1735_v38  ;;  %v1706_v17 = vmul.f32 %v1697_v4, %v1682_v14  ;;  %v1707_v50 = vmul.f32 %v1701_v5, %v1683_v15 }
 0x963   : > { %v1730_v18 = vadd.f32 %v1721_v7, %v1706_v17  ;;  %v1731_v19 = vadd.f32 %v1725_v8, %v1707_v50 }
 0x965   : > { %v1736_v20 = vmax.f32 %v1730_v18, 0.0  ;;  %v1737_v28 = vmax.f32 %v1731_v19, 0.0 }
 0x967   : > { %1742 = vst [vmem:[%s434_s23 + $0x20] sm:$0xff] %v1736_v20  ;;  %1743 = vst [vmem:[%s434_s23 + $0x28] sm:$0xff] %v1737_v28 }
 0x968   : > { %2564 = shalt.err (!%p2561_p8)
}
 0x969   : > { %s2565_s9 = scalar_lea.hbm %s3147_s25, 768  ;;  %s2569_s23 = scalar_lea.hbm %s3229_s27, 1536 }
 0x96a   : > { %p2566_p7 = scmp.ne.s32.totalorder %s3147_s25, %s2565_s9  ;;  %p2570_p3 = scmp.lt.u32.totalorder %s3147_s25, %s3229_s27 }
 0x96b   : > { %p2571_p6 = scmp.lt.u32.totalorder %s2569_s23, %s2565_s9  ;;  %p2573_p0 = scmp.lt.u32.totalorder %s2565_s9, %s3147_s25 }
 0x96c   : > { %p2567_p9 = pnand %p2566_p7, %p3230_p5 }
 0x96d   : > { %p2572_p2 = por %p2571_p6, %p2570_p3 }
 0x96e   : > { %p2568_p4 = pneg %p2567_p9 }
 0x96f   : > { %p2574_p10 = por %p2573_p0, %p2572_p2 }
 0x971   : > { %p2575_p1 = pnand %p2574_p10, %p2568_p4 }
 0x973   : > { %2578 = shalt.err (!%p2575_p1)
}
 0x974   : > { %s2648_s28 = smov 256   ;;  %s2649_s24 = smov 16  }
 0x975   : > { %2141 = dma.vmem_to_hbm [thread:$0]  (%p3230_p5), %s3149_s1, 768, %s3147_s25, %s1745_s15, %s2648_s28, %s2648_s28, %s2649_s24  }
 0x976 PF: > { %s1774_s16 = sand.u32 1, %s2617_s30   ;;  %p3231_p11 = scmp.ne.s32.totalorder %s3220_s14, 0 }
 0x977   : > { %p3232_p12 = scmp.ge.s32.totalorder %s2629_s12, 2  ;;  %s1775_s19 = scalar_lea.sflag [#allocation4], %s1774_s16 }
 0x979   : > { %p2167_p13 = pnand %p3232_p12, %p3231_p11 }
 0x97b   : > { %2612 = dma.done.wait (!%p2167_p13), %s1775_s19, 768  }
 0x97c   : > { %2614 = vsyncadd (!%p2167_p13), %s1775_s19, 4294966528  ;;  %p25_p8 = scmp.ge.s32.totalorder %s2878_s17, 4   ;;  %s3233_s30 = smov %s2621_s10 }
 0x97d   : > { %s3234_s10 = smov %s2625_s11  ;;  %s3235_s11 = smov %s2889_s29 }
 0x97e   : > { %s3236_s12 = smov %s2878_s17  ;;  %27 = sbr.rel (!%p25_p8) target bundleno = 12 (0xc), region = 125 }
 0x985   :  { %1780 = vsyncpa [#allocation3], 1 }
 0x986   :  { %1782 = vsyncpa [#allocation3 + $0x1], 1 }
 0x987   :  { %1783 = vsyncpa [#allocation6], 1 }
 0x988   :  { %1784 = vsyncpa [#allocation9], 1 }
 0x989   :  { %1785 = vsyncpa [#allocation12], 1 }
 0x98a   :  { %1786 = vsyncpa [#allocation4], 1 }
 0x98b   :  { %1788 = vsyncpa [#allocation4 + $0x1], 1 }

// kernel: tpu_custom_call.1
= control target key start
LH: loop header
LB: loop body
LE: loop exit
PB: predicated region body
PF: predicated region fallthrough
CT: control target
= control target key end

     0   :  { %s3193_s0 = inlined_call_operand.hbm [shape: f32[48,256], index: 0, kind: input, shape index: {}]   ;;  %s3194_s1 = inlined_call_operand.hbm [shape: bf16[256,128], index: 1, kind: input, shape index: {}]   ;;  %s3195_s2 = inlined_call_operand.hbm [shape: f32[3,128], index: 2, kind: input, shape index: {}]   ;;  %s3196_s3 = inlined_call_operand.hbm [shape: bf16[128,384], index: 3, kind: input, shape index: {}]   ;;  %s3197_s4 = inlined_call_operand.vmem [shape: f32[3,384], index: 4, kind: input, shape index: {}]   ;;  %s3198_s5 = inlined_call_operand.hbm [shape: bf16[384,128], index: 5, kind: input, shape index: {}]   ;;  %s3199_s6 = inlined_call_operand.hbm [shape: f32[3,128], index: 6, kind: input, shape index: {}]   ;;  %s3200_s7 = inlined_call_operand.hbm [shape: bf16[128,256], index: 7, kind: input, shape index: {}]   ;;  %s3201_s8 = inlined_call_operand.vmem [shape: f32[3,256], index: 8, kind: input, shape index: {}]   ;;  %s3202_s9 = inlined_call_operand.hbm [shape: f32[48,256], index: 9, kind: output, shape index: {}]  }
   0x1   :  { %3208 = sst [smem:[#allocation20_spill]] %s3194_s1 }
   0x2   :  { %3209 = sst [smem:[#allocation21_spill]] %s3195_s2 }
   0x3   :  { %3210 = sst [smem:[#allocation22_spill]] %s3202_s9 }
   0x4   :  { %14 = vsyncpa [#allocation3], 0 }
   0x5   :  { %16 = vsyncpa [#allocation3 + $0x1], 0 }
   0x6   :  { %17 = vsyncpa [#allocation6], 0 }
   0x7   :  { %18 = vsyncpa [#allocation9], 0 }
   0x8   :  { %19 = vsyncpa [#allocation12], 0 }
   0x9   :  { %20 = vsyncpa [#allocation4], 0 }
   0xa   :  { %22 = vsyncpa [#allocation4 + $0x1], 0  ;;  %s2700_s30 = smov 0   ;;  %s2702_s10 = smov 0  }
   0xb   :  { %s2704_s11 = smov 0   ;;  %s2706_s12 = smov 0  }
   0xc LB: > { %s2631_s13 = smov [#allocation5]   ;;  %s2721_s15 = sadd.s32 4294967295, %s2629_s12   ;;  %s2629_s12 = sphi %s2706_s12, %s3236_s12   ;;  %s2625_s11 = sphi %s2704_s11, %s3235_s11   ;;  %s2621_s10 = sphi %s2702_s10, %s3234_s10   ;;  %s2617_s30 = sphi %s2700_s30, %s3233_s30  }
   0xd   : > { %s265_s14 = sshll.u32 %s2631_s13, 4  ;;  %p1890_p0 = scmp.ge.s32.totalorder %s2629_s12, 1  ;;  %s2726_s14 = int_to_ptr.vmem [resolvable:$true] %s265_s14 }
   0xe   : > { %p3205_p1 = scmp.eq.s32.totalorder %s2721_s15, 0  ;;  %p253_p2 = scmp.lt.s32.totalorder %s2629_s12, 3 }
   0xf   : > { %s2632_s17 = smov [#allocation8]   ;;  %s2633_s20 = smov [#allocation11]  }
  0x10   : > { %p2728_p3 = pnand %p1890_p0, %p253_p2  ;;  %s289_s18 = sshll.u32 %s2632_s17, 4  ;;  %s2741_s18 = int_to_ptr.vmem [resolvable:$true] %s289_s18 }
  0x11   : > { %s2743_s21 = sshll.u32 %s2633_s20, 4  ;;  %s3213_s1 = sld [smem:[#allocation20_spill]]  ;;  %s320_s21 = int_to_ptr.vmem [resolvable:$true] %s2743_s21 }
  0x12   : > { %s3211_s16 = scalar_select %p2728_p3, 1, 0 }
  0x13   : > { %p2143_p5 = pneg %p2728_p3 }
  0x15   : > { %p2737_p6 = pnand %p2143_p5, %p3205_p1 }
  0x17   : > { %s2353_s24 = scalar_lea.hbm %s3213_s1, 2048  ;;  %p2753_p8 = pneg %p2737_p6 }
  0x18   : > { %p2354_p7 = scmp.ne.s32.totalorder %s3213_s1, %s2353_s24  ;;  %p2360_p11 = scmp.lt.u32.totalorder %s2353_s24, %s3213_s1 }
  0x1a   : > { %p2356_p9 = pnand %p2753_p8, %p2354_p7 }
  0x1c   : > { %p2357_p10 = pneg %p2356_p9 }
  0x1e   : > { %p2362_p12 = pnand %p2360_p11, %p2357_p10 }
  0x20   : > { %2365 = shalt.err (!%p2362_p12)
}
  0x21   : > { %s2366_s13 = scalar_lea.vmem %s2726_s14, 2048  ;;  %p2374_p5 = scmp.lt.s32.totalorder %s2726_s14, %s2726_s14 }
  0x22   : > { %p2367_p13 = scmp.ne.s32.totalorder %s2726_s14, %s2366_s13  ;;  %p2375_p4 = scmp.lt.s32.totalorder %s2366_s13, %s2366_s13 }
  0x24   : > { %p2369_p0 = pnand %p2367_p13, %p2753_p8  ;;  %p2376_p7 = por %p2375_p4, %p2374_p5 }
  0x26   : > { %p2370_p2 = pneg %p2369_p0 }
  0x28   : > { %p2377_p9 = pnand %p2376_p7, %p2370_p2 }
  0x2a   : > { %2380 = shalt.err (!%p2377_p9)
}
  0x2b   : > { %s3204_s17 = smov 64   ;;  %s2635_s20 = smov 4  }
  0x2c   : > { %2146 = dma.hbm_to_vmem [thread:$0]  (!%p2737_p6), %s3213_s1, 2048, %s2726_s14, [#allocation6], %s3204_s17, %s3204_s17, %s2635_s20  }
  0x2d   : > { %s2381_s26 = scalar_lea.hbm %s3196_s3, 3072 }
  0x2e   : > { %p2382_p4 = scmp.ne.s32.totalorder %s3196_s3, %s2381_s26  ;;  %p2388_p12 = scmp.lt.u32.totalorder %s2381_s26, %s3196_s3 }
  0x30   : > { %p2384_p10 = pnand %p2382_p4, %p2753_p8 }
  0x32   : > { %p2385_p11 = pneg %p2384_p10 }
  0x34   : > { %p2390_p13 = pnand %p2388_p12, %p2385_p11 }
  0x36   : > { %2393 = shalt.err (!%p2390_p13)
}
  0x37   : > { %s2394_s14 = scalar_lea.vmem %s2741_s18, 3072  ;;  %p2402_p7 = scmp.lt.s32.totalorder %s2741_s18, %s2741_s18 }
  0x38   : > { %p2395_p0 = scmp.ne.s32.totalorder %s2741_s18, %s2394_s14  ;;  %p2403_p9 = scmp.lt.s32.totalorder %s2394_s14, %s2394_s14 }
  0x3a   : > { %p2397_p2 = pnand %p2395_p0, %p2753_p8  ;;  %p2404_p4 = por %p2403_p9, %p2402_p7 }
  0x3c   : > { %p2398_p5 = pneg %p2397_p2 }
  0x3e   : > { %p2405_p10 = pnand %p2404_p4, %p2398_p5 }
  0x40   : > { %2408 = shalt.err (!%p2405_p10)
}
  0x41   : > { %s2636_s22 = smov 192   ;;  %s2637_s9 = smov 12  }
  0x42   : > { %2152 = dma.hbm_to_vmem [thread:$0]  (!%p2737_p6), %s3196_s3, 3072, %s2741_s18, [#allocation9], %s2636_s22, %s2636_s22, %s2637_s9  }
  0x43   : > { %s2409_s28 = scalar_lea.hbm %s3199_s6, 64 }
  0x44   : > { %p2410_p11 = scmp.ne.s32.totalorder %s3199_s6, %s2409_s28  ;;  %p2416_p0 = scmp.lt.u32.totalorder %s2409_s28, %s3199_s6 }
  0x46   : > { %p2412_p12 = pnand %p2410_p11, %p2753_p8 }
  0x48   : > { %p2413_p13 = pneg %p2412_p12 }
  0x4a   : > { %p2418_p2 = pnand %p2416_p0, %p2413_p13 }
  0x4c   : > { %2421 = shalt.err (!%p2418_p2)
}
  0x4d   : > { %s2422_s23 = scalar_lea.vmem %s320_s21, 64  ;;  %p2430_p4 = scmp.lt.s32.totalorder %s320_s21, %s320_s21 }
  0x4e   : > { %p2423_p5 = scmp.ne.s32.totalorder %s320_s21, %s2422_s23  ;;  %p2431_p10 = scmp.lt.s32.totalorder %s2422_s23, %s2422_s23 }
  0x50   : > { %p2425_p7 = pnand %p2423_p5, %p2753_p8  ;;  %p2432_p1 = por %p2431_p10, %p2430_p4 }
  0x52   : > { %p2426_p9 = pneg %p2425_p7 }
  0x54   : > { %p2433_p3 = pnand %p2432_p1, %p2426_p9 }
  0x56   : > { %2436 = shalt.err (!%p2433_p3)
}
  0x57   : > { %2158 = dma.hbm_to_vmem [thread:$0]  (!%p2737_p6), %s3199_s6, 64, %s320_s21, [#allocation12]  }
  0x58   : > { %s2638_s17 = smov [#allocation7]   ;;  %s2639_s24 = smov [#allocation10]  }
  0x59   : > { %s279_s9 = sshll.u32 %s2638_s17, 4  ;;  %s305_s25 = sshll.u32 %s2639_s24, 4  ;;  %s280_s9 = int_to_ptr.vmem [resolvable:$true] %s279_s9  ;;  %s306_s25 = int_to_ptr.vmem [resolvable:$true] %s305_s25 }
  0x5a   : > { %s3215_s2 = sld [smem:[#allocation21_spill]] }
  0x60   : > { %s2437_s29 = scalar_lea.hbm %s3215_s2, 64 }
  0x61   : > { %p2438_p1 = scmp.ne.s32.totalorder %s3215_s2, %s2437_s29  ;;  %p2444_p12 = scmp.lt.u32.totalorder %s2437_s29, %s3215_s2 }
  0x63   : > { %p2440_p3 = pnand %p2438_p1, %p2753_p8 }
  0x65   : > { %p2441_p11 = pneg %p2440_p3 }
  0x67   : > { %p2446_p13 = pnand %p2444_p12, %p2441_p11 }
  0x69   : > { %2449 = shalt.err (!%p2446_p13)
}
  0x6a   : > { %s2450_s21 = scalar_lea.vmem %s280_s9, 64  ;;  %p2458_p7 = scmp.lt.s32.totalorder %s280_s9, %s280_s9 }
  0x6b   : > { %p2451_p0 = scmp.ne.s32.totalorder %s280_s9, %s2450_s21  ;;  %p2459_p9 = scmp.lt.s32.totalorder %s2450_s21, %s2450_s21 }
  0x6d   : > { %p2453_p2 = pnand %p2451_p0, %p2753_p8  ;;  %p2460_p4 = por %p2459_p9, %p2458_p7 }
  0x6f   : > { %p2454_p5 = pneg %p2453_p2 }
  0x71   : > { %p2461_p10 = pnand %p2460_p4, %p2454_p5 }
  0x73   : > { %2464 = shalt.err (!%p2461_p10)
}
  0x74   : > { %2149 = dma.hbm_to_vmem [thread:$0]  (!%p2737_p6), %s3215_s2, 64, %s280_s9, [#allocation6]  }
  0x75   : > { %s2465_s28 = scalar_lea.hbm %s3198_s5, 3072 }
  0x76   : > { %p2466_p1 = scmp.ne.s32.totalorder %s3198_s5, %s2465_s28  ;;  %p2472_p12 = scmp.lt.u32.totalorder %s2465_s28, %s3198_s5 }
  0x78   : > { %p2468_p3 = pnand %p2466_p1, %p2753_p8 }
  0x7a   : > { %p2469_p11 = pneg %p2468_p3 }
  0x7c   : > { %p2474_p13 = pnand %p2472_p12, %p2469_p11 }
  0x7e   : > { %2477 = shalt.err (!%p2474_p13)
}
  0x7f   : > { %s2478_s18 = scalar_lea.vmem %s306_s25, 3072  ;;  %p2486_p7 = scmp.lt.s32.totalorder %s306_s25, %s306_s25 }
  0x80   : > { %p2479_p0 = scmp.ne.s32.totalorder %s306_s25, %s2478_s18  ;;  %p2487_p9 = scmp.lt.s32.totalorder %s2478_s18, %s2478_s18 }
  0x82   : > { %p2481_p2 = pnand %p2479_p0, %p2753_p8  ;;  %p2488_p4 = por %p2487_p9, %p2486_p7 }
  0x84   : > { %p2482_p5 = pneg %p2481_p2 }
  0x86   : > { %p2489_p10 = pnand %p2488_p4, %p2482_p5 }
  0x88   : > { %2492 = shalt.err (!%p2489_p10)
}
  0x89   : > { %s3216_s9 = smov 64   ;;  %s2640_s17 = smov [#allocation13]  }
  0x8a   : > { %2155 = dma.hbm_to_vmem [thread:$0]  (!%p2737_p6), %s3198_s5, 3072, %s306_s25, [#allocation9], %s3216_s9, %s3216_s9, %s2635_s20  }
  0x8b   : > { %s329_s24 = sshll.u32 %s2640_s17, 4  ;;  %s2493_s29 = scalar_lea.hbm %s3200_s7, 2048  ;;  %s330_s24 = int_to_ptr.vmem [resolvable:$true] %s329_s24 }
  0x8c   : > { %p2494_p1 = scmp.ne.s32.totalorder %s3200_s7, %s2493_s29  ;;  %p2500_p12 = scmp.lt.u32.totalorder %s2493_s29, %s3200_s7 }
  0x8e   : > { %p2496_p3 = pnand %p2494_p1, %p2753_p8 }
  0x90   : > { %p2497_p11 = pneg %p2496_p3 }
  0x92   : > { %p2502_p13 = pnand %p2500_p12, %p2497_p11 }
  0x94   : > { %2505 = shalt.err (!%p2502_p13)
}
  0x95   : > { %s2506_s20 = scalar_lea.vmem %s330_s24, 2048  ;;  %p2514_p7 = scmp.lt.s32.totalorder %s330_s24, %s330_s24 }
  0x96   : > { %p2507_p0 = scmp.ne.s32.totalorder %s330_s24, %s2506_s20  ;;  %p2515_p9 = scmp.lt.s32.totalorder %s2506_s20, %s2506_s20 }
  0x98   : > { %p2509_p2 = pnand %p2507_p0, %p2753_p8  ;;  %p2516_p4 = por %p2515_p9, %p2514_p7 }
  0x9a   : > { %p2510_p5 = pneg %p2509_p2 }
  0x9c   : > { %p2517_p10 = pnand %p2516_p4, %p2510_p5 }
  0x9e   : > { %2520 = shalt.err (!%p2517_p10)
}
  0x9f   : > { %s2641_s25 = smov 128   ;;  %s2642_s27 = smov 8  }
  0xa0   : > { %2161 = dma.hbm_to_vmem [thread:$0]  (!%p2737_p6), %s3200_s7, 2048, %s330_s24, [#allocation12], %s2641_s25, %s2641_s25, %s2642_s27  }
  0xa1   : > { %s1889_s22 = sadd.s32 4294967294, %s2629_s12   ;;  %s2878_s17 = sadd.s32 1, %s2629_s12  }
  0xa2   : > { %s32_s26 = ssub.s32 %s2629_s12, %s2878_s17  ;;  %s35_s28 = sadd.s32 1, %s2625_s11 }
  0xa3   : > { %p33_p8 = scmp.eq.s32.totalorder %s32_s26, 0  ;;  %p42_p1 = scmp.ne.s32.totalorder %s2625_s11, %s2621_s10 }
  0xa4   : > { %p43_p3 = scmp.eq.s32.totalorder %s2629_s12, 0  ;;  %p48_p11 = scmp.ne.s32.totalorder %s2621_s10, %s2617_s30 }
  0xa5   : > { %s2889_s29 = scalar_select %p33_p8, %s2625_s11, %s35_s28  }
  0xa6   : > { %p44_p12 = por %p43_p3, %p42_p1  ;;  %p3217_p13 = scmp.eq.s32.totalorder %s2721_s15, 0 }
  0xa7   : > { %p240_p6 = scmp.eq.s32.totalorder %s2721_s15, 1  ;;  %p246_p2 = scmp.eq.s32.totalorder %s1889_s22, 1 }
  0xa8   : > { %p2893_p0 = por %p3217_p13, %p48_p11  ;;  %p2176_p5 = scmp.lt.s32.totalorder %s2629_s12, 2 }
  0xa9   : > { %s346_s24 = sand.u32 1, %s2625_s11   ;;  %p2900_p7 = por %p240_p6, %p42_p1 }
  0xaa   : > { %p2904_p9 = por %p246_p2, %p48_p11  ;;  %s2113_s23 = smul.u32 48, %s346_s24 }
  0xab   : > { %s3219_s13 = scalar_select %p2900_p7, 1, 0 }
  0xac   : > { %s3220_s14 = scalar_select %p2904_p9, 1, 0 }
  0xad   : > { %s1995_s18 = smul.u32 768, %s2629_s12  ;;  %p2909_p4 = pnand %p2176_p5, %p44_p12 }
  0xae   : > { %s350_s21 = scalar_lea.vmem [#allocation2], %s2113_s23  ;;  %s2920_s26 = scalar_lea.sflag [#allocation3], %s346_s24 }
  0xaf   : > { %s2916_s9 = scalar_lea.hbm %s3193_s0, %s1995_s18  ;;  %s358_s22 = sshll.u32 %s350_s21, 4  ;;  %s2918_s22 = int_to_ptr.vmem [resolvable:$true] %s358_s22 }
  0xb0   : > { %s2521_s28 = scalar_lea.hbm %s2916_s9, 768  ;;  %p2523_p8 = pneg %p2909_p4 }
  0xb1   : > { %p2522_p10 = scmp.ne.s32.totalorder %s2916_s9, %s2521_s28  ;;  %s2526_s27 = scalar_lea.hbm %s3193_s0, 1536 }
  0xb2   : > { %p2527_p11 = scmp.lt.u32.totalorder %s2916_s9, %s3193_s0  ;;  %p2528_p12 = scmp.lt.u32.totalorder %s2526_s27, %s2521_s28 }
  0xb3   : > { %p2524_p1 = pnand %p2523_p8, %p2522_p10  ;;  %p2530_p6 = scmp.lt.u32.totalorder %s2521_s28, %s2916_s9 }
  0xb4   : > { %p2529_p13 = por %p2528_p12, %p2527_p11 }
  0xb5   : > { %p2525_p3 = pneg %p2524_p1 }
  0xb6   : > { %p2531_p2 = por %p2530_p6, %p2529_p13 }
  0xb8   : > { %p2532_p5 = pnand %p2531_p2, %p2525_p3 }
  0xba   : > { %2535 = shalt.err (!%p2532_p5)
}
  0xbb   : > { %s2536_s24 = scalar_lea.vmem %s2918_s22, 768  ;;  %s2643_s23 = smov [#allocation2]  }
  0xbc   : > { %p2537_p10 = scmp.ne.s32.totalorder %s2918_s22, %s2536_s24  ;;  %s2541_s21 = sshll.u32 %s2643_s23, 4  ;;  %s2542_s21 = int_to_ptr.vmem [resolvable:$false] %s2541_s21 }
  0xbd   : > { %s2543_s1 = scalar_lea.vmem %s2542_s21, 1536  ;;  %p2544_p7 = scmp.lt.s32.totalorder %s2918_s22, %s2542_s21 }
  0xbe   : > { %p2539_p1 = pnand %p2537_p10, %p2523_p8  ;;  %p2545_p11 = scmp.lt.s32.totalorder %s2543_s1, %s2536_s24 }
  0xc0   : > { %p2540_p9 = pneg %p2539_p1  ;;  %p2546_p12 = por %p2545_p11, %p2544_p7 }
  0xc2   : > { %p2547_p13 = pnand %p2546_p12, %p2540_p9 }
  0xc4   : > { %2550 = shalt.err (!%p2547_p13)
}
  0xc5   : > { %s2644_s2 = smov 256   ;;  %s2645_s28 = smov 16  }
  0xc6   : > { %2165 = dma.hbm_to_vmem [thread:$0]  (!%p2909_p4), %s2916_s9, 768, %s2918_s22, %s2920_s26, %s2644_s2, %s2644_s2, %s2645_s28  }
  0xc7   : > { %p3222_p8 = scmp.ne.s32.totalorder %s3211_s16, 0 }
  0xc8   : > { %s2951_s18 = sand.u32 (!%p3222_p8), 1, %s2621_s10  }
  0xc9   : > { %370 = sbr.rel (%p3222_p8) target bundleno = 2422 (0x976), region = 56  ;;  %s373_s27 = scalar_lea.sflag (!%p3222_p8), [#allocation3], %s2951_s18 }
  0xca   : > { %s2114_s25 = smul.u32 (!%p3222_p8), 48, %s2951_s18 }
  0xcc   : > { %s2957_s24 = scalar_lea.vmem (!%p3222_p8), [#allocation2], %s2114_s25 }
  0xd0   : > { %2596 = dma.done.wait (%p2893_p0), %s373_s27, 768  }
  0xd1   : > { %2598 = vsyncadd (%p2893_p0), %s373_s27, 4294966528  ;;  %p3223_p7 = scmp.eq.s32.totalorder %s2721_s15, 0 }
  0xd3   : > { %2600 = dma.done.wait (%p3223_p7), [#allocation6], 2112   ;;  %p3224_p9 = pmov %p3223_p7 }
  0xd4   : > { %p3225_p4 = pmov %p3223_p7 }
  0xd5   : > { %2602 = vsyncadd (%p3224_p9), [#allocation6], 4294965184 }
  0xd6   : > { %2604 = dma.done.wait (%p3225_p4), [#allocation9], 6144   ;;  %p3226_p3 = pmov %p3225_p4 }
  0xd8   : > { %2606 = vsyncadd (%p3226_p3), [#allocation9], 4294961152  ;;  %p3227_p6 = pmov %p3226_p3 }
  0xd9   : > { %p3228_p2 = pmov %p3226_p3 }
  0xda   : > { %2608 = dma.done.wait (%p3227_p6), [#allocation12], 2112  }
  0xdb   : > { %2610 = vsyncadd (%p3228_p2), [#allocation12], 4294965184  ;;  %v2233_v0 = vld [vmem:[#allocation5 + $0x40] sm:$0xff]   ;;  %v2235_v2 = vld [vmem:[#allocation5 + $0x48] sm:$0xff]   ;;  %v481_v26 = vlaneseq  ;;  %s434_s23 = scalar_lea.vmem [#allocation14], %s2114_s25  ;;  %s1996_s21 = smul.u32 768, %s2721_s15 }
  0xdc   : > { %v2234_v1 = vld [vmem:[#allocation5] sm:$0xff]   ;;  %1997 = vmatprep.subr.bf16.mxu0 %v2233_v0  ;;  %v2236_v3 = vld [vmem:[#allocation5 + $0x8] sm:$0xff]   ;;  %v2237_v4 = vld [vmem:[#allocation5 + $0x50] sm:$0xff]   ;;  %s1759_s1 = sshll.u32 %s434_s23, 4  ;;  %s3229_s27 = sld [smem:[#allocation22_spill]]  ;;  %s3149_s1 = int_to_ptr.vmem [resolvable:$true] %s1759_s1 }
  0xdd   : > { %1998 = vmatpush3.bf16.msra.mxu0 %v2234_v1  ;;  %v2238_v5 = vld [vmem:[#allocation5 + $0x10] sm:$0xff]   ;;  %v2239_v6 = vld [vmem:[#allocation5 + $0x58] sm:$0xff]   ;;  %v2241_v8 = vld [vmem:[#allocation5 + $0x60] sm:$0xff]   ;;  %v2981_v27 = vshrl.u32 %v481_v26, 7  ;;  %s1745_s15 = scalar_lea.sflag [#allocation4], %s2951_s18  ;;  %p3230_p5 = scmp.ne.s32.totalorder %s3219_s13, 0 }
  0xde   : > { %1999 = vmatprep.subr.bf16.mxu0 %v2235_v2  ;;  %v2240_v7 = vld [vmem:[#allocation5 + $0x18] sm:$0xff]   ;;  %v2242_v9 = vld [vmem:[#allocation5 + $0x20] sm:$0xff]   ;;  %v2243_v10 = vld [vmem:[#allocation5 + $0x68] sm:$0xff]   ;;  %s2647_s16 = smov [#allocation14]  }
  0xdf   : > { %v439_v11 = vld [vmem:[%s2957_s24 + $0x8] sm:$0xff]  ;;  %v441_v12 = vld [vmem:[%s2957_s24 + $0x18] sm:$0xff]  ;;  %v2245_v15 = vld [vmem:[#allocation5 + $0x70] sm:$0xff]   ;;  %v2984_v28 = vsub.s32 0, %v2981_v27  ;;  %v3004_v26 = vsub.s32 1, %v2981_v27  ;;  %s2555_s19 = sshll.u32 %s2647_s16, 4  ;;  %s2556_s19 = int_to_ptr.vmem [resolvable:$false] %s2555_s19 }
  0xe0   : > { %v2244_v13 = vld [vmem:[#allocation5 + $0x28] sm:$0xff]   ;;  %v445_v14 = vpack.c.bf16 %v441_v12, %v439_v11  ;;  %v2246_v16 = vld [vmem:[#allocation5 + $0x30] sm:$0xff]   ;;  %v2247_v17 = vld [vmem:[#allocation5 + $0x78] sm:$0xff]   ;;  %s2557_s20 = scalar_lea.vmem %s2556_s19, 1536  ;;  %p2558_p11 = scmp.lt.s32.totalorder %s3149_s1, %s2556_s19 }
  0xe1   : > { %2000 = vmatpush3.bf16.msra.mxu0 %v2236_v3  ;;  %v2248_v18 = vld [vmem:[#allocation5 + $0x38] sm:$0xff]   ;;  %v438_v19 = vld [vmem:[%s2957_s24] sm:$0xff]  ;;  %v440_v20 = vld [vmem:[%s2957_s24 + $0x10] sm:$0xff] }
  0xe2   : > { %2001 = vmatprep.subr.bf16.mxu0 %v2237_v4  ;;  %613 = vmatprep.mubr.bf16.mxu0 %v445_v14  ;;  %v443_v21 = vld [vmem:[%s2957_s24 + $0x28] sm:$0xff]  ;;  %v444_v22 = vpack.c.bf16 %v440_v20, %v438_v19  ;;  %v442_v24 = vld [vmem:[%s2957_s24 + $0x20] sm:$0xff]  ;;  %s3147_s25 = scalar_lea.hbm %s3229_s27, %s1996_s21  ;;  %s2551_s24 = scalar_lea.vmem %s3149_s1, 768 }
  0xe3   : > { %v447_v23 = vpack.c.bf16 %v443_v21, %v443_v21  ;;  %v446_v25 = vpack.c.bf16 %v442_v24, %v442_v24  ;;  %v2986_v29 = vld [vmem:[#allocation7] sm:$0x7]  ;;  %v2249_v45 = vld [vmem:[#allocation8 + $0x4] ss:$12 sps:$4 sm:$0xff]   ;;  %v2251_v46 = vld [vmem:[#allocation8] ss:$12 sps:$4 sm:$0xff]   ;;  %p2552_p0 = scmp.ne.s32.totalorder %s3149_s1, %s2551_s24  ;;  %p2559_p12 = scmp.lt.s32.totalorder %s2557_s20, %s2551_s24 }
  0xe4   : > { %v484_v31 = vrot.slane %v2986_v29, %v2984_v28  ;;  %873 = vmatprep.subr.bf16.mxu1 %v2249_v45  ;;  %v2252_v59 = vld [vmem:[#allocation8 + $0x1c] ss:$12 sps:$4 sm:$0xff]   ;;  %v2255_v61 = vld [vmem:[#allocation8 + $0x18] ss:$12 sps:$4 sm:$0xff]   ;;  %v2256_v62 = vld [vmem:[#allocation8 + $0x34] ss:$12 sps:$4 sm:$0xff]  }
  0xe5   : > { %2002 = vmatpush3.bf16.msra.mxu0 %v2238_v5  ;;  %874 = vmatpush1.bf16.msra.mxu1 %v2251_v46  ;;  %v2254_v60 = vld [vmem:[#allocation8 + $0x8] ss:$12 sps:$4 sm:$0xff]   ;;  %v2258_v63 = vld [vmem:[#allocation8 + $0x20] ss:$12 sps:$4 sm:$0xff]   ;;  %v2259_v0 = vld [vmem:[#allocation8 + $0x30] ss:$12 sps:$4 sm:$0xff]   ;;  %p2553_p10 = pnand %p2552_p0, %p3230_p5  ;;  %p2560_p13 = por %p2559_p12, %p2558_p11 }
  0xe6   : > { %2003 = vmatprep.subr.bf16.mxu0 %v2239_v6  ;;  %875 = vmatprep.subr.bf16.mxu1 %v2252_v59  ;;  %v2260_v1 = vld [vmem:[#allocation8 + $0x4c] ss:$12 sps:$4 sm:$0xff]   ;;  %v2263_v3 = vld [vmem:[#allocation8 + $0x48] ss:$12 sps:$4 sm:$0xff]   ;;  %v2264_v4 = vld [vmem:[#allocation8 + $0x64] ss:$12 sps:$4 sm:$0xff]  }
  0xe7   : > { %v2262_v2 = vld [vmem:[#allocation8 + $0x38] ss:$12 sps:$4 sm:$0xff]   ;;  %v2266_v5 = vld [vmem:[#allocation8 + $0x50] ss:$12 sps:$4 sm:$0xff]   ;;  %v2267_v6 = vld [vmem:[#allocation8 + $0x60] ss:$12 sps:$4 sm:$0xff]   ;;  %p2554_p1 = pneg %p2553_p10 }
  0xe8   : > { %v2274_v11 = vld [vmem:[#allocation8 + $0x80] ss:$12 sps:$4 sm:$0xff]   ;;  %v2275_v12 = vld [vmem:[#allocation8 + $0x90] ss:$12 sps:$4 sm:$0xff]   ;;  %v2278_v14 = vld [vmem:[#allocation8 + $0x98] ss:$12 sps:$4 sm:$0xff]  }
  0xe9   : > { %2004 = vmatpush3.bf16.msra.mxu0 %v2240_v7  ;;  %876 = vmatpush1.bf16.msra.mxu1 %v2255_v61  ;;  %v2268_v7 = vld [vmem:[#allocation8 + $0x7c] ss:$12 sps:$4 sm:$0xff]   ;;  %p2561_p8 = pnand %p2560_p13, %p2554_p1 }
  0xea   : > { %2005 = vmatprep.subr.bf16.mxu0 %v2241_v8  ;;  %877 = vmatprep.subr.bf16.mxu1 %v2256_v62  ;;  %v2270_v8 = vld [vmem:[#allocation8 + $0x68] ss:$12 sps:$4 sm:$0xff]  }
  0xed   : > { %2006 = vmatpush3.bf16.msra.mxu0 %v2242_v9  ;;  %878 = vmatpush1.bf16.msra.mxu1 %v2259_v0  ;;  %v2271_v9 = vld [vmem:[#allocation8 + $0x78] ss:$12 sps:$4 sm:$0xff]  }
  0xee   : > { %2007 = vmatprep.subr.bf16.mxu0 %v2243_v10  ;;  %879 = vmatprep.subr.bf16.mxu1 %v2260_v1  ;;  %v2272_v10 = vld [vmem:[#allocation8 + $0x94] ss:$12 sps:$4 sm:$0xff]  }
  0xf1   : > { %2008 = vmatpush3.bf16.msra.mxu0 %v2244_v13  ;;  %880 = vmatpush1.bf16.msra.mxu1 %v2263_v3  ;;  %v2276_v13 = vld [vmem:[#allocation8 + $0xac] ss:$12 sps:$4 sm:$0xff]  }
  0xf2   : > { %2009 = vmatprep.subr.bf16.mxu0 %v2245_v15  ;;  %881 = vmatprep.subr.bf16.mxu1 %v2264_v4  ;;  %v2279_v15 = vld [vmem:[#allocation8 + $0xa8] ss:$12 sps:$4 sm:$0xff]  }
  0xf5   : > { %2010 = vmatpush3.bf16.msra.mxu0 %v2246_v16  ;;  %882 = vmatpush1.bf16.msra.mxu1 %v2267_v6  ;;  %v2646_v16 = vmov 0  }
  0xf6   : > { %2011 = vmatprep.subr.bf16.mxu0 %v2247_v17  ;;  %883 = vmatprep.subr.bf16.mxu1 %v2268_v7  ;;  %v2280_v17 = vld [vmem:[#allocation8 + $0xb0] ss:$12 sps:$4 sm:$0xff]  }
  0xf7   : > { %905 = vmatprep.mubr.bf16.mxu1 %v2646_v16 }
  0xf9   : > { %2012 = vmatpush3.bf16.msra.mxu0 %v2248_v18  ;;  %884 = vmatpush1.bf16.msra.mxu1 %v2271_v9 }
  0xfa   : > { %2073 = vmatprep.subr.bf16.mxu0 %v2254_v60  ;;  %885 = vmatprep.subr.bf16.mxu1 %v2272_v10 }
  0xfc   : > { %614 = vmatmul.mubr.bf16.vlgmr.msra.gmra.mrb[0].mxu0 %v444_v22 }
  0xfd   : > { %621 = vmatprep.mubr.bf16.mxu0 %v447_v23  ;;  %2074 = vmatpush3.bf16.msra.mxu0 %v2254_v60 }
  0xfe   : > { %2075 = vmatprep.subr.bf16.mxu0 %v2258_v63  ;;  %886 = vmatpush1.bf16.msra.mxu1 %v2275_v12 }
  0xff   : > { %887 = vmatprep.subr.bf16.mxu1 %v2276_v13 }
 0x101   : > { %2076 = vmatpush3.bf16.msra.mxu0 %v2258_v63 }
 0x102   : > { %2077 = vmatprep.subr.bf16.mxu0 %v2262_v2  ;;  %888 = vmatpush1.bf16.msra.mxu1 %v2279_v15 }
 0x104   : > { %622 = vmatmul.mubr.bf16.gmra.mrb[4].mxu0 %v446_v25 }
 0x105   : > { %2078 = vmatpush3.bf16.msra.mxu0 %v2262_v2 }
 0x106   : > { %2079 = vmatprep.subr.bf16.mxu0 %v2266_v5 }
 0x109   : > { %2080 = vmatpush3.bf16.msra.mxu0 %v2266_v5 }
 0x10a   : > { %2081 = vmatprep.subr.bf16.mxu0 %v2270_v8 }
 0x10d   : > { %2082 = vmatpush3.bf16.msra.mxu0 %v2270_v8 }
 0x10e   : > { %2083 = vmatprep.subr.bf16.mxu0 %v2274_v11 }
 0x111   : > { %2084 = vmatpush3.bf16.msra.mxu0 %v2274_v11 }
 0x112   : > { %2085 = vmatprep.subr.bf16.mxu0 %v2278_v14 }
 0x115   : > { %2086 = vmatpush3.bf16.msra.mxu0 %v2278_v14 }
 0x116   : > { %2087 = vmatprep.subr.bf16.mxu0 %v2280_v17 }
 0x119   : > { %2088 = vmatpush3.bf16.msra.mxu0 %v2280_v17 }
 0x1cf   : > { %v2013_v30 = vpop.f32.mrb[0].mxu0 }
 0x1d0   : > { %v2014_v32 = vpop.f32.mrb[1].mxu0 }
 0x1d1   : > { %v2015_v33 = vadd.f32 %v2014_v32, %v2013_v30  ;;  %v2016_v34 = vpop.f32.mrb[2].mxu0  ;;  %v3009_v32 = vsub.s32 2, %v2981_v27 }
 0x1d2   : > { %v2017_v35 = vpop.f32.mrb[3].mxu0 }
 0x1d3   : > { %v2018_v36 = vadd.f32 %v2017_v35, %v2016_v34  ;;  %v616_v37 = vadd.f32 %v2015_v33, %v484_v31  ;;  %v673_v35 = vrot.slane %v2986_v29, %v3009_v32 }
 0x1d5   : > { %629 = vadd.xlane.f32.xlu0 %v616_v37  ;;  %v619_v39 = vadd.f32 %v2018_v36, %v484_v31 }
 0x1d7   : > { %v2019_v38 = vpop.f32.mrb[4].mxu0 }
 0x1d8   : > { %v2020_v40 = vpop.f32.mrb[5].mxu0 }
 0x1d9   : > { %v2021_v41 = vadd.f32 %v2020_v40, %v2019_v38  ;;  %v2022_v42 = vpop.f32.mrb[6].mxu0  ;;  %631 = vadd.xlane.f32.xlu0 %v619_v39 }
 0x1da   : > { %v2023_v43 = vpop.f32.mrb[7].mxu0 }
 0x1db   : > { %v624_v44 = vadd.f32 %v2021_v41, %v484_v31  ;;  %v666_v31 = vrot.slane %v2986_v29, %v3004_v26 }
 0x1dd   : > { %633 = vadd.xlane.f32.xlu1 %v624_v44 }
 0x262   : > { %v630_v47 = vpop.xlane.xlu0 %629 }
 0x263   : > { %v636_v48 = vmul.f32 0.0078125, %v630_v47 }
 0x265   : > { %v2990_v49 = vsub.f32 %v616_v37, %v636_v48 }
 0x266   : > { %v632_v50 = vpop.xlane.xlu0 %631 }
 0x267   : > { %v637_v51 = vmul.f32 0.0078125, %v632_v50  ;;  %v642_v52 = vmul.f32 %v2990_v49, %v2990_v49  ;;  %v724_v50 = vsub.s32 4, %v2981_v27 }
 0x269   : > { %v2994_v53 = vsub.f32 %v619_v39, %v637_v51  ;;  %645 = vadd.xlane.f32.xlu1 %v642_v52  ;;  %v3021_v51 = vld [vmem:[%s3197_s4] sm:$0x77] }
 0x26a   : > { %v634_v54 = vpop.xlane.xlu1 %633  ;;  %v721_v52 = vrot.slane %v3021_v51, %v2984_v28 }
 0x26b   : > { %v638_v55 = vmul.f32 0.0078125, %v634_v54  ;;  %v643_v56 = vmul.f32 %v2994_v53, %v2994_v53  ;;  %v3031_v54 = vld [vmem:[%s3197_s4 + $0x8] sm:$0x7] }
 0x26d   : > { %v2998_v57 = vsub.f32 %v624_v44, %v638_v55  ;;  %647 = vadd.xlane.f32.xlu0 %v643_v56  ;;  %v736_v55 = vrot.slane %v721_v52, %v2984_v28 }
 0x26f   : > { %v644_v58 = vmul.f32 %v2998_v57, %v2998_v57 }
 0x271   : > { %649 = vadd.xlane.f32.xlu1 %v644_v58 }
 0x2f6   : > { %v646_v18 = vpop.xlane.xlu1 %645 }
 0x2f7   : > { %v651_v19 = vmul.f32 0.0078125, %v646_v18 }
 0x2f9   : > { %v654_v20 = vadd.f32 1e-05, %v651_v19 }
 0x2fa   : > { %v648_v21 = vpop.xlane.xlu0 %647 }
 0x2fb   : > { %2329 = vrsqrt.f32 %v654_v20  ;;  %v652_v22 = vmul.f32 0.0078125, %v648_v21 }
 0x2fd   : > { %v655_v23 = vadd.f32 1e-05, %v652_v22 }
 0x2fe   : > { %v650_v24 = vpop.xlane.xlu1 %649 }
 0x2ff   : > { %2331 = vrsqrt.f32 %v655_v23  ;;  %v653_v25 = vmul.f32 0.0078125, %v650_v24  ;;  %v2281_v23 = vld [vmem:[#allocation10 + $0x40] sm:$0xff]  }
 0x300   : > { %v2282_v24 = vld [vmem:[#allocation10] sm:$0xff]   ;;  %2035 = vmatprep.subr.bf16.mxu1 %v2281_v23 }
 0x301   : > { %v656_v30 = vadd.f32 1e-05, %v653_v25  ;;  %v2283_v25 = vld [vmem:[#allocation10 + $0x80] sm:$0xff]  }
 0x302   : > { %2093 = vmatprep.subr.bf16.mxu0 %v2283_v25 }
 0x303   : > { %2333 = vrsqrt.f32 %v656_v30 }
 0x305   : > { %v2330_v33 = vpop.eup %2329 }
 0x306   : > { %v660_v34 = vmul.f32 %v2330_v33, %v2990_v49 }
 0x308   : > { %v667_v36 = vmul.f32 %v666_v31, %v660_v34 }
 0x309   : > { %v2332_v37 = vpop.eup %2331 }
 0x30a   : > { %v661_v38 = vmul.f32 %v2332_v37, %v2994_v53  ;;  %v674_v40 = vadd.f32 %v673_v35, %v667_v36  ;;  %v725_v53 = vrot.slane %v3021_v51, %v724_v50 }
 0x30c   : > { %v668_v39 = vmul.f32 %v666_v31, %v661_v38  ;;  %v677_v45 = vmax.f32 %v674_v40, 0.0  ;;  %v740_v56 = vrot.slane %v725_v53, %v2984_v28 }
 0x30d   : > { %v2334_v41 = vpop.eup %2333 }
 0x30e   : > { %v662_v42 = vmul.f32 %v2334_v41, %v2998_v57  ;;  %v675_v43 = vadd.f32 %v673_v35, %v668_v39  ;;  %v729_v57 = vrot.slane %v3031_v54, %v2984_v28 }
 0x310   : > { %v669_v44 = vmul.f32 %v666_v31, %v662_v42  ;;  %v678_v46 = vmax.f32 %v675_v43, 0.0  ;;  %v744_v63 = vrot.slane %v729_v57, %v2984_v28 }
 0x312   : > { %v680_v47 = vpack.c.bf16 %v678_v46, %v677_v45  ;;  %v676_v48 = vadd.f32 %v673_v35, %v669_v44 }
 0x314   : > { %906 = vmatmul.mubr.bf16.vlgmr.msra.gmra.mrb[0].mxu1 %v680_v47  ;;  %2089 = vmatprep.mubr.bf16.mxu0 %v680_v47  ;;  %v679_v49 = vmax.f32 %v676_v48, 0.0 }
 0x315   : > { %915 = vmatprep.mubr.bf16.mxu1 %v2646_v16  ;;  %2036 = vmatpush3.bf16.msra.mxu1 %v2282_v24 }
 0x316   : > { %v681_v29 = vpack.c.bf16 %v679_v49, %v679_v49 }
 0x318   : > { %2090 = vmatmul.mubr.bf16.vlgmr.msra.gmra.mrb[8].mxu0 %v681_v29 }
 0x319   : > { %2094 = vmatpush3.bf16.msra.mxu0 %v2283_v25 }
 0x31c   : > { %916 = vmatmul.mubr.bf16.gmra.mrb[4].mxu1 %v681_v29 }
 0x3e7   : > { %v907_v58 = vpop.f32.mrb[0].mxu1 }
 0x3e8   : > { %v909_v59 = vpop.f32.mrb[1].mxu1  ;;  %v908_v60 = vadd.f32 %v907_v58, %v736_v55 }
 0x3e9   : > { %v910_v61 = vadd.f32 %v909_v59, %v740_v56  ;;  %v911_v62 = vpop.f32.mrb[2].mxu1 }
 0x3ea   : > { %v913_v0 = vpop.f32.mrb[3].mxu1  ;;  %v912_v1 = vadd.f32 %v911_v62, %v736_v55 }
 0x3eb   : > { %v914_v2 = vadd.f32 %v913_v0, %v740_v56  ;;  %v2091_v3 = vpop.f32.mrb[8].mxu0  ;;  %v972_v5 = vadd.f32 %v910_v61, %v908_v60  ;;  %v2285_v0 = vld [vmem:[#allocation10 + $0x8] sm:$0xff]  }
 0x3ec   : > { %v958_v4 = vpop.f32.mrb[9].mxu0  ;;  %v967_v20 = vadd.f32 %v2091_v3, %v744_v63  ;;  %v2288_v3 = vld [vmem:[#allocation10 + $0x10] sm:$0xff]  }
 0x3ed   : > { %v959_v6 = vadd.f32 %v958_v4, %v744_v63  ;;  %v2092_v7 = vpop.f32.mrb[10].mxu0  ;;  %v976_v9 = vadd.f32 %v914_v2, %v912_v1  ;;  %v2289_v4 = vld [vmem:[#allocation10 + $0x90] sm:$0xff]  }
 0x3ee   : > { %v961_v8 = vpop.f32.mrb[11].mxu0  ;;  %v2292_v7 = vld [vmem:[#allocation10 + $0x98] sm:$0xff]  }
 0x3ef   : > { %v962_v10 = vadd.f32 %v961_v8, %v744_v63  ;;  %v917_v11 = vpop.f32.mrb[4].mxu1  ;;  %v973_v12 = vadd.f32 %v972_v5, %v959_v6  ;;  %v2284_v63 = vld [vmem:[#allocation10 + $0x48] sm:$0xff]   ;;  %v2290_v5 = vld [vmem:[#allocation10 + $0x58] sm:$0xff]   ;;  %v2293_v8 = vld [vmem:[#allocation10 + $0x60] sm:$0xff]  }
 0x3f0   : > { %v918_v13 = vadd.f32 %v917_v11, %v736_v55  ;;  %v919_v14 = vpop.f32.mrb[5].mxu1  ;;  %2037 = vmatprep.subr.bf16.mxu1 %v2284_v63  ;;  %v2296_v11 = vld [vmem:[#allocation10 + $0x68] sm:$0xff]  }
 0x3f1   : > { %v920_v15 = vadd.f32 %v919_v14, %v740_v56  ;;  %v921_v17 = vpop.f32.mrb[6].mxu1  ;;  %974 = vadd.xlane.f32.xlu0 %v973_v12  ;;  %v977_v18 = vadd.f32 %v976_v9, %v962_v10  ;;  %2038 = vmatpush3.bf16.msra.mxu1 %v2285_v0  ;;  %v2294_v9 = vld [vmem:[#allocation10 + $0x20] sm:$0xff]   ;;  %v2297_v12 = vld [vmem:[#allocation10 + $0x28] sm:$0xff]   ;;  %v2299_v14 = vld [vmem:[#allocation10 + $0x70] sm:$0xff]  }
 0x3f2   : > { %v922_v19 = vpop.f32.mrb[7].mxu1  ;;  %v2301_v17 = vld [vmem:[#allocation10 + $0xb0] sm:$0xff]  }
 0x3f3   : > { %v980_v21 = vadd.f32 %v920_v15, %v918_v13  ;;  %978 = vadd.xlane.f32.xlu1 %v977_v18  ;;  %v2302_v18 = vld [vmem:[#allocation10 + $0x78] sm:$0xff]  }
 0x3f4   : > { %v2303_v19 = vld [vmem:[#allocation10 + $0x38] sm:$0xff]  }
 0x3f5   : > { %v981_v22 = vadd.f32 %v980_v21, %v967_v20 }
 0x3f7   : > { %982 = vadd.xlane.f32.xlu0 %v981_v22 }
 0x47e   : > { %v975_v30 = vpop.xlane.xlu0 %974 }
 0x47f   : > { %v985_v31 = vmul.f32 0.0026041667, %v975_v30 }
 0x480   : > { %v979_v33 = vpop.xlane.xlu1 %978 }
 0x481   : > { %v3038_v34 = vsub.f32 %v908_v60, %v985_v31  ;;  %v3040_v35 = vsub.f32 %v910_v61, %v985_v31  ;;  %v986_v36 = vmul.f32 0.0026041667, %v979_v33  ;;  %v3042_v37 = vsub.f32 %v959_v6, %v985_v31  ;;  %v2291_v6 = vld [vmem:[#allocation10 + $0x18] sm:$0xff]  }
 0x483   : > { %v3044_v38 = vsub.f32 %v912_v1, %v986_v36  ;;  %v3046_v39 = vsub.f32 %v914_v2, %v986_v36  ;;  %v3048_v40 = vsub.f32 %v962_v10, %v986_v36  ;;  %v997_v41 = vmul.f32 %v3038_v34, %v3038_v34  ;;  %v2286_v1 = vld [vmem:[#allocation10 + $0x88] sm:$0xff]   ;;  %v2287_v2 = vld [vmem:[#allocation10 + $0x50] sm:$0xff]   ;;  %v2295_v10 = vld [vmem:[#allocation10 + $0xa0] sm:$0xff]  }
 0x484   : > { %v983_v42 = vpop.xlane.xlu0 %982  ;;  %v998_v43 = vmul.f32 %v3040_v35, %v3040_v35  ;;  %v999_v47 = vmul.f32 %v3042_v37, %v3042_v37  ;;  %2095 = vmatprep.subr.bf16.mxu0 %v2286_v1  ;;  %2039 = vmatprep.subr.bf16.mxu1 %v2287_v2  ;;  %v1042_v36 = vsub.s32 5, %v2981_v27 }
 0x485   : > { %v987_v44 = vmul.f32 0.0026041667, %v983_v42  ;;  %v1000_v45 = vmul.f32 %v3044_v38, %v3044_v38  ;;  %v1001_v46 = vmul.f32 %v3046_v39, %v3046_v39  ;;  %v1002_v49 = vmul.f32 %v3048_v40, %v3048_v40  ;;  %2096 = vmatpush3.bf16.msra.mxu0 %v2286_v1  ;;  %2040 = vmatpush3.bf16.msra.mxu1 %v2288_v3 }
 0x486   : > { %v1006_v48 = vadd.f32 %v998_v43, %v997_v41  ;;  %2097 = vmatprep.subr.bf16.mxu0 %v2289_v4  ;;  %2041 = vmatprep.subr.bf16.mxu1 %v2290_v5  ;;  %v1078_v41 = vsub.s32 6, %v2981_v27  ;;  %v1047_v43 = vrot.slane %v3031_v54, %v3004_v26 }
 0x487   : > { %v3062_v29 = vsub.f32 %v918_v13, %v987_v44  ;;  %v3064_v52 = vsub.f32 %v920_v15, %v987_v44  ;;  %v3066_v53 = vsub.f32 %v967_v20, %v987_v44  ;;  %v1010_v55 = vadd.f32 %v1001_v46, %v1000_v45  ;;  %v2298_v13 = vld [vmem:[#allocation10 + $0xa8] sm:$0xff]   ;;  %v2300_v15 = vld [vmem:[#allocation10 + $0x30] sm:$0xff]   ;;  %v2304_v20 = vld [vmem:[#allocation10 + $0xb8] sm:$0xff]  }
 0x488   : > { %v1007_v56 = vadd.f32 %v1006_v48, %v999_v47  ;;  %v1043_v44 = vrot.slane %v3021_v51, %v1042_v36  ;;  %v1039_v45 = vrot.slane %v3021_v51, %v3004_v26  ;;  %v1083_v46 = vrot.slane %v3031_v54, %v3009_v32 }
 0x489   : > { %v1011_v57 = vadd.f32 %v1010_v55, %v1002_v49  ;;  %v1003_v58 = vmul.f32 %v3062_v29, %v3062_v29  ;;  %v1004_v59 = vmul.f32 %v3064_v52, %v3064_v52  ;;  %v1005_v60 = vmul.f32 %v3066_v53, %v3066_v53  ;;  %2098 = vmatpush3.bf16.msra.mxu0 %v2289_v4 }
 0x48a   : > { %1008 = vadd.xlane.f32.xlu1 %v1007_v56  ;;  %2042 = vmatpush3.bf16.msra.mxu1 %v2291_v6  ;;  %v1079_v47 = vrot.slane %v3021_v51, %v1078_v41  ;;  %v1075_v48 = vrot.slane %v3021_v51, %v3009_v32  ;;  %v1058_v49 = vrot.slane %v1043_v44, %v3004_v26 }
 0x48b   : > { %1012 = vadd.xlane.f32.xlu0 %v1011_v57  ;;  %v1014_v61 = vadd.f32 %v1004_v59, %v1003_v58  ;;  %2099 = vmatprep.subr.bf16.mxu0 %v2292_v7  ;;  %v1062_v55 = vrot.slane %v1047_v43, %v3004_v26  ;;  %v1054_v56 = vrot.slane %v1039_v45, %v3004_v26 }
 0x48c   : > { %2043 = vmatprep.subr.bf16.mxu1 %v2293_v8  ;;  %v1094_v58 = vrot.slane %v1079_v47, %v3009_v32  ;;  %v1098_v59 = vrot.slane %v1083_v46, %v3009_v32  ;;  %v1090_v51 = vrot.slane %v1075_v48, %v3009_v32 }
 0x48d   : > { %v1015_v62 = vadd.f32 %v1014_v61, %v1005_v60  ;;  %2100 = vmatpush3.bf16.msra.mxu0 %v2292_v7 }
 0x48e   : > { %2044 = vmatpush3.bf16.msra.mxu1 %v2294_v9  ;;  %2101 = vmatprep.subr.bf16.mxu0 %v2295_v10 }
 0x48f   : > { %1016 = vadd.xlane.f32.xlu1 %v1015_v62  ;;  %2045 = vmatprep.subr.bf16.mxu1 %v2296_v11 }
 0x491   : > { %2102 = vmatpush3.bf16.msra.mxu0 %v2295_v10 }
 0x492   : > { %2046 = vmatpush3.bf16.msra.mxu1 %v2297_v12  ;;  %2103 = vmatprep.subr.bf16.mxu0 %v2298_v13 }
 0x493   : > { %2047 = vmatprep.subr.bf16.mxu1 %v2299_v14 }
 0x495   : > { %2104 = vmatpush3.bf16.msra.mxu0 %v2298_v13 }
 0x496   : > { %2048 = vmatpush3.bf16.msra.mxu1 %v2300_v15  ;;  %2105 = vmatprep.subr.bf16.mxu0 %v2301_v17 }
 0x497   : > { %2049 = vmatprep.subr.bf16.mxu1 %v2302_v18 }
 0x499   : > { %2106 = vmatpush3.bf16.msra.mxu0 %v2301_v17 }
 0x49a   : > { %2050 = vmatpush3.bf16.msra.mxu1 %v2303_v19  ;;  %2107 = vmatprep.subr.bf16.mxu0 %v2304_v20 }
 0x49d   : > { %2108 = vmatpush3.bf16.msra.mxu0 %v2304_v20 }
 0x517   : > { %v1009_v21 = vpop.xlane.xlu1 %1008 }
 0x518   : > { %v1018_v22 = vmul.f32 0.0026041667, %v1009_v21  ;;  %v1013_v23 = vpop.xlane.xlu0 %1012 }
 0x519   : > { %v1019_v24 = vmul.f32 0.0026041667, %v1013_v23 }
 0x51a   : > { %v1021_v25 = vadd.f32 1e-05, %v1018_v22 }
 0x51b   : > { %v1022_v30 = vadd.f32 1e-05, %v1019_v24 }
 0x51c   : > { %2335 = vrsqrt.f32 %v1021_v25  ;;  %v1017_v31 = vpop.xlane.xlu1 %1016 }
 0x51d   : > { %2337 = vrsqrt.f32 %v1022_v30  ;;  %v1020_v33 = vmul.f32 0.0026041667, %v1017_v31 }
 0x51f   : > { %v1023_v42 = vadd.f32 1e-05, %v1020_v33 }
 0x521   : > { %2339 = vrsqrt.f32 %v1023_v42 }
 0x526   : > { %v2336_v57 = vpop.eup %2335 }
 0x527   : > { %v2338_v60 = vpop.eup %2337  ;;  %v1028_v54 = vmul.f32 %v2336_v57, %v3040_v35  ;;  %v1029_v61 = vmul.f32 %v2336_v57, %v3042_v37  ;;  %v1027_v62 = vmul.f32 %v2336_v57, %v3038_v34 }
 0x528   : > { %v1031_v63 = vmul.f32 %v2338_v60, %v3046_v39  ;;  %v1032_v0 = vmul.f32 %v2338_v60, %v3048_v40  ;;  %v1030_v1 = vmul.f32 %v2338_v60, %v3044_v38 }
 0x529   : > { %v1064_v2 = vmul.f32 %v1058_v49, %v1028_v54  ;;  %v1065_v3 = vmul.f32 %v1062_v55, %v1029_v61  ;;  %v1063_v4 = vmul.f32 %v1054_v56, %v1027_v62 }
 0x52a   : > { %v1067_v5 = vmul.f32 %v1058_v49, %v1031_v63  ;;  %v1068_v6 = vmul.f32 %v1062_v55, %v1032_v0  ;;  %v1066_v7 = vmul.f32 %v1054_v56, %v1030_v1 }
 0x52b   : > { %v2340_v8 = vpop.eup %2339  ;;  %v1100_v35 = vadd.f32 %v1094_v58, %v1064_v2  ;;  %v1101_v9 = vadd.f32 %v1098_v59, %v1065_v3  ;;  %v1099_v37 = vadd.f32 %v1090_v51, %v1063_v4 }
 0x52c   : > { %v1103_v10 = vadd.f32 %v1094_v58, %v1067_v5  ;;  %v1104_v34 = vadd.f32 %v1098_v59, %v1068_v6  ;;  %v1102_v11 = vadd.f32 %v1090_v51, %v1066_v7  ;;  %v1034_v12 = vmul.f32 %v2340_v8, %v3064_v52  ;;  %v2305_v6 = vld [vmem:[#allocation13] ss:$8 sps:$4 sm:$0xff]   ;;  %v2307_v7 = vld [vmem:[#allocation13 + $0x4] ss:$8 sps:$4 sm:$0xff]  }
 0x52d   : > { %v1109_v39 = vmax.f32 %v1100_v35, 0.0  ;;  %v1110_v13 = vmax.f32 %v1101_v9, 0.0  ;;  %v1108_v40 = vmax.f32 %v1099_v37, 0.0  ;;  %v1035_v38 = vmul.f32 %v2340_v8, %v3066_v53  ;;  %1584 = vmatprep.subr.bf16.mxu1 %v2307_v7  ;;  %v2308_v35 = vld [vmem:[#allocation13 + $0x10] ss:$8 sps:$4 sm:$0xff]  }
 0x52e   : > { %v1112_v14 = vmax.f32 %v1103_v10, 0.0  ;;  %v1113_v15 = vmax.f32 %v1104_v34, 0.0  ;;  %v1111_v17 = vmax.f32 %v1102_v11, 0.0  ;;  %v1070_v18 = vmul.f32 %v1058_v49, %v1034_v12 }
 0x52f   : > { %v1071_v19 = vmul.f32 %v1062_v55, %v1035_v38  ;;  %v1033_v20 = vmul.f32 %v2340_v8, %v3062_v29  ;;  %v3106_v29 = vld [vmem:[#allocation11] sm:$0x7] }
 0x530   : > { %v1118_v21 = vpack.c.bf16 %v1112_v14, %v1109_v39  ;;  %v1119_v22 = vpack.c.bf16 %v1113_v15, %v1110_v13  ;;  %v1117_v23 = vpack.c.bf16 %v1111_v17, %v1108_v40  ;;  %v1106_v24 = vadd.f32 %v1094_v58, %v1070_v18  ;;  %v2310_v8 = vld [vmem:[#allocation13 + $0x14] ss:$8 sps:$4 sm:$0xff]   ;;  %v2313_v17 = vld [vmem:[#allocation13 + $0x24] ss:$8 sps:$4 sm:$0xff]   ;;  %v2311_v18 = vld [vmem:[#allocation13 + $0x20] ss:$8 sps:$4 sm:$0xff]  }
 0x531   : > { %v1107_v25 = vadd.f32 %v1098_v59, %v1071_v19  ;;  %v1069_v30 = vmul.f32 %v1054_v56, %v1033_v20  ;;  %v1175_v46 = vrot.slane %v3106_v29, %v2984_v28  ;;  %v2316_v19 = vld [vmem:[#allocation13 + $0x34] ss:$8 sps:$4 sm:$0xff]   ;;  %v2314_v20 = vld [vmem:[#allocation13 + $0x30] ss:$8 sps:$4 sm:$0xff]  }
 0x532   : > { %1352 = vmatprep.mubr.bf16.mxu1 %v1118_v21  ;;  %2109 = vmatprep.mubr.bf16.mxu0 %v1119_v22  ;;  %v1115_v52 = vmax.f32 %v1106_v24, 0.0  ;;  %v2319_v21 = vld [vmem:[#allocation13 + $0x44] ss:$8 sps:$4 sm:$0xff]   ;;  %v2317_v22 = vld [vmem:[#allocation13 + $0x40] ss:$8 sps:$4 sm:$0xff]  }
 0x533   : > { %1353 = vmatmul.mubr.bf16.vlgmr.msra.gmra.mrb[8].mxu1 %v1117_v23  ;;  %v1116_v31 = vmax.f32 %v1107_v25, 0.0  ;;  %v1105_v33 = vadd.f32 %v1090_v51, %v1069_v30  ;;  %v2322_v23 = vld [vmem:[#allocation13 + $0x54] ss:$8 sps:$4 sm:$0xff]   ;;  %v2320_v24 = vld [vmem:[#allocation13 + $0x50] ss:$8 sps:$4 sm:$0xff]  }
 0x534   : > { %v1121_v53 = vpack.c.bf16 %v1115_v52, %v1115_v52  ;;  %1585 = vmatpush1.bf16.msra.mxu1 %v2305_v6  ;;  %v2323_v25 = vld [vmem:[#allocation13 + $0x60] ss:$8 sps:$4 sm:$0xff]   ;;  %v2325_v30 = vld [vmem:[#allocation13 + $0x64] ss:$8 sps:$4 sm:$0xff]   ;;  %v2328_v52 = vld [vmem:[#allocation13 + $0x74] ss:$8 sps:$4 sm:$0xff]  }
 0x535   : > { %v1122_v42 = vpack.c.bf16 %v1116_v31, %v1116_v31  ;;  %v1114_v43 = vmax.f32 %v1105_v33, 0.0  ;;  %1586 = vmatprep.subr.bf16.mxu1 %v2310_v8  ;;  %v2326_v31 = vld [vmem:[#allocation13 + $0x70] ss:$8 sps:$4 sm:$0xff]  }
 0x536   : > { %1360 = vmatprep.mubr.bf16.mxu1 %v1121_v53 }
 0x537   : > { %2110 = vmatmul.mubr.bf16.vlgmr.msra.gmra.mrb[12].mxu0 %v1122_v42  ;;  %v1120_v44 = vpack.c.bf16 %v1114_v43, %v1114_v43 }
 0x538   : > { %1587 = vmatpush1.bf16.msra.mxu1 %v2308_v35 }
 0x539   : > { %1588 = vmatprep.subr.bf16.mxu1 %v2313_v17 }
 0x53b   : > { %1361 = vmatmul.mubr.bf16.gmra.mrb[12].mxu1 %v1120_v44 }
 0x53c   : > { %1616 = vmatprep.mubr.bf16.mxu1 %v2646_v16  ;;  %1589 = vmatpush1.bf16.msra.mxu1 %v2311_v18 }
 0x53d   : > { %1590 = vmatprep.subr.bf16.mxu1 %v2316_v19 }
 0x540   : > { %1591 = vmatpush1.bf16.msra.mxu1 %v2314_v20 }
 0x541   : > { %1592 = vmatprep.subr.bf16.mxu1 %v2319_v21 }
 0x544   : > { %1593 = vmatpush1.bf16.msra.mxu1 %v2317_v22 }
 0x545   : > { %1594 = vmatprep.subr.bf16.mxu1 %v2322_v23 }
 0x548   : > { %1595 = vmatpush1.bf16.msra.mxu1 %v2320_v24 }
 0x549   : > { %1596 = vmatprep.subr.bf16.mxu1 %v2325_v30 }
 0x54c   : > { %1597 = vmatpush1.bf16.msra.mxu1 %v2323_v25 }
 0x54d   : > { %1598 = vmatprep.subr.bf16.mxu1 %v2328_v52 }
 0x550   : > { %1599 = vmatpush1.bf16.msra.mxu1 %v2326_v31 }
 0x606   : > { %v2051_v45 = vpop.f32.mrb[8].mxu1 }
 0x607   : > { %v2052_v47 = vpop.f32.mrb[9].mxu1 }
 0x608   : > { %v2053_v48 = vadd.f32 %v2052_v47, %v2051_v45  ;;  %v2054_v49 = vpop.f32.mrb[10].mxu1 }
 0x609   : > { %v2055_v55 = vpop.f32.mrb[11].mxu1 }
 0x60a   : > { %v2056_v56 = vadd.f32 %v2055_v55, %v2054_v49  ;;  %v2111_v57 = vpop.f32.mrb[12].mxu0  ;;  %v1355_v58 = vadd.f32 %v2053_v48, %v1175_v46  ;;  %v1452_v49 = vrot.slane %v3106_v29, %v3004_v26 }
 0x60b   : > { %v1402_v59 = vpop.f32.mrb[13].mxu0 }
 0x60c   : > { %v1403_v60 = vadd.f32 %v1402_v59, %v1355_v58  ;;  %v2112_v54 = vpop.f32.mrb[14].mxu0  ;;  %v1358_v61 = vadd.f32 %v2056_v56, %v1175_v46  ;;  %v1459_v56 = vrot.slane %v3106_v29, %v3009_v32  ;;  %v3118_v29 = vld [vmem:[%s3201_s8] sm:$0x77] }
 0x60d   : > { %v1405_v62 = vpop.f32.mrb[15].mxu0  ;;  %v1489_v7 = vrot.slane %v3118_v29, %v2984_v28  ;;  %v1493_v8 = vrot.slane %v3118_v29, %v724_v50 }
 0x60e   : > { %v1406_v51 = vadd.f32 %v1405_v62, %v1358_v61  ;;  %v2057_v63 = vpop.f32.mrb[12].mxu1  ;;  %1416 = vadd.xlane.f32.xlu0 %v1403_v60 }
 0x60f   : > { %v2058_v0 = vpop.f32.mrb[13].mxu1  ;;  %v1499_v35 = vrot.slane %v1489_v7, %v2984_v28 }
 0x610   : > { %v2059_v1 = vadd.f32 %v2058_v0, %v2057_v63  ;;  %v2060_v2 = vpop.f32.mrb[14].mxu1  ;;  %1418 = vadd.xlane.f32.xlu1 %v1406_v51 }
 0x611   : > { %v2061_v3 = vpop.f32.mrb[15].mxu1 }
 0x612   : > { %v1363_v4 = vadd.f32 %v2059_v1, %v1175_v46 }
 0x614   : > { %v1411_v5 = vadd.f32 %v2111_v57, %v1363_v4 }
 0x616   : > { %1420 = vadd.xlane.f32.xlu0 %v1411_v5 }
 0x69b   : > { %v1417_v9 = vpop.xlane.xlu0 %1416 }
 0x69c   : > { %v1422_v37 = vmul.f32 0.0078125, %v1417_v9  ;;  %v1503_v9 = vrot.slane %v1493_v8, %v2984_v28 }
 0x69d   : > { %v1419_v10 = vpop.xlane.xlu1 %1418 }
 0x69e   : > { %v1425_v34 = vsub.f32 %v1403_v60, %v1422_v37  ;;  %v1423_v11 = vmul.f32 0.0078125, %v1419_v10 }
 0x6a0   : > { %v1426_v12 = vsub.f32 %v1406_v51, %v1423_v11  ;;  %v1428_v39 = vmul.f32 %v1425_v34, %v1425_v34 }
 0x6a2   : > { %1431 = vadd.xlane.f32.xlu1 %v1428_v39  ;;  %v1429_v13 = vmul.f32 %v1426_v12, %v1426_v12 }
 0x6a3   : > { %v1421_v40 = vpop.xlane.xlu0 %1420 }
 0x6a4   : > { %v1424_v38 = vmul.f32 0.0078125, %v1421_v40  ;;  %1433 = vadd.xlane.f32.xlu0 %v1429_v13 }
 0x6a6   : > { %v1427_v14 = vsub.f32 %v1411_v5, %v1424_v38 }
 0x6a8   : > { %v1430_v15 = vmul.f32 %v1427_v14, %v1427_v14 }
 0x6aa   : > { %1435 = vadd.xlane.f32.xlu1 %v1430_v15 }
 0x72f   : > { %v1432_v33 = vpop.xlane.xlu1 %1431 }
 0x730   : > { %v1437_v53 = vmul.f32 0.0078125, %v1432_v33 }
 0x731   : > { %v1434_v42 = vpop.xlane.xlu0 %1433 }
 0x732   : > { %v1440_v43 = vadd.f32 1e-05, %v1437_v53  ;;  %v1438_v44 = vmul.f32 0.0078125, %v1434_v42 }
 0x734   : > { %2341 = vrsqrt.f32 %v1440_v43  ;;  %v1441_v45 = vadd.f32 1e-05, %v1438_v44 }
 0x736   : > { %2343 = vrsqrt.f32 %v1441_v45 }
 0x737   : > { %v1436_v46 = vpop.xlane.xlu1 %1435 }
 0x738   : > { %v1439_v47 = vmul.f32 0.0078125, %v1436_v46 }
 0x73a   : > { %v1442_v48 = vadd.f32 1e-05, %v1439_v47 }
 0x73c   : > { %2345 = vrsqrt.f32 %v1442_v48 }
 0x73e   : > { %v2342_v55 = vpop.eup %2341 }
 0x73f   : > { %v1446_v57 = vmul.f32 %v2342_v55, %v1425_v34 }
 0x740   : > { %v2344_v58 = vpop.eup %2343 }
 0x741   : > { %v1453_v59 = vmul.f32 %v1452_v49, %v1446_v57  ;;  %v1447_v60 = vmul.f32 %v2344_v58, %v1426_v12 }
 0x743   : > { %v1454_v54 = vmul.f32 %v1452_v49, %v1447_v60  ;;  %v1460_v61 = vadd.f32 %v1459_v56, %v1453_v59 }
 0x745   : > { %v1461_v62 = vadd.f32 %v1459_v56, %v1454_v54  ;;  %v1463_v63 = vmax.f32 %v1460_v61, 0.0 }
 0x746   : > { %v2346_v51 = vpop.eup %2345 }
 0x747   : > { %v1464_v0 = vmax.f32 %v1461_v62, 0.0  ;;  %v1448_v1 = vmul.f32 %v2346_v51, %v1427_v14 }
 0x749   : > { %v1466_v2 = vpack.c.bf16 %v1464_v0, %v1463_v63  ;;  %v1455_v3 = vmul.f32 %v1452_v49, %v1448_v1  ;;  %v1687_v63 = vrot.slane %v3118_v29, %v3004_v26  ;;  %v1691_v0 = vrot.slane %v3118_v29, %v1042_v36 }
 0x74b   : > { %1617 = vmatmul.mubr.bf16.vlgmr.msra.gmra.mrb[16].mxu1 %v1466_v2  ;;  %v1462_v4 = vadd.f32 %v1459_v56, %v1455_v3  ;;  %v1711_v2 = vrot.slane %v3118_v29, %v3009_v32  ;;  %v1715_v3 = vrot.slane %v3118_v29, %v1078_v41 }
 0x74c   : > { %1626 = vmatprep.mubr.bf16.mxu1 %v2646_v16 }
 0x74d   : > { %v1465_v5 = vmax.f32 %v1462_v4, 0.0  ;;  %v1697_v4 = vrot.slane %v1687_v63, %v3004_v26  ;;  %v1721_v7 = vrot.slane %v1711_v2, %v3009_v32  ;;  %v1725_v8 = vrot.slane %v1715_v3, %v3009_v32 }
 0x74f   : > { %v1467_v6 = vpack.c.bf16 %v1465_v5, %v1465_v5  ;;  %v1701_v5 = vrot.slane %v1691_v0, %v3004_v26 }
 0x753   : > { %1627 = vmatmul.mubr.bf16.gmra.mrb[20].mxu1 %v1467_v6 }
 0x81e   : > { %v1618_v16 = vpop.f32.mrb[16].mxu1 }
 0x81f   : > { %v1619_v37 = vadd.f32 %v1618_v16, %v1499_v35  ;;  %v1620_v10 = vpop.f32.mrb[17].mxu1 }
 0x820   : > { %v1621_v34 = vadd.f32 %v1620_v10, %v1503_v9  ;;  %v1622_v11 = vpop.f32.mrb[18].mxu1 }
 0x821   : > { %v1623_v12 = vadd.f32 %v1622_v11, %v1499_v35  ;;  %v1624_v39 = vpop.f32.mrb[19].mxu1 }
 0x822   : > { %v1625_v13 = vadd.f32 %v1624_v39, %v1503_v9  ;;  %v1635_v40 = vadd.f32 %v1621_v34, %v1619_v37 }
 0x824   : > { %1636 = vadd.xlane.f32.xlu0 %v1635_v40  ;;  %v1638_v38 = vadd.f32 %v1625_v13, %v1623_v12 }
 0x826   : > { %v1628_v14 = vpop.f32.mrb[20].mxu1  ;;  %1639 = vadd.xlane.f32.xlu1 %v1638_v38 }
 0x827   : > { %v1629_v15 = vadd.f32 %v1628_v14, %v1499_v35  ;;  %v1630_v17 = vpop.f32.mrb[21].mxu1 }
 0x828   : > { %v1631_v50 = vadd.f32 %v1630_v17, %v1503_v9  ;;  %v1632_v18 = vpop.f32.mrb[22].mxu1 }
 0x829   : > { %v1633_v19 = vpop.f32.mrb[23].mxu1 }
 0x82a   : > { %v1641_v20 = vadd.f32 %v1631_v50, %v1629_v15 }
 0x82c   : > { %1642 = vadd.xlane.f32.xlu0 %v1641_v20 }
 0x8b1   : > { %v1637_v28 = vpop.xlane.xlu0 %1636 }
 0x8b2   : > { %v1645_v21 = vmul.f32 0.00390625, %v1637_v28 }
 0x8b3   : > { %v1640_v22 = vpop.xlane.xlu1 %1639 }
 0x8b4   : > { %v1648_v23 = vsub.f32 %v1619_v37, %v1645_v21  ;;  %v1649_v24 = vsub.f32 %v1621_v34, %v1645_v21  ;;  %v1646_v25 = vmul.f32 0.00390625, %v1640_v22 }
 0x8b6   : > { %v1650_v30 = vsub.f32 %v1623_v12, %v1646_v25  ;;  %v1651_v52 = vsub.f32 %v1625_v13, %v1646_v25  ;;  %v1654_v31 = vmul.f32 %v1648_v23, %v1648_v23  ;;  %v1655_v33 = vmul.f32 %v1649_v24, %v1649_v24 }
 0x8b8   : > { %v1660_v53 = vadd.f32 %v1655_v33, %v1654_v31  ;;  %v1656_v42 = vmul.f32 %v1650_v30, %v1650_v30  ;;  %v1657_v43 = vmul.f32 %v1651_v52, %v1651_v52 }
 0x8b9   : > { %v1643_v44 = vpop.xlane.xlu0 %1642 }
 0x8ba   : > { %v1647_v45 = vmul.f32 0.00390625, %v1643_v44  ;;  %1661 = vadd.xlane.f32.xlu1 %v1660_v53  ;;  %v1663_v46 = vadd.f32 %v1657_v43, %v1656_v42 }
 0x8bc   : > { %v1652_v47 = vsub.f32 %v1629_v15, %v1647_v45  ;;  %v1653_v48 = vsub.f32 %v1631_v50, %v1647_v45  ;;  %1664 = vadd.xlane.f32.xlu0 %v1663_v46 }
 0x8be   : > { %v1658_v49 = vmul.f32 %v1652_v47, %v1652_v47  ;;  %v1659_v55 = vmul.f32 %v1653_v48, %v1653_v48 }
 0x8c0   : > { %v1666_v56 = vadd.f32 %v1659_v55, %v1658_v49 }
 0x8c2   : > { %1667 = vadd.xlane.f32.xlu1 %v1666_v56 }
 0x947   : > { %v1662_v57 = vpop.xlane.xlu1 %1661 }
 0x948   : > { %v1669_v58 = vmul.f32 0.00390625, %v1662_v57 }
 0x949   : > { %v1665_v59 = vpop.xlane.xlu0 %1664 }
 0x94a   : > { %v1672_v60 = vadd.f32 1e-05, %v1669_v58  ;;  %v1670_v54 = vmul.f32 0.00390625, %v1665_v59 }
 0x94c   : > { %2347 = vrsqrt.f32 %v1672_v60  ;;  %v1673_v61 = vadd.f32 1e-05, %v1670_v54 }
 0x94e   : > { %2349 = vrsqrt.f32 %v1673_v61 }
 0x94f   : > { %v1668_v62 = vpop.xlane.xlu1 %1667 }
 0x950   : > { %v1671_v51 = vmul.f32 0.00390625, %v1668_v62 }
 0x952   : > { %v1674_v1 = vadd.f32 1e-05, %v1671_v51 }
 0x954   : > { %2351 = vrsqrt.f32 %v1674_v1 }
 0x956   : > { %v2348_v6 = vpop.eup %2347 }
 0x957   : > { %v1678_v35 = vmul.f32 %v2348_v6, %v1648_v23  ;;  %v1679_v36 = vmul.f32 %v2348_v6, %v1649_v24 }
 0x958   : > { %v2350_v9 = vpop.eup %2349 }
 0x959   : > { %v1702_v16 = vmul.f32 %v1697_v4, %v1678_v35  ;;  %v1703_v37 = vmul.f32 %v1701_v5, %v1679_v36  ;;  %v1680_v10 = vmul.f32 %v2350_v9, %v1650_v30  ;;  %v1681_v27 = vmul.f32 %v2350_v9, %v1651_v52 }
 0x95b   : > { %v1726_v34 = vadd.f32 %v1721_v7, %v1702_v16  ;;  %v1727_v41 = vadd.f32 %v1725_v8, %v1703_v37  ;;  %v1704_v29 = vmul.f32 %v1697_v4, %v1680_v10  ;;  %v1705_v11 = vmul.f32 %v1701_v5, %v1681_v27 }
 0x95d   : > { %v1732_v12 = vmax.f32 %v1726_v34, 0.0  ;;  %v1733_v26 = vmax.f32 %v1727_v41, 0.0  ;;  %v1728_v39 = vadd.f32 %v1721_v7, %v1704_v29  ;;  %v1729_v13 = vadd.f32 %v1725_v8, %v1705_v11 }
 0x95e   : > { %v2352_v40 = vpop.eup %2351 }
 0x95f   : > { %1738 = vst [vmem:[%s434_s23] sm:$0xff] %v1732_v12  ;;  %1739 = vst [vmem:[%s434_s23 + $0x8] sm:$0xff] %v1733_v26  ;;  %v1734_v32 = vmax.f32 %v1728_v39, 0.0  ;;  %v1735_v38 = vmax.f32 %v1729_v13, 0.0  ;;  %v1682_v14 = vmul.f32 %v2352_v40, %v1652_v47  ;;  %v1683_v15 = vmul.f32 %v2352_v40, %v1653_v48 }
 0x961   : > { %1740 = vst [vmem:[%s434_s23 + $0x10] sm:$0xff] %v1734_v32  ;;  %1741 = vst [vmem:[%s434_s23 + $0x18] sm:$0xff] %v1735_v38  ;;  %v1706_v17 = vmul.f32 %v1697_v4, %v1682_v14  ;;  %v1707_v50 = vmul.f32 %v1701_v5, %v1683_v15 }
 0x963   : > { %v1730_v18 = vadd.f32 %v1721_v7, %v1706_v17  ;;  %v1731_v19 = vadd.f32 %v1725_v8, %v1707_v50 }
 0x965   : > { %v1736_v20 = vmax.f32 %v1730_v18, 0.0  ;;  %v1737_v28 = vmax.f32 %v1731_v19, 0.0 }
 0x967   : > { %1742 = vst [vmem:[%s434_s23 + $0x20] sm:$0xff] %v1736_v20  ;;  %1743 = vst [vmem:[%s434_s23 + $0x28] sm:$0xff] %v1737_v28 }
 0x968   : > { %2564 = shalt.err (!%p2561_p8)
}
 0x969   : > { %s2565_s9 = scalar_lea.hbm %s3147_s25, 768  ;;  %s2569_s23 = scalar_lea.hbm %s3229_s27, 1536 }
 0x96a   : > { %p2566_p7 = scmp.ne.s32.totalorder %s3147_s25, %s2565_s9  ;;  %p2570_p3 = scmp.lt.u32.totalorder %s3147_s25, %s3229_s27 }
 0x96b   : > { %p2571_p6 = scmp.lt.u32.totalorder %s2569_s23, %s2565_s9  ;;  %p2573_p0 = scmp.lt.u32.totalorder %s2565_s9, %s3147_s25 }
 0x96c   : > { %p2567_p9 = pnand %p2566_p7, %p3230_p5 }
 0x96d   : > { %p2572_p2 = por %p2571_p6, %p2570_p3 }
 0x96e   : > { %p2568_p4 = pneg %p2567_p9 }
 0x96f   : > { %p2574_p10 = por %p2573_p0, %p2572_p2 }
 0x971   : > { %p2575_p1 = pnand %p2574_p10, %p2568_p4 }
 0x973   : > { %2578 = shalt.err (!%p2575_p1)
}
 0x974   : > { %s2648_s28 = smov 256   ;;  %s2649_s24 = smov 16  }
 0x975   : > { %2141 = dma.vmem_to_hbm [thread:$0]  (%p3230_p5), %s3149_s1, 768, %s3147_s25, %s1745_s15, %s2648_s28, %s2648_s28, %s2649_s24  }
 0x976 PF: > { %s1774_s16 = sand.u32 1, %s2617_s30   ;;  %p3231_p11 = scmp.ne.s32.totalorder %s3220_s14, 0 }
 0x977   : > { %p3232_p12 = scmp.ge.s32.totalorder %s2629_s12, 2  ;;  %s1775_s19 = scalar_lea.sflag [#allocation4], %s1774_s16 }
 0x979   : > { %p2167_p13 = pnand %p3232_p12, %p3231_p11 }
 0x97b   : > { %2612 = dma.done.wait (!%p2167_p13), %s1775_s19, 768  }
 0x97c   : > { %2614 = vsyncadd (!%p2167_p13), %s1775_s19, 4294966528  ;;  %p25_p8 = scmp.ge.s32.totalorder %s2878_s17, 4   ;;  %s3233_s30 = smov %s2621_s10 }
 0x97d   : > { %s3234_s10 = smov %s2625_s11  ;;  %s3235_s11 = smov %s2889_s29 }
 0x97e   : > { %s3236_s12 = smov %s2878_s17  ;;  %27 = sbr.rel (!%p25_p8) target bundleno = 12 (0xc), region = 125 }
 0x985   :  { %1780 = vsyncpa [#allocation3], 1 }
 0x986   :  { %1782 = vsyncpa [#allocation3 + $0x1], 1 }
 0x987   :  { %1783 = vsyncpa [#allocation6], 1 }
 0x988   :  { %1784 = vsyncpa [#allocation9], 1 }
 0x989   :  { %1785 = vsyncpa [#allocation12], 1 }
 0x98a   :  { %1786 = vsyncpa [#allocation4], 1 }
 0x98b   :  { %1788 = vsyncpa [#allocation4 + $0x1], 1 }

</bundles_post_ra>
